<compile_context>
chip_gen: v7x
topology: tpu7x:2x2x1
jax: 0.10.0
libtpu: 0.0.40
codegen_flags: <defaults>
</compile_context>

<pallas_src>
import functools

import jax
import jax.numpy as jnp
from jax import lax
from jax.experimental import pallas as pl
from jax.experimental.pallas import tpu as pltpu

_NEG_BIG = -1e30  # finite "-inf": keeps max/exp NaN-free on fully-masked tiles


def _ntxent_tile_kernel(zr_ref, zc_ref, zp_ref, out_ref,
                        zrh_sc, pos_sc, m_sc, l_sc,
                        *, tile, b_valid, b_pad, inv_temp):
    i = pl.program_id(0)           # row-tile index   (parallel)
    j = pl.program_id(1)           # column-tile index (reduction)
    padded = b_valid != b_pad      # static Python bool

    @pl.when(j == 0)
    def _init():
        # Normalize the resident row tile once per row sweep, and compute the
        # positive-pair similarity against the partner tile (rows shifted by
        # b_pad).  All O(T*D) work; torch's eps=1e-8 is applied per-row norm.
        zr = zr_ref[...]
        inv_r = 1.0 / jnp.maximum(
            jnp.sqrt(jnp.sum(zr * zr, axis=-1, keepdims=True)), 1e-8)
        zrh = zr * inv_r
        zrh_sc[...] = zrh

        zp = zp_ref[...]
        inv_p = 1.0 / jnp.maximum(
            jnp.sqrt(jnp.sum(zp * zp, axis=-1, keepdims=True)), 1e-8)
        pos_sc[...] = jnp.sum(zrh * (zp * inv_p), axis=-1,
                              keepdims=True) * inv_temp

        m_sc[...] = jnp.full_like(m_sc, _NEG_BIG)
        l_sc[...] = jnp.zeros_like(l_sc)

    # Normalize the current column tile (O(T*D), hidden under the MXU work).
    zc = zc_ref[...]
    inv_c = 1.0 / jnp.maximum(
        jnp.sqrt(jnp.sum(zc * zc, axis=-1, keepdims=True)), 1e-8)
    zch = zc * inv_c

    # (T, T) cosine-similarity tile on the MXU; contract the last dim of both
    # operands so no transpose is materialized, then scale by 1/temperature.
    s = lax.dot_general(zrh_sc[...], zch, (((1,), (1,)), ((), ())),
                        preferred_element_type=jnp.float32) * inv_temp

    # Mask the diagonal (self-similarity; only present when i == j) and, if
    # the batch was padded, the padded columns — small per-tile iotas only.
    row_l = lax.broadcasted_iota(jnp.int32, (tile, tile), 0)
    col_l = lax.broadcasted_iota(jnp.int32, (tile, tile), 1)
    keep = jnp.logical_not((i == j) & (row_l == col_l))
    if padded:
        col_local = (j * tile) % b_pad + col_l   # position within its half
        keep = keep & (col_local < b_valid)
    s = jnp.where(keep, s, _NEG_BIG)

    # Online log-sum-exp update.
    m_prev = m_sc[...]
    m_new = jnp.maximum(m_prev, jnp.max(s, axis=-1, keepdims=True))
    alpha = jnp.exp(m_prev - m_new)
    p = jnp.exp(s - m_new)
    l_sc[...] = alpha * l_sc[...] + jnp.sum(p, axis=-1, keepdims=True)
    m_sc[...] = m_new

    @pl.when(j == pl.num_programs(1) - 1)
    def _finalize():
        lse = m_sc[...] + jnp.log(l_sc[...])       # (T, 1)
        loss_row = lse - pos_sc[...]               # cross-entropy, label 0
        if padded:
            row_local = (i * tile) % b_pad + lax.broadcasted_iota(
                jnp.int32, (tile, 1), 0)
            loss_row = jnp.where(row_local < b_valid, loss_row, 0.0)
        # Lane-dense, unmasked store: replicate over 128 lanes, read lane 0.
        out_ref[...] = jnp.broadcast_to(loss_row, (tile, 128))


def _round_up(x, m):
    return (x + m - 1) // m * m


def ntxent_loss(z_i, z_j, *, temperature):
    assert z_i.shape == z_j.shape and z_i.ndim == 2
    B, D = z_i.shape
    N = 2 * B

    # 128-aligned tiles; bump to 256 for large batches to keep the v6e/v7x
    # MXU and the grid pipeline well fed.  Per-step VMEM stays a few MiB, so
    # the default scoped VMEM limit suffices on v5e/v6e/v7x.
    # TODO(synk): also tile the feature dim D for very large hidden sizes.
    tile = 256 if B >= 256 else 128
    b_pad = _round_up(B, tile)
    d_pad = _round_up(D, 128)
    n_pad = 2 * b_pad
    g_half = b_pad // tile
    g = n_pad // tile

    zi = jnp.pad(z_i.astype(jnp.float32), ((0, b_pad - B), (0, d_pad - D)))
    zj = jnp.pad(z_j.astype(jnp.float32), ((0, b_pad - B), (0, d_pad - D)))
    z = jnp.concatenate([zi, zj], axis=0)                  # (n_pad, d_pad)

    kernel = functools.partial(
        _ntxent_tile_kernel, tile=tile, b_valid=B, b_pad=b_pad,
        inv_temp=float(1.0 / temperature))

    per_row = pl.pallas_call(
        kernel,
        out_shape=jax.ShapeDtypeStruct((n_pad, 128), jnp.float32),
        grid_spec=pltpu.PrefetchScalarGridSpec(
            num_scalar_prefetch=0,
            grid=(g, g),
            in_specs=[
                pl.BlockSpec((tile, d_pad), lambda i, j: (i, 0)),               # row tile
                pl.BlockSpec((tile, d_pad), lambda i, j: (j, 0)),               # col tile
                pl.BlockSpec((tile, d_pad), lambda i, j: ((i + g_half) % g, 0)),  # partner
            ],
            out_specs=pl.BlockSpec((tile, 128), lambda i, j: (i, 0)),
            scratch_shapes=[
                pltpu.VMEM((tile, d_pad), jnp.float32),    # normalized row tile
                pltpu.VMEM((tile, 1), jnp.float32),        # positive similarity
                pltpu.VMEM((tile, 1), jnp.float32),        # running max
                pltpu.VMEM((tile, 1), jnp.float32),        # running sum-exp
            ]),
        compiler_params=pltpu.CompilerParams(
            dimension_semantics=("parallel", "arbitrary")),
    )(z, z, z)

    # Tiny O(N) reduction in JAX; padded rows were zeroed in-kernel.
    return jnp.sum(per_row[:, 0]) / jnp.float32(N)


def ntxent_loss_ref(z_i, z_j, *, temperature):
    """Pure-JAX reference mirroring the PyTorch module."""
    B = z_i.shape[0]
    N = 2 * B
    z = jnp.concatenate([z_i, z_j], axis=0).astype(jnp.float32)
    norms = jnp.linalg.norm(z, axis=-1, keepdims=True)
    dots = jnp.dot(z, z.T, precision=lax.Precision.HIGHEST)
    sim = dots / jnp.maximum(norms * norms.T, 1e-8) / temperature
    idx = jnp.arange(N)
    pos = sim[idx, (idx + B) % N]
    sim_masked = jnp.where(jnp.eye(N, dtype=bool), -jnp.inf, sim)
    lse = jax.scipy.special.logsumexp(sim_masked, axis=-1)
    return jnp.sum(lse - pos) / N


if __name__ == "__main__":
    key = jax.random.PRNGKey(0)
    k1, k2, k3, k4 = jax.random.split(key, 4)

    # Small demo shape matching the module (batch=4, hidden=32).
    z_i = jax.random.normal(k1, (4, 32), dtype=jnp.float32)
    z_j = jax.random.normal(k2, (4, 32), dtype=jnp.float32)
    loss = ntxent_loss(z_i, z_j, temperature=0.5)
    jax.block_until_ready(loss)
    ref = ntxent_loss_ref(z_i, z_j, temperature=0.5)
    assert jnp.allclose(loss, ref, rtol=1e-4, atol=1e-4), (loss, ref)

    # Multi-tile case: exercises padding, diagonal gating and partner tiles.
    z_i2 = jax.random.normal(k3, (200, 96), dtype=jnp.float32)
    z_j2 = jax.random.normal(k4, (200, 96), dtype=jnp.float32)
    loss2 = ntxent_loss(z_i2, z_j2, temperature=0.2)
    jax.block_until_ready(loss2)
    ref2 = ntxent_loss_ref(z_i2, z_j2, temperature=0.2)
    assert jnp.allclose(loss2, ref2, rtol=1e-4, atol=1e-4), (loss2, ref2)

    print("KERNEL_OK")
</pallas_src>

<mosaic_0001>
module attributes {stable_mosaic.version = 11 : i64} {
  func.func @_ntxent_tile_kernel(%arg0: i32, %arg1: i32, %arg2: memref<128x128xf32, #tpu.memory_space<vmem>>, %arg3: memref<128x128xf32, #tpu.memory_space<vmem>>, %arg4: memref<128x128xf32, #tpu.memory_space<vmem>>, %arg5: memref<128x128xf32, #tpu.memory_space<vmem>>, %arg6: memref<128x128xf32, #tpu.memory_space<vmem>>, %arg7: memref<128x1xf32, #tpu.memory_space<vmem>>, %arg8: memref<128x1xf32, #tpu.memory_space<vmem>>, %arg9: memref<128x1xf32, #tpu.memory_space<vmem>>) attributes {dimension_semantics = [#tpu.dimension_semantics<parallel>, #tpu.dimension_semantics<arbitrary>], iteration_bounds = array<i64: 2, 2>, scalar_prefetch = 0 : i64, scratch_operands = 4 : i64, tpu.core_type = #tpu.core_type<tc>, window_params = [{transform_indices = @transform_0, window_bounds = array<i64: 128, 128>}, {transform_indices = @transform_1, window_bounds = array<i64: 128, 128>}, {transform_indices = @transform_2, window_bounds = array<i64: 128, 128>}, {transform_indices = @transform_3, window_bounds = array<i64: 128, 128>}]} {
    %c0_i32 = arith.constant 0 : i32
    %0 = arith.cmpi eq, %arg1, %c0_i32 : i32
    %1 = arith.extui %0 : i1 to i32
    %c0_i32_0 = arith.constant 0 : i32
    %2 = arith.cmpi ne, %1, %c0_i32_0 : i32
    scf.if %2 {
      %c0_27 = arith.constant 0 : index
      %c0_28 = arith.constant 0 : index
      %62 = vector.load %arg2[%c0_27, %c0_28] : memref<128x128xf32, #tpu.memory_space<vmem>>, vector<128x128xf32>
      %63 = arith.mulf %62, %62 : vector<128x128xf32>
      %cst_29 = arith.constant dense<0.000000e+00> : vector<128xf32>
      %64 = vector.multi_reduction <add>, %63, %cst_29 [1] : vector<128x128xf32> to vector<128xf32>
      %65 = vector.shape_cast %64 : vector<128xf32> to vector<128x1xf32>
      %66 = math.sqrt %65 : vector<128x1xf32>
      %cst_30 = arith.constant 9.99999993E-9 : f32
      %67 = vector.broadcast %cst_30 : f32 to vector<128x1xf32>
      %68 = arith.maximumf %66, %67 : vector<128x1xf32>
      %cst_31 = arith.constant 1.000000e+00 : f32
      %69 = vector.broadcast %cst_31 : f32 to vector<128x1xf32>
      %70 = arith.divf %69, %68 : vector<128x1xf32>
      %71 = vector.broadcast %70 : vector<128x1xf32> to vector<128x128xf32>
      %72 = arith.mulf %62, %71 : vector<128x128xf32>
      %c0_32 = arith.constant 0 : index
      %c0_33 = arith.constant 0 : index
      %73 = vector.load %arg6[%c0_32, %c0_33] : memref<128x128xf32, #tpu.memory_space<vmem>>, vector<128x128xf32>
      tpu.vector_store %arg6[%c0_32, %c0_33], %72 {strides = array<i32>} : memref<128x128xf32, #tpu.memory_space<vmem>>, vector<128x128xf32>,
      %c0_34 = arith.constant 0 : index
      %c0_35 = arith.constant 0 : index
      %74 = vector.load %arg4[%c0_34, %c0_35] : memref<128x128xf32, #tpu.memory_space<vmem>>, vector<128x128xf32>
      %75 = arith.mulf %74, %74 : vector<128x128xf32>
      %cst_36 = arith.constant dense<0.000000e+00> : vector<128xf32>
      %76 = vector.multi_reduction <add>, %75, %cst_36 [1] : vector<128x128xf32> to vector<128xf32>
      %77 = vector.shape_cast %76 : vector<128xf32> to vector<128x1xf32>
      %78 = math.sqrt %77 : vector<128x1xf32>
      %cst_37 = arith.constant 9.99999993E-9 : f32
      %79 = vector.broadcast %cst_37 : f32 to vector<128x1xf32>
      %80 = arith.maximumf %78, %79 : vector<128x1xf32>
      %cst_38 = arith.constant 1.000000e+00 : f32
      %81 = vector.broadcast %cst_38 : f32 to vector<128x1xf32>
      %82 = arith.divf %81, %80 : vector<128x1xf32>
      %83 = vector.broadcast %82 : vector<128x1xf32> to vector<128x128xf32>
      %84 = arith.mulf %74, %83 : vector<128x128xf32>
      %85 = arith.mulf %72, %84 : vector<128x128xf32>
      %cst_39 = arith.constant dense<0.000000e+00> : vector<128xf32>
      %86 = vector.multi_reduction <add>, %85, %cst_39 [1] : vector<128x128xf32> to vector<128xf32>
      %87 = vector.shape_cast %86 : vector<128xf32> to vector<128x1xf32>
      %cst_40 = arith.constant 2.000000e+00 : f32
      %88 = vector.broadcast %cst_40 : f32 to vector<128x1xf32>
      %89 = arith.mulf %87, %88 : vector<128x1xf32>
      %c0_41 = arith.constant 0 : index
      %c0_42 = arith.constant 0 : index
      %90 = vector.load %arg7[%c0_41, %c0_42] : memref<128x1xf32, #tpu.memory_space<vmem>>, vector<128x1xf32>
      tpu.vector_store %arg7[%c0_41, %c0_42], %89 {strides = array<i32>} : memref<128x1xf32, #tpu.memory_space<vmem>>, vector<128x1xf32>,
      %cst_43 = arith.constant -1.000000e+30 : f32
      %91 = vector.broadcast %cst_43 : f32 to vector<128x1xf32>
      %c0_44 = arith.constant 0 : index
      %c0_45 = arith.constant 0 : index
      %92 = vector.load %arg8[%c0_44, %c0_45] : memref<128x1xf32, #tpu.memory_space<vmem>>, vector<128x1xf32>
      tpu.vector_store %arg8[%c0_44, %c0_45], %91 {strides = array<i32>} : memref<128x1xf32, #tpu.memory_space<vmem>>, vector<128x1xf32>,
      %cst_46 = arith.constant 0.000000e+00 : f32
      %93 = vector.broadcast %cst_46 : f32 to vector<128x1xf32>
      %c0_47 = arith.constant 0 : index
      %c0_48 = arith.constant 0 : index
      %94 = vector.load %arg9[%c0_47, %c0_48] : memref<128x1xf32, #tpu.memory_space<vmem>>, vector<128x1xf32>
      tpu.vector_store %arg9[%c0_47, %c0_48], %93 {strides = array<i32>} : memref<128x1xf32, #tpu.memory_space<vmem>>, vector<128x1xf32>,
    } else {
    }
    %c0 = arith.constant 0 : index
    %c0_1 = arith.constant 0 : index
    %3 = vector.load %arg3[%c0, %c0_1] : memref<128x128xf32, #tpu.memory_space<vmem>>, vector<128x128xf32>
    %4 = arith.mulf %3, %3 : vector<128x128xf32>
    %cst = arith.constant dense<0.000000e+00> : vector<128xf32>
    %5 = vector.multi_reduction <add>, %4, %cst [1] : vector<128x128xf32> to vector<128xf32>
    %6 = vector.shape_cast %5 : vector<128xf32> to vector<128x1xf32>
    %7 = math.sqrt %6 : vector<128x1xf32>
    %cst_2 = arith.constant 9.99999993E-9 : f32
    %8 = vector.broadcast %cst_2 : f32 to vector<128x1xf32>
    %9 = arith.maximumf %7, %8 : vector<128x1xf32>
    %cst_3 = arith.constant 1.000000e+00 : f32
    %10 = vector.broadcast %cst_3 : f32 to vector<128x1xf32>
    %11 = arith.divf %10, %9 : vector<128x1xf32>
    %12 = vector.broadcast %11 : vector<128x1xf32> to vector<128x128xf32>
    %13 = arith.mulf %3, %12 : vector<128x128xf32>
    %c0_4 = arith.constant 0 : index
    %c0_5 = arith.constant 0 : index
    %14 = vector.load %arg6[%c0_4, %c0_5] : memref<128x128xf32, #tpu.memory_space<vmem>>, vector<128x128xf32>
    %cst_6 = arith.constant dense<0.000000e+00> : vector<128x128xf32>
    %15 = tpu.matmul %14, %13, %cst_6 {dimension_numbers = #tpu.dot_dimension_numbers<[1], [1], [0], [0], [0, 0, 1, 0], [], []>} : vector<128x128xf32>, vector<128x128xf32>, vector<128x128xf32> -> vector<128x128xf32>
    %cst_7 = arith.constant 2.000000e+00 : f32
    %16 = vector.broadcast %cst_7 : f32 to vector<128x128xf32>
    %17 = arith.mulf %15, %16 : vector<128x128xf32>
    %18 = tpu.iota {dimensions = array<i32: 0>} : vector<128x128xi32>
    %19 = tpu.iota {dimensions = array<i32: 1>} : vector<128x128xi32>
    %20 = arith.cmpi eq, %arg0, %arg1 : i32
    %21 = arith.cmpi eq, %18, %19 : vector<128x128xi32>
    %22 = vector.broadcast %20 : i1 to vector<128x128xi1>
    %23 = arith.andi %22, %21 : vector<128x128xi1>
    %cst_8 = arith.constant dense<true> : vector<128x128xi1>
    %24 = arith.xori %23, %cst_8 : vector<128x128xi1>
    %c128_i32 = arith.constant 128 : i32
    %25 = arith.muli %arg1, %c128_i32 : i32
    %c128_i32_9 = arith.constant 128 : i32
    %c0_i32_10 = arith.constant 0 : i32
    %26 = arith.cmpi eq, %c128_i32_9, %c0_i32_10 : i32
    %c1_i32 = arith.constant 1 : i32
    %27 = arith.select %26, %c1_i32, %c128_i32_9 : i32
    %28 = arith.remsi %25, %27 : i32
    %c0_i32_11 = arith.constant 0 : i32
    %29 = arith.cmpi ne, %28, %c0_i32_11 : i32
    %c0_i32_12 = arith.constant 0 : i32
    %30 = arith.cmpi slt, %28, %c0_i32_12 : i32
    %c0_i32_13 = arith.constant 0 : i32
    %31 = arith.cmpi slt, %27, %c0_i32_13 : i32
    %32 = arith.xori %30, %31 : i1
    %33 = arith.andi %32, %29 : i1
    %34 = arith.addi %28, %27 : i32
    %35 = arith.select %33, %34, %28 : i32
    %36 = vector.broadcast %35 : i32 to vector<128x128xi32>
    %37 = arith.addi %36, %19 : vector<128x128xi32>
    %c4_i32 = arith.constant 4 : i32
    %38 = vector.broadcast %c4_i32 : i32 to vector<128x128xi32>
    %39 = arith.cmpi slt, %37, %38 : vector<128x128xi32>
    %40 = arith.andi %24, %39 : vector<128x128xi1>
    %cst_14 = arith.constant -1.000000e+30 : f32
    %41 = vector.broadcast %cst_14 : f32 to vector<128x128xf32>
    %42 = arith.select %40, %17, %41 : vector<128x128xi1>, vector<128x128xf32>
    %c0_15 = arith.constant 0 : index
    %c0_16 = arith.constant 0 : index
    %43 = vector.load %arg8[%c0_15, %c0_16] : memref<128x1xf32, #tpu.memory_space<vmem>>, vector<128x1xf32>
    %cst_17 = arith.constant dense<0xFF800000> : vector<128xf32>
    %44 = vector.multi_reduction <maximumf>, %42, %cst_17 [1] : vector<128x128xf32> to vector<128xf32>
    %45 = vector.shape_cast %44 : vector<128xf32> to vector<128x1xf32>
    %46 = arith.maximumf %43, %45 : vector<128x1xf32>
    %47 = arith.subf %43, %46 : vector<128x1xf32>
    %48 = math.exp %47 : vector<128x1xf32>
    %49 = vector.broadcast %46 : vector<128x1xf32> to vector<128x128xf32>
    %50 = arith.subf %42, %49 : vector<128x128xf32>
    %51 = math.exp %50 : vector<128x128xf32>
    %c0_18 = arith.constant 0 : index
    %c0_19 = arith.constant 0 : index
    %52 = vector.load %arg9[%c0_18, %c0_19] : memref<128x1xf32, #tpu.memory_space<vmem>>, vector<128x1xf32>
    %53 = arith.mulf %48, %52 : vector<128x1xf32>
    %cst_20 = arith.constant dense<0.000000e+00> : vector<128xf32>
    %54 = vector.multi_reduction <add>, %51, %cst_20 [1] : vector<128x128xf32> to vector<128xf32>
    %55 = vector.shape_cast %54 : vector<128xf32> to vector<128x1xf32>
    %56 = arith.addf %53, %55 : vector<128x1xf32>
    %c0_21 = arith.constant 0 : index
    %c0_22 = arith.constant 0 : index
    %57 = vector.load %arg9[%c0_21, %c0_22] : memref<128x1xf32, #tpu.memory_space<vmem>>, vector<128x1xf32>
    tpu.vector_store %arg9[%c0_21, %c0_22], %56 {strides = array<i32>} : memref<128x1xf32, #tpu.memory_space<vmem>>, vector<128x1xf32>,
    %c0_23 = arith.constant 0 : index
    %c0_24 = arith.constant 0 : index
    %58 = vector.load %arg8[%c0_23, %c0_24] : memref<128x1xf32, #tpu.memory_space<vmem>>, vector<128x1xf32>
    tpu.vector_store %arg8[%c0_23, %c0_24], %46 {strides = array<i32>} : memref<128x1xf32, #tpu.memory_space<vmem>>, vector<128x1xf32>,
    %c1_i32_25 = arith.constant 1 : i32
    %59 = arith.cmpi eq, %arg1, %c1_i32_25 : i32
    %60 = arith.extui %59 : i1 to i32
    %c0_i32_26 = arith.constant 0 : i32
    %61 = arith.cmpi ne, %60, %c0_i32_26 : i32
    scf.if %61 {
      %c0_27 = arith.constant 0 : index
      %c0_28 = arith.constant 0 : index
      %62 = vector.load %arg8[%c0_27, %c0_28] : memref<128x1xf32, #tpu.memory_space<vmem>>, vector<128x1xf32>
      %c0_29 = arith.constant 0 : index
      %c0_30 = arith.constant 0 : index
      %63 = vector.load %arg9[%c0_29, %c0_30] : memref<128x1xf32, #tpu.memory_space<vmem>>, vector<128x1xf32>
      %64 = math.log %63 : vector<128x1xf32>
      %65 = arith.addf %62, %64 : vector<128x1xf32>
      %c0_31 = arith.constant 0 : index
      %c0_32 = arith.constant 0 : index
      %66 = vector.load %arg7[%c0_31, %c0_32] : memref<128x1xf32, #tpu.memory_space<vmem>>, vector<128x1xf32>
      %67 = arith.subf %65, %66 : vector<128x1xf32>
      %c128_i32_33 = arith.constant 128 : i32
      %68 = arith.muli %arg0, %c128_i32_33 : i32
      %c128_i32_34 = arith.constant 128 : i32
      %c0_i32_35 = arith.constant 0 : i32
      %69 = arith.cmpi eq, %c128_i32_34, %c0_i32_35 : i32
      %c1_i32_36 = arith.constant 1 : i32
      %70 = arith.select %69, %c1_i32_36, %c128_i32_34 : i32
      %71 = arith.remsi %68, %70 : i32
      %c0_i32_37 = arith.constant 0 : i32
      %72 = arith.cmpi ne, %71, %c0_i32_37 : i32
      %c0_i32_38 = arith.constant 0 : i32
      %73 = arith.cmpi slt, %71, %c0_i32_38 : i32
      %c0_i32_39 = arith.constant 0 : i32
      %74 = arith.cmpi slt, %70, %c0_i32_39 : i32
      %75 = arith.xori %73, %74 : i1
      %76 = arith.andi %75, %72 : i1
      %77 = arith.addi %71, %70 : i32
      %78 = arith.select %76, %77, %71 : i32
      %79 = tpu.iota {dimensions = array<i32: 0>} : vector<128x1xi32>
      %80 = vector.broadcast %78 : i32 to vector<128x1xi32>
      %81 = arith.addi %80, %79 : vector<128x1xi32>
      %c4_i32_40 = arith.constant 4 : i32
      %82 = vector.broadcast %c4_i32_40 : i32 to vector<128x1xi32>
      %83 = arith.cmpi slt, %81, %82 : vector<128x1xi32>
      %cst_41 = arith.constant 0.000000e+00 : f32
      %84 = vector.broadcast %cst_41 : f32 to vector<128x1xf32>
      %85 = arith.select %83, %67, %84 : vector<128x1xi1>, vector<128x1xf32>
      %86 = vector.shape_cast %85 : vector<128x1xf32> to vector<128x1xf32>
      %87 = vector.broadcast %86 : vector<128x1xf32> to vector<128x128xf32>
      %c0_42 = arith.constant 0 : index
      %c0_43 = arith.constant 0 : index
      %88 = vector.load %arg5[%c0_42, %c0_43] : memref<128x128xf32, #tpu.memory_space<vmem>>, vector<128x128xf32>
      tpu.vector_store %arg5[%c0_42, %c0_43], %87 {strides = array<i32>} : memref<128x128xf32, #tpu.memory_space<vmem>>, vector<128x128xf32>,
    } else {
    }
    return
  }
  func.func @transform_0(%arg0: i32, %arg1: i32) -> (i32, i32) {
    %c0_i32 = arith.constant 0 : i32
    %c0_i32_0 = arith.constant 0 : i32
    return %arg0, %c0_i32 : i32, i32
  }
  func.func @transform_1(%arg0: i32, %arg1: i32) -> (i32, i32) {
    %c0_i32 = arith.constant 0 : i32
    %c0_i32_0 = arith.constant 0 : i32
    return %arg1, %c0_i32 : i32, i32
  }
  func.func @transform_2(%arg0: i32, %arg1: i32) -> (i32, i32) {
    %c1_i32 = arith.constant 1 : i32
    %0 = arith.addi %arg0, %c1_i32 : i32
    %c2_i32 = arith.constant 2 : i32
    %c0_i32 = arith.constant 0 : i32
    %1 = arith.cmpi eq, %c2_i32, %c0_i32 : i32
    %c1_i32_0 = arith.constant 1 : i32
    %2 = arith.select %1, %c1_i32_0, %c2_i32 : i32
    %3 = arith.remsi %0, %2 : i32
    %c0_i32_1 = arith.constant 0 : i32
    %4 = arith.cmpi ne, %3, %c0_i32_1 : i32
    %c0_i32_2 = arith.constant 0 : i32
    %5 = arith.cmpi slt, %3, %c0_i32_2 : i32
    %c0_i32_3 = arith.constant 0 : i32
    %6 = arith.cmpi slt, %2, %c0_i32_3 : i32
    %7 = arith.xori %5, %6 : i1
    %8 = arith.andi %7, %4 : i1
    %9 = arith.addi %3, %2 : i32
    %10 = arith.select %8, %9, %3 : i32
    %c0_i32_4 = arith.constant 0 : i32
    %c0_i32_5 = arith.constant 0 : i32
    return %10, %c0_i32_4 : i32, i32
  }
  func.func @transform_3(%arg0: i32, %arg1: i32) -> (i32, i32) {
    %c0_i32 = arith.constant 0 : i32
    %c0_i32_0 = arith.constant 0 : i32
    return %arg0, %c0_i32 : i32, i32
  }
}

</mosaic_0001>

<bundles_post_ra>
// kernel: tpu_custom_call.1
= control target key start
LH: loop header
LB: loop body
LE: loop exit
PB: predicated region body
PF: predicated region fallthrough
CT: control target
= control target key end

     0   :  { %s5081_s0 = inlined_call_operand.hbm [shape: f32[256,128], index: 0, kind: input, shape index: {}]   ;;  %s5082_s1 = inlined_call_operand.hbm [shape: f32[256,128], index: 1, kind: input, shape index: {}]   ;;  %s5083_s2 = inlined_call_operand.hbm [shape: f32[256,128], index: 2, kind: input, shape index: {}]   ;;  %s5084_s3 = inlined_call_operand.hbm [shape: f32[256,128], index: 3, kind: output, shape index: {}]  }
   0x1   :  { %5127 = sst [smem:[#allocation50_spill]] %s5081_s0 }
   0x2   :  { %5128 = sst [smem:[#allocation51_spill]] %s5082_s1 }
   0x3   :  { %5129 = sst [smem:[#allocation52_spill]] %s5084_s3 }
   0x4   :  { %8 = vsyncpa [#allocation7], 0 }
   0x5   :  { %10 = vsyncpa [#allocation7 + $0x1], 0 }
   0x6   :  { %11 = vsyncpa [#allocation10], 0 }
   0x7   :  { %13 = vsyncpa [#allocation10 + $0x1], 0 }
   0x8   :  { %14 = vsyncpa [#allocation8], 0 }
   0x9   :  { %16 = vsyncpa [#allocation8 + $0x1], 0  ;;  %s3156_s12 = smov 0   ;;  %s3158_s13 = smov 0  }
   0xa   :  { %s3160_s14 = smov 0   ;;  %s3162_s15 = smov 0  }
   0xb   :  { %s3164_s16 = smov 0   ;;  %s3166_s17 = smov 0  }
   0xc   :  { %s3168_s18 = smov 0   ;;  %s3170_s19 = smov 0  }
   0xd   :  { %s3172_s20 = smov 0   ;;  %s3174_s21 = smov 0  }
   0xe   :  { %s3176_s22 = smov 0   ;;  %s3178_s23 = smov 0  }
   0xf   :  { %s3180_s24 = smov 0   ;;  %s3182_s25 = smov 0  }
  0x10 LB: > { %5130 = sst [smem:[#allocation17_spill]] %s3089_s17  ;;  %s3225_s26 = sadd.s32 4294967295, %s3121_s25   ;;  %s3121_s25 = sphi %s3182_s25, %s22_s25   ;;  %s3117_s24 = sphi %s3180_s24, %s5302_s24   ;;  %s3113_s23 = sphi %s3178_s23, %s5290_s23   ;;  %s3109_s22 = sphi %s3176_s22, %s5301_s22   ;;  %s3105_s21 = sphi %s3174_s21, %s5288_s21   ;;  %s3101_s20 = sphi %s3172_s20, %s5300_s20   ;;  %s3097_s19 = sphi %s3170_s19, %s5299_s19   ;;  %s3093_s18 = sphi %s3168_s18, %s5298_s18   ;;  %s3089_s17 = sphi %s3166_s17, %s5286_s17   ;;  %s3085_s16 = sphi %s3164_s16, %s5297_s16   ;;  %s3081_s15 = sphi %s3162_s15, %s5296_s15   ;;  %s3077_s14 = sphi %s3160_s14, %s5295_s14   ;;  %s3073_s13 = sphi %s3158_s13, %s5294_s13   ;;  %s3069_s12 = sphi %s3156_s12, %s5293_s12  }
  0x11   : > { %5131 = sst [smem:[#allocation18_spill]] %s3109_s22  ;;  %s31_s27 = sadd.s32 1, %s3113_s23 }
  0x12   : > { %5132 = sst [smem:[#allocation19_spill]] %s3113_s23  ;;  %p3228_p0 = scmp.ge.s32.totalorder %s31_s27, 2 }
  0x13   : > { %5133 = sst [smem:[#allocation20_spill]] %s3117_s24  ;;  %p5089_p1 = scmp.eq.s32.totalorder %s3121_s25, 0 }
  0x14   : > { %p5088_p2 = scmp.eq.s32.totalorder %s3225_s26, 0  ;;  %s67_s29 = sadd.s32 1, %s3089_s17 }
  0x15   : > { %s5304_s27 = smov (%p3228_p0, %s31_s27), 0  ;;  %p74_p3 = scmp.ne.s32.totalorder %s3089_s17, %s3085_s16 }
  0x16   : > { %5135 = sst [smem:[#allocation21_spill]] %s5304_s27  ;;  %p80_p4 = scmp.ne.s32.totalorder %s3085_s16, %s3081_s15 }
  0x17   : > { %s64_s30 = ssub.s32 %s3113_s23, %s5304_s27  ;;  %p76_p6 = por %p74_p3, %p5089_p1 }
  0x18   : > { %p65_p5 = scmp.eq.s32.totalorder %s64_s30, 0  ;;  %p3248_p7 = por %p80_p4, %p5088_p2 }
  0x19   : > { %p5087_p8 = scmp.lt.s32.totalorder %s3121_s25, 4  ;;  %s203_s6 = sand.u32 1, %s3121_s25  }
  0x1a   : > { %s5136_s4 = scalar_select %p3248_p7, 1, 0 }
  0x1b   : > { %s3254_s5 = scalar_select %p65_p5, %s3089_s17, %s67_s29  }
  0x1c   : > { %s205_s7 = sand.u32 1, %s3089_s17   ;;  %s2294_s9 = sshll.u32 %s3113_s23, 11 }
  0x1d   : > { %5137 = sst [smem:[#allocation22_spill]] %s3254_s5  ;;  %s2264_s8 = sshll.u32 %s205_s7, 7 }
  0x1e   : > { %s5138_s1 = sld [smem:[#allocation51_spill]]  ;;  %s207_s30 = scalar_lea.vmem [#allocation9], %s2264_s8 }
  0x1f   : > { %s214_s27 = sshll.u32 %s207_s30, 4  ;;  %p3268_p9 = pnand %p5087_p8, %p76_p6  ;;  %s3264_s27 = int_to_ptr.vmem [resolvable:$true] %s214_s27 }
  0x20   : > { %s3274_s7 = scalar_lea.sflag [#allocation10], %s203_s6 }
  0x21   : > { %p2879_p13 = pneg %p3268_p9 }
  0x24   : > { %s3262_s15 = scalar_lea.hbm %s5138_s1, %s2294_s9  ;;  %s2882_s11 = scalar_lea.hbm %s5138_s1, 4096 }
  0x25   : > { %s2877_s9 = scalar_lea.hbm %s3262_s15, 2048  ;;  %p2883_p5 = scmp.lt.u32.totalorder %s3262_s15, %s5138_s1 }
  0x26   : > { %p2878_p12 = scmp.ne.s32.totalorder %s3262_s15, %s2877_s9  ;;  %p2884_p6 = scmp.lt.u32.totalorder %s2882_s11, %s2877_s9 }
  0x27   : > { %p2886_p2 = scmp.lt.u32.totalorder %s2877_s9, %s3262_s15 }
  0x28   : > { %p2880_p3 = pnand %p2879_p13, %p2878_p12  ;;  %p2885_p8 = por %p2884_p6, %p2883_p5 }
  0x2a   : > { %p2881_p4 = pneg %p2880_p3  ;;  %p2887_p1 = por %p2886_p2, %p2885_p8 }
  0x2c   : > { %p2888_p10 = pnand %p2887_p1, %p2881_p4 }
  0x2e   : > { %2891 = shalt.err (!%p2888_p10)
}
  0x2f   : > { %s2892_s6 = scalar_lea.vmem %s3264_s27, 2048  ;;  %s3123_s8 = smov [#allocation9]  }
  0x30   : > { %p2893_p12 = scmp.ne.s32.totalorder %s3264_s27, %s2892_s6  ;;  %s2897_s10 = sshll.u32 %s3123_s8, 4  ;;  %s2898_s10 = int_to_ptr.vmem [resolvable:$false] %s2897_s10 }
  0x31   : > { %s2899_s23 = scalar_lea.vmem %s2898_s10, 4096  ;;  %p2900_p7 = scmp.lt.s32.totalorder %s3264_s27, %s2898_s10 }
  0x32   : > { %p2895_p3 = pnand %p2893_p12, %p2879_p13  ;;  %p2901_p5 = scmp.lt.s32.totalorder %s2899_s23, %s2892_s6 }
  0x34   : > { %p2896_p11 = pneg %p2895_p3  ;;  %p2902_p6 = por %p2901_p5, %p2900_p7 }
  0x36   : > { %p2903_p2 = pnand %p2902_p6, %p2896_p11 }
  0x38   : > { %2906 = shalt.err (!%p2903_p2)
}
  0x39   : > { %s5091_s9 = smov 128   ;;  %s5093_s11 = smov 8  }
  0x3a   : > { %2447 = dma.hbm_to_vmem [thread:$0]  (!%p3268_p9), %s3262_s15, 2048, %s3264_s27, %s3274_s7, %s5091_s9, %s5091_s9, %s5093_s11  }
  0x3b   : > { %p5140_p1 = scmp.lt.s32.totalorder %s3121_s25, 5  ;;  %p5141_p7 = scmp.ge.s32.totalorder %s3121_s25, 1 }
  0x3c   : > { %s2252_s6 = sadd.s32 4294967294, %s3121_s25   ;;  %s34_s8 = sadd.s32 1, %s3117_s24 }
  0x3d   : > { %p3309_p8 = pnand %p5141_p7, %p5140_p1  ;;  %s41_s23 = sadd.s32 1, %s3101_s20 }
  0x3e   : > { %s35_s10 = scalar_select %p3228_p0, %s34_s8, %s3117_s24 }
  0x3f   : > { %p48_p10 = scmp.ne.s32.totalorder %s3101_s20, %s3097_s19  ;;  %p54_p13 = scmp.ne.s32.totalorder %s3097_s19, %s3093_s18 }
  0x40   : > { %p36_p11 = scmp.ge.s32.totalorder %s35_s10, 2  ;;  %p5143_p9 = scmp.eq.s32.totalorder %s3121_s25, 0 }
  0x41   : > { %p5146_p0 = scmp.eq.s32.totalorder %s3225_s26, 0  ;;  %s92_s15 = ssub.s32 0, %s34_s8 }
  0x42   : > { %p3328_p4 = por %p5143_p9, %p48_p10  ;;  %s5306_s10 = smov (%p36_p11, %s35_s10), 0 }
  0x43   : > { %5145 = sst [smem:[#allocation23_spill]] %s5306_s10  ;;  %p3339_p12 = por %p5146_p0, %p54_p13 }
  0x44   : > { %s38_s29 = ssub.s32 %s3117_s24, %s5306_s10  ;;  %s3345_s9 = smin.u32 %s92_s15, %s34_s8 }
  0x45   : > { %s5147_s28 = scalar_select %p3339_p12, 1, 0 }
  0x46   : > { %p39_p3 = scmp.eq.s32.totalorder %s38_s29, 0  ;;  %s103_s11 = sadd.s32 1, %s5306_s10 }
  0x47   : > { %s105_s1 = ssub.s32 0, %s103_s11  ;;  %p156_p5 = scmp.eq.s32.totalorder %s3225_s26, 3 }
  0x48   : > { %s3349_s5 = scalar_select %p39_p3, %s3101_s20, %s41_s23  }
  0x49   : > { %s2256_s17 = smin.u32 %s105_s1, %s103_s11  ;;  %p162_p6 = scmp.eq.s32.totalorder %s2252_s6, 3 }
  0x4a   : > { %5148 = sst [smem:[#allocation24_spill]] %s3349_s5  ;;  %s3352_s3 = sand.u32 1, %s2256_s17  }
  0x4b   : > { %p3357_p2 = por %p156_p5, %p48_p10  ;;  %p3364_p1 = por %p162_p6, %p54_p13 }
  0x4c   : > { %s182_s15 = sand.u32 1, %s3101_s20   ;;  %s2293_s10 = sshll.u32 %s3117_s24, 11 }
  0x4d   : > { %s5149_s22 = scalar_select %p3357_p2, 1, 0 }
  0x4e   : > { %s5150_s8 = scalar_select %p3364_p1, 1, 0 }
  0x4f   : > { %s2261_s29 = sshll.u32 %s182_s15, 7  ;;  %s5151_s0 = sld [smem:[#allocation50_spill]] }
  0x50   : > { %s186_s17 = scalar_lea.vmem [#allocation6], %s2261_s29  ;;  %p5152_p7 = scmp.lt.s32.totalorder %s3121_s25, 4 }
  0x51   : > { %s193_s11 = sshll.u32 %s186_s17, 4  ;;  %s3385_s24 = scalar_lea.sflag [#allocation7], %s182_s15  ;;  %s3375_s11 = int_to_ptr.vmem [resolvable:$true] %s193_s11 }
  0x52   : > { %p3381_p10 = pnand %p5152_p7, %p3328_p4 }
  0x54   : > { %p2909_p13 = pneg %p3381_p10 }
  0x55   : > { %s3373_s1 = scalar_lea.hbm %s5151_s0, %s2293_s10  ;;  %s2912_s27 = scalar_lea.hbm %s5151_s0, 4096 }
  0x56   : > { %s2907_s5 = scalar_lea.hbm %s3373_s1, 2048  ;;  %p2913_p4 = scmp.lt.u32.totalorder %s3373_s1, %s5151_s0 }
  0x57   : > { %p2908_p11 = scmp.ne.s32.totalorder %s3373_s1, %s2907_s5  ;;  %p2914_p3 = scmp.lt.u32.totalorder %s2912_s27, %s2907_s5 }
  0x58   : > { %p2916_p6 = scmp.lt.u32.totalorder %s2907_s5, %s3373_s1 }
  0x59   : > { %p2910_p9 = pnand %p2909_p13, %p2908_p11  ;;  %p2915_p5 = por %p2914_p3, %p2913_p4 }
  0x5b   : > { %p2911_p0 = pneg %p2910_p9  ;;  %p2917_p7 = por %p2916_p6, %p2915_p5 }
  0x5d   : > { %p2918_p1 = pnand %p2917_p7, %p2911_p0 }
  0x5f   : > { %2921 = shalt.err (!%p2918_p1)
}
  0x60   : > { %s2922_s15 = scalar_lea.vmem %s3375_s11, 2048  ;;  %s3126_s10 = smov [#allocation6]  }
  0x61   : > { %p2923_p11 = scmp.ne.s32.totalorder %s3375_s11, %s2922_s15  ;;  %s2927_s29 = sshll.u32 %s3126_s10, 4  ;;  %s2928_s29 = int_to_ptr.vmem [resolvable:$false] %s2927_s29 }
  0x62   : > { %s2929_s23 = scalar_lea.vmem %s2928_s29, 4096  ;;  %p2930_p12 = scmp.lt.s32.totalorder %s3375_s11, %s2928_s29 }
  0x63   : > { %p2925_p9 = pnand %p2923_p11, %p2909_p13  ;;  %p2931_p4 = scmp.lt.s32.totalorder %s2929_s23, %s2922_s15 }
  0x65   : > { %p2926_p2 = pneg %p2925_p9  ;;  %p2932_p3 = por %p2931_p4, %p2930_p12 }
  0x67   : > { %p2933_p5 = pnand %p2932_p3, %p2926_p2 }
  0x69   : > { %2936 = shalt.err (!%p2933_p5)
}
  0x6a   : > { %s5154_s5 = smov 8   ;;  %s5155_s27 = smov 128  }
  0x6b   : > { %2444 = dma.hbm_to_vmem [thread:$0]  (!%p3381_p10), %s3373_s1, 2048, %s3375_s11, %s3385_s24, %s5155_s27, %s5155_s27, %s5154_s5  }
  0x6c   : > { %s94_s6 = sand.u32 1, %s3345_s9   ;;  %s119_s17 = sadd.s32 1, %s3077_s14 }
  0x6d   : > { %p2255_p12 = scmp.lt.s32.totalorder %s94_s6, 0  ;;  %s101_s15 = sadd.s32 2, %s94_s6 }
  0x6e   : > { %p2258_p2 = scmp.lt.s32.totalorder %s3352_s3, 0  ;;  %s114_s10 = sadd.s32 2, %s3352_s3 }
  0x6f   : > { %s5308_s15 = smov (!%p2255_p12, %s101_s15), %s94_s6  ;;  %p126_p1 = scmp.ne.s32.totalorder %s3077_s14, %s3073_s13 }
  0x70   : > { %s5310_s10 = smov (!%p2258_p2, %s114_s10), %s3352_s3  ;;  %p132_p13 = scmp.ne.s32.totalorder %s3073_s13, %s3069_s12 }
  0x71   : > { %s116_s29 = ssub.s32 %s5308_s15, %s5310_s10  ;;  %s226_s23 = sand.u32 1, %s3077_s14  }
  0x72   : > { %p117_p0 = scmp.eq.s32.totalorder %s116_s29, 0  ;;  %p5156_p6 = scmp.eq.s32.totalorder %s3121_s25, 0 }
  0x73   : > { %p5157_p11 = scmp.eq.s32.totalorder %s3225_s26, 0  ;;  %s2267_s9 = sshll.u32 %s226_s23, 7 }
  0x74   : > { %p128_p7 = por %p126_p1, %p5156_p6  ;;  %s2295_s11 = sshll.u32 %s5308_s15, 11 }
  0x75   : > { %p3430_p9 = por %p132_p13, %p5157_p11  ;;  %s3440_s3 = scalar_lea.hbm %s5083_s2, %s2295_s11 }
  0x76   : > { %s3435_s1 = scalar_select %p117_p0, %s3077_s14, %s119_s17  }
  0x77   : > { %s5158_s24 = scalar_select %p3430_p9, 1, 0 }
  0x78   : > { %s228_s12 = scalar_lea.vmem [#allocation11], %s2267_s9  ;;  %p5159_p10 = scmp.lt.s32.totalorder %s3121_s25, 4 }
  0x79   : > { %s248_s10 = sshll.u32 %s228_s12, 4  ;;  %s2937_s17 = scalar_lea.hbm %s3440_s3, 2048  ;;  %s3442_s10 = int_to_ptr.vmem [resolvable:$true] %s248_s10 }
  0x7a   : > { %p3446_p4 = pnand %p5159_p10, %p128_p7  ;;  %p2938_p3 = scmp.ne.s32.totalorder %s3440_s3, %s2937_s17 }
  0x7b   : > { %s2942_s23 = scalar_lea.hbm %s5083_s2, 4096  ;;  %p2943_p1 = scmp.lt.u32.totalorder %s3440_s3, %s5083_s2 }
  0x7c   : > { %p2939_p5 = pneg %p3446_p4  ;;  %p2944_p13 = scmp.lt.u32.totalorder %s2942_s23, %s2937_s17 }
  0x7d   : > { %p2946_p6 = scmp.lt.u32.totalorder %s2937_s17, %s3440_s3 }
  0x7e   : > { %p2940_p12 = pnand %p2939_p5, %p2938_p3  ;;  %p2945_p0 = por %p2944_p13, %p2943_p1 }
  0x80   : > { %p2941_p2 = pneg %p2940_p12  ;;  %p2947_p7 = por %p2946_p6, %p2945_p0 }
  0x82   : > { %p2948_p11 = pnand %p2947_p7, %p2941_p2 }
  0x84   : > { %2951 = shalt.err (!%p2948_p11)
}
  0x85   : > { %s2952_s6 = scalar_lea.vmem %s3442_s10, 2048  ;;  %s3127_s12 = smov [#allocation11]  }
  0x86   : > { %p2953_p10 = scmp.ne.s32.totalorder %s3442_s10, %s2952_s6  ;;  %s2957_s0 = sshll.u32 %s3127_s12, 4  ;;  %s2958_s0 = int_to_ptr.vmem [resolvable:$false] %s2957_s0 }
  0x87   : > { %s2959_s15 = scalar_lea.vmem %s2958_s0, 4096  ;;  %p2960_p9 = scmp.lt.s32.totalorder %s3442_s10, %s2958_s0 }
  0x88   : > { %p2955_p3 = pnand %p2953_p10, %p2939_p5  ;;  %p2961_p1 = scmp.lt.s32.totalorder %s2959_s15, %s2952_s6 }
  0x8a   : > { %p2956_p12 = pneg %p2955_p3  ;;  %p2962_p13 = por %p2961_p1, %p2960_p9 }
  0x8c   : > { %p2963_p0 = pnand %p2962_p13, %p2956_p12 }
  0x8e   : > { %2966 = shalt.err (!%p2963_p0)
}
  0x8f   : > { %2450 = dma.hbm_to_vmem [thread:$0]  (!%p3446_p4), %s3440_s3, 2048, %s3442_s10, %s3274_s7, %s5155_s27, %s5155_s27, %s5154_s5  }
  0x90   : > { %260 = sbr.rel (%p3309_p8) target bundleno = 1699 (0x6a3), region = 32 }
  0x97   : > { %s3482_s17 = sand.u32 1, %s3097_s19   ;;  %p5161_p9 = scmp.ne.s32.totalorder %s5147_s28, 0 }
  0x98   : > { %s2274_s23 = sshll.u32 %s3482_s17, 7  ;;  %s263_s9 = scalar_lea.sflag [#allocation7], %s3482_s17 }
  0x99   : > { %s3486_s11 = scalar_lea.vmem [#allocation6], %s2274_s23 }
  0x9a   : > { %3052 = dma.done.wait (%p5161_p9), %s263_s9, 2048  }
  0x9b   : > { %3054 = vsyncadd (%p5161_p9), %s263_s9, 4294965248  ;;  %s271_s7 = sand.u32 1, %s3225_s26   ;;  %s273_s30 = sand.u32 1, %s3085_s16  }
  0x9c   : > { %s2275_s5 = sshll.u32 %s273_s30, 7  ;;  %s272_s27 = scalar_lea.sflag [#allocation10], %s271_s7 }
  0x9d   : > { %s3494_s3 = scalar_lea.vmem [#allocation9], %s2275_s5  ;;  %p5162_p8 = scmp.ne.s32.totalorder %s5136_s4, 0 }
  0x9f   : > { %3056 = dma.done.wait (%p5162_p8), %s272_s27, 2048  }
  0xa0   : > { %3058 = vsyncadd (%p5162_p8), %s272_s27, 4294965248  ;;  %s282_s10 = sand.u32 1, %s3073_s13   ;;  %p5163_p4 = scmp.ne.s32.totalorder %s5158_s24, 0 }
  0xa1   : > { %s2276_s29 = sshll.u32 %s282_s10, 7 }
  0xa2   : > { %s3501_s28 = scalar_lea.vmem [#allocation11], %s2276_s29 }
  0xa3   : > { %3060 = dma.done.wait (%p5163_p4), %s272_s27, 2048  }
  0xa4   : > { %3062 = vsyncadd (%p5163_p4), %s272_s27, 4294965248  ;;  %s3507_s26 = scalar_lea.vmem [#allocation12], %s2274_s23  ;;  %p2278_p5 = scmp.ne.s32.totalorder %s3105_s21, 0 }
  0xa6   : > { %337 = sbr.rel (%p2278_p5) target bundleno = 571 (0x23b), region = 48 }
  0xad   : > { %v3511_v0 = vld [vmem:[%s3486_s11 + $0x10] sm:$0xff]  ;;  %v3514_v1 = vld [vmem:[%s3486_s11] sm:$0xff]  ;;  %v3517_v2 = vld [vmem:[%s3486_s11 + $0x18] sm:$0xff]  ;;  %vm898_vm0 = vcmask 7168  }
  0xae   : > { %v356_v3 = vmul.f32 %v3511_v0, %v3511_v0  ;;  %v354_v4 = vmul.f32 %v3514_v1, %v3514_v1  ;;  %v3524_v5 = vld [vmem:[%s3486_s11 + $0x8] sm:$0xff]  ;;  %v357_v6 = vmul.f32 %v3517_v2, %v3517_v2  ;;  %v3534_v9 = vld [vmem:[%s3486_s11 + $0x20] sm:$0xff]  ;;  %v3541_v12 = vld [vmem:[%s3486_s11 + $0x38] sm:$0xff] }
  0xaf   : > { %v355_v7 = vmul.f32 %v3524_v5, %v3524_v5  ;;  %v3531_v8 = vld [vmem:[%s3486_s11 + $0x28] sm:$0xff]  ;;  %v358_v11 = vmul.f32 %v3534_v9, %v3534_v9  ;;  %v3544_v13 = vld [vmem:[%s3486_s11 + $0x30] sm:$0xff]  ;;  %v361_v14 = vmul.f32 %v3541_v12, %v3541_v12  ;;  %v346_v17 = vld [vmem:[%s3486_s11 + $0x40] sm:$0xff] }
  0xb0   : > { %374 = vadd.xlane.f32.xlu1 %v356_v3  ;;  %370 = vadd.xlane.f32.xlu0 %v354_v4  ;;  %v359_v10 = vmul.f32 %v3531_v8, %v3531_v8  ;;  %v360_v15 = vmul.f32 %v3544_v13, %v3544_v13  ;;  %v3551_v16 = vld [vmem:[%s3486_s11 + $0x48] sm:$0xff]  ;;  %v362_v19 = vmul.f32 %v346_v17, %v346_v17  ;;  %v349_v20 = vld [vmem:[%s3486_s11 + $0x58] sm:$0xff]  ;;  %v348_v21 = vld [vmem:[%s3486_s11 + $0x50] sm:$0xff]  ;;  %v3128_v3 = vmov -1e+30  }
  0xb1   : > { %5164 = vst [vmem:[#allocation25_spill] sm:$0xff] %v3551_v16  ;;  %v363_v18 = vmul.f32 %v3551_v16, %v3551_v16  ;;  %v365_v22 = vmul.f32 %v349_v20, %v349_v20  ;;  %v364_v23 = vmul.f32 %v348_v21, %v348_v21  ;;  %v351_v24 = vld [vmem:[%s3486_s11 + $0x68] sm:$0xff]  ;;  %v350_v25 = vld [vmem:[%s3486_s11 + $0x60] sm:$0xff]  ;;  %v353_v28 = vld [vmem:[%s3486_s11 + $0x78] sm:$0xff]  ;;  %v3129_v4 = vmov 0.0  }
  0xb2   : > { %v367_v26 = vmul.f32 %v351_v24, %v351_v24  ;;  %v366_v27 = vmul.f32 %v350_v25, %v350_v25  ;;  %v352_v29 = vld [vmem:[%s3486_s11 + $0x70] sm:$0xff]  ;;  %v369_v30 = vmul.f32 %v353_v28, %v353_v28  ;;  %v3563_v32 = vld [vmem:[%s3501_s28 + $0x8] sm:$0xff]  ;;  %v3566_v33 = vld [vmem:[%s3501_s28] sm:$0xff]  ;;  %915 = vst.msk [vmem:[#allocation4] sm:$0xff] %vm898_vm0, %v3128_v3 }
  0xb3   : > { %v368_v31 = vmul.f32 %v352_v29, %v352_v29  ;;  %v611_v34 = vmul.f32 %v3563_v32, %v3563_v32  ;;  %v610_v35 = vmul.f32 %v3566_v33, %v3566_v33  ;;  %v3573_v36 = vld [vmem:[%s3501_s28 + $0x18] sm:$0xff]  ;;  %v3576_v37 = vld [vmem:[%s3501_s28 + $0x10] sm:$0xff]  ;;  %v3583_v40 = vld [vmem:[%s3501_s28 + $0x28] sm:$0xff]  ;;  %916 = vst.msk [vmem:[#allocation4 + $0x8] sm:$0xff] %vm898_vm0, %v3128_v3 }
  0xb4   : > { %376 = vadd.xlane.f32.xlu1 %v357_v6  ;;  %372 = vadd.xlane.f32.xlu0 %v355_v7  ;;  %v613_v38 = vmul.f32 %v3573_v36, %v3573_v36  ;;  %v612_v39 = vmul.f32 %v3576_v37, %v3576_v37  ;;  %v3586_v41 = vld [vmem:[%s3501_s28 + $0x20] sm:$0xff]  ;;  %v615_v42 = vmul.f32 %v3583_v40, %v3583_v40  ;;  %v3593_v44 = vld [vmem:[%s3501_s28 + $0x38] sm:$0xff]  ;;  %v3596_v45 = vld [vmem:[%s3501_s28 + $0x30] sm:$0xff] }
  0xb5   : > { %v614_v43 = vmul.f32 %v3586_v41, %v3586_v41  ;;  %v617_v46 = vmul.f32 %v3593_v44, %v3593_v44  ;;  %v616_v47 = vmul.f32 %v3596_v45, %v3596_v45  ;;  %v3603_v48 = vld [vmem:[%s3501_s28 + $0x48] sm:$0xff]  ;;  %v3606_v49 = vld [vmem:[%s3501_s28 + $0x40] sm:$0xff]  ;;  %v3613_v52 = vld [vmem:[%s3501_s28 + $0x58] sm:$0xff]  ;;  %917 = vst.msk [vmem:[#allocation4 + $0x10] sm:$0xff] %vm898_vm0, %v3128_v3 }
  0xb6   : > { %5165 = vst [vmem:[#allocation26_spill] sm:$0xff] %v3603_v48  ;;  %5166 = vst [vmem:[#allocation27_spill] sm:$0xff] %v3606_v49  ;;  %v619_v50 = vmul.f32 %v3603_v48, %v3603_v48  ;;  %v618_v51 = vmul.f32 %v3606_v49, %v3606_v49  ;;  %v3616_v53 = vld [vmem:[%s3501_s28 + $0x50] sm:$0xff]  ;;  %v621_v54 = vmul.f32 %v3613_v52, %v3613_v52  ;;  %v3623_v56 = vld [vmem:[%s3501_s28 + $0x68] sm:$0xff] }
  0xb7   : > { %5167 = vst [vmem:[#allocation28_spill] sm:$0xff] %v3613_v52  ;;  %5168 = vst [vmem:[#allocation29_spill] sm:$0xff] %v3616_v53  ;;  %v620_v55 = vmul.f32 %v3616_v53, %v3616_v53  ;;  %v3626_v57 = vld [vmem:[%s3501_s28 + $0x60] sm:$0xff]  ;;  %v623_v58 = vmul.f32 %v3623_v56, %v3623_v56  ;;  %v3633_v60 = vld [vmem:[%s3501_s28 + $0x78] sm:$0xff] }
  0xb8   : > { %380 = vadd.xlane.f32.xlu1 %v359_v10  ;;  %378 = vadd.xlane.f32.xlu0 %v358_v11  ;;  %5169 = vst [vmem:[#allocation30_spill] sm:$0xff] %v3623_v56  ;;  %5170 = vst [vmem:[#allocation31_spill] sm:$0xff] %v3626_v57  ;;  %v622_v59 = vmul.f32 %v3626_v57, %v3626_v57  ;;  %v3636_v61 = vld [vmem:[%s3501_s28 + $0x70] sm:$0xff]  ;;  %v625_v62 = vmul.f32 %v3633_v60, %v3633_v60 }
  0xb9   : > { %5171 = vst [vmem:[#allocation32_spill] sm:$0xff] %v3633_v60  ;;  %5172 = vst [vmem:[#allocation33_spill] sm:$0xff] %v3636_v61  ;;  %v624_v63 = vmul.f32 %v3636_v61, %v3636_v61 }
  0xba   : > { %918 = vst.msk [vmem:[#allocation4 + $0x18] sm:$0xff] %vm898_vm0, %v3128_v3  ;;  %919 = vst.msk [vmem:[#allocation4 + $0x20] sm:$0xff] %vm898_vm0, %v3128_v3 }
  0xbb   : > { %920 = vst.msk [vmem:[#allocation4 + $0x28] sm:$0xff] %vm898_vm0, %v3128_v3  ;;  %921 = vst.msk [vmem:[#allocation4 + $0x30] sm:$0xff] %vm898_vm0, %v3128_v3 }
  0xbc   : > { %384 = vadd.xlane.f32.xlu1 %v361_v14  ;;  %382 = vadd.xlane.f32.xlu0 %v360_v15  ;;  %922 = vst.msk [vmem:[#allocation4 + $0x38] sm:$0xff] %vm898_vm0, %v3128_v3  ;;  %923 = vst.msk [vmem:[#allocation4 + $0x40] sm:$0xff] %vm898_vm0, %v3128_v3 }
  0xbd   : > { %924 = vst.msk [vmem:[#allocation4 + $0x48] sm:$0xff] %vm898_vm0, %v3128_v3  ;;  %925 = vst.msk [vmem:[#allocation4 + $0x50] sm:$0xff] %vm898_vm0, %v3128_v3 }
  0xbe   : > { %926 = vst.msk [vmem:[#allocation4 + $0x58] sm:$0xff] %vm898_vm0, %v3128_v3  ;;  %927 = vst.msk [vmem:[#allocation4 + $0x60] sm:$0xff] %vm898_vm0, %v3128_v3 }
  0xbf   : > { %928 = vst.msk [vmem:[#allocation4 + $0x68] sm:$0xff] %vm898_vm0, %v3128_v3  ;;  %929 = vst.msk [vmem:[#allocation4 + $0x70] sm:$0xff] %vm898_vm0, %v3128_v3 }
  0xc0   : > { %388 = vadd.xlane.f32.xlu1 %v363_v18  ;;  %386 = vadd.xlane.f32.xlu0 %v362_v19  ;;  %930 = vst.msk [vmem:[#allocation4 + $0x78] sm:$0xff] %vm898_vm0, %v3128_v3  ;;  %931 = vst.msk [vmem:[#allocation5] sm:$0xff] %vm898_vm0, %v3129_v4 }
  0xc1   : > { %932 = vst.msk [vmem:[#allocation5 + $0x8] sm:$0xff] %vm898_vm0, %v3129_v4  ;;  %933 = vst.msk [vmem:[#allocation5 + $0x10] sm:$0xff] %vm898_vm0, %v3129_v4 }
  0xc2   : > { %934 = vst.msk [vmem:[#allocation5 + $0x18] sm:$0xff] %vm898_vm0, %v3129_v4  ;;  %935 = vst.msk [vmem:[#allocation5 + $0x20] sm:$0xff] %vm898_vm0, %v3129_v4 }
  0xc3   : > { %936 = vst.msk [vmem:[#allocation5 + $0x28] sm:$0xff] %vm898_vm0, %v3129_v4  ;;  %937 = vst.msk [vmem:[#allocation5 + $0x30] sm:$0xff] %vm898_vm0, %v3129_v4 }
  0xc4   : > { %392 = vadd.xlane.f32.xlu1 %v365_v22  ;;  %390 = vadd.xlane.f32.xlu0 %v364_v23  ;;  %938 = vst.msk [vmem:[#allocation5 + $0x38] sm:$0xff] %vm898_vm0, %v3129_v4  ;;  %939 = vst.msk [vmem:[#allocation5 + $0x40] sm:$0xff] %vm898_vm0, %v3129_v4 }
  0xc5   : > { %940 = vst.msk [vmem:[#allocation5 + $0x48] sm:$0xff] %vm898_vm0, %v3129_v4  ;;  %941 = vst.msk [vmem:[#allocation5 + $0x50] sm:$0xff] %vm898_vm0, %v3129_v4 }
  0xc6   : > { %942 = vst.msk [vmem:[#allocation5 + $0x58] sm:$0xff] %vm898_vm0, %v3129_v4  ;;  %943 = vst.msk [vmem:[#allocation5 + $0x60] sm:$0xff] %vm898_vm0, %v3129_v4 }
  0xc7   : > { %944 = vst.msk [vmem:[#allocation5 + $0x68] sm:$0xff] %vm898_vm0, %v3129_v4  ;;  %945 = vst.msk [vmem:[#allocation5 + $0x70] sm:$0xff] %vm898_vm0, %v3129_v4 }
  0xc8   : > { %396 = vadd.xlane.f32.xlu1 %v367_v26  ;;  %394 = vadd.xlane.f32.xlu0 %v366_v27  ;;  %946 = vst.msk [vmem:[#allocation5 + $0x78] sm:$0xff] %vm898_vm0, %v3129_v4 }
  0xcc   : > { %400 = vadd.xlane.f32.xlu1 %v369_v30  ;;  %398 = vadd.xlane.f32.xlu0 %v368_v31 }
  0xd0   : > { %628 = vadd.xlane.f32.xlu1 %v611_v34  ;;  %626 = vadd.xlane.f32.xlu0 %v610_v35 }
  0xd4   : > { %632 = vadd.xlane.f32.xlu1 %v613_v38  ;;  %630 = vadd.xlane.f32.xlu0 %v612_v39 }
  0xd8   : > { %636 = vadd.xlane.f32.xlu1 %v615_v42  ;;  %634 = vadd.xlane.f32.xlu0 %v614_v43 }
  0xdc   : > { %640 = vadd.xlane.f32.xlu1 %v617_v46  ;;  %638 = vadd.xlane.f32.xlu0 %v616_v47 }
  0xe0   : > { %644 = vadd.xlane.f32.xlu1 %v619_v50  ;;  %642 = vadd.xlane.f32.xlu0 %v618_v51 }
  0xe4   : > { %648 = vadd.xlane.f32.xlu1 %v621_v54  ;;  %646 = vadd.xlane.f32.xlu0 %v620_v55 }
  0xe8   : > { %652 = vadd.xlane.f32.xlu1 %v623_v58  ;;  %650 = vadd.xlane.f32.xlu0 %v622_v59 }
  0xec   : > { %656 = vadd.xlane.f32.xlu1 %v625_v62  ;;  %654 = vadd.xlane.f32.xlu0 %v624_v63 }
 0x13d   : > { %v375_v6 = vpop.xlane.xlu1 %374  ;;  %v371_v7 = vpop.xlane.xlu0 %370 }
 0x13e   : > { %2578 = vrsqrt.f32 %v375_v6  ;;  %vm418_vm1 = vcmp.eq.f32.partialorder %v375_v6, inf  ;;  %vm420_vm2 = vcmp.eq.f32.partialorder %v375_v6, 0.0  ;;  %v421_v29 = vand.u32 2147483648, %v375_v6 }
 0x13f   : > { %2580 = vrsqrt.f32 %v371_v7  ;;  %vm404_vm3 = vcmp.eq.f32.partialorder %v371_v7, inf  ;;  %vm406_vm4 = vcmp.eq.f32.partialorder %v371_v7, 0.0  ;;  %v407_v34 = vand.u32 2147483648, %v371_v7 }
 0x141   : > { %v3674_v10 = vpop.xlane.xlu1 %376  ;;  %v3676_v11 = vpop.xlane.xlu0 %372 }
 0x142   : > { %2582 = vrsqrt.f32 %v3674_v10  ;;  %vm425_vm5 = vcmp.eq.f32.partialorder %v3674_v10, inf  ;;  %vm427_vm6 = vcmp.eq.f32.partialorder %v3674_v10, 0.0  ;;  %v428_v39 = vand.u32 2147483648, %v3674_v10 }
 0x143   : > { %2584 = vrsqrt.f32 %v3676_v11  ;;  %vm411_vm7 = vcmp.eq.f32.partialorder %v3676_v11, inf  ;;  %vm413_vm8 = vcmp.eq.f32.partialorder %v3676_v11, 0.0  ;;  %v414_v50 = vand.u32 2147483648, %v3676_v11 }
 0x145   : > { %v3678_v14 = vpop.xlane.xlu1 %380  ;;  %v3680_v15 = vpop.xlane.xlu0 %378 }
 0x146   : > { %2586 = vrsqrt.f32 %v3678_v14  ;;  %vm439_vm9 = vcmp.eq.f32.partialorder %v3678_v14, inf  ;;  %vm441_vm10 = vcmp.eq.f32.partialorder %v3678_v14, 0.0  ;;  %v442_v51 = vand.u32 2147483648, %v3678_v14 }
 0x147   : > { %2588 = vrsqrt.f32 %v3680_v15  ;;  %vm432_vm11 = vcmp.eq.f32.partialorder %v3680_v15, inf  ;;  %vm434_vm12 = vcmp.eq.f32.partialorder %v3680_v15, 0.0 }
 0x148   : > { %v2579_v21 = vpop.eup %2578 }
 0x149   : > { %v3682_v17 = vpop.xlane.xlu1 %384  ;;  %v3684_v18 = vpop.xlane.xlu0 %382  ;;  %v417_v25 = vmul.f32 %v2579_v21, %v375_v6  ;;  %v435_v21 = vand.u32 2147483648, %v3680_v15 }
 0x14a   : > { %v2581_v22 = vpop.eup %2580  ;;  %2590 = vrsqrt.f32 %v3682_v17  ;;  %vm453_vm13 = vcmp.eq.f32.partialorder %v3682_v17, inf  ;;  %vm455_vm14 = vcmp.eq.f32.partialorder %v3682_v17, 0.0  ;;  %vm446_vm15 = vcmp.eq.f32.partialorder %v3684_v18, inf }
 0x14b   : > { %2592 = vrsqrt.f32 %v3684_v18  ;;  %v403_v27 = vmul.f32 %v2581_v22, %v371_v7  ;;  %v419_v35 = vsel %vm418_vm1, %v375_v6, %v417_v25  ;;  %v456_v25 = vand.u32 2147483648, %v3682_v17 }
 0x14c   : > { %v2583_v26 = vpop.eup %2582  ;;  %v3723_v58 = vsel %vm420_vm2, %v421_v29, %v419_v35  ;;  %vm448_vm1 = vcmp.eq.f32.partialorder %v3684_v18, 0.0 }
 0x14d   : > { %v3688_v19 = vpop.xlane.xlu1 %388  ;;  %v3690_v20 = vpop.xlane.xlu0 %386  ;;  %v424_v38 = vmul.f32 %v2583_v26, %v3674_v10  ;;  %v405_v43 = vsel %vm404_vm3, %v371_v7, %v403_v27  ;;  %v449_v26 = vand.u32 2147483648, %v3684_v18 }
 0x14e   : > { %2594 = vrsqrt.f32 %v3688_v19  ;;  %v2585_v28 = vpop.eup %2584  ;;  %v3729_v59 = vsel %vm406_vm4, %v407_v34, %v405_v43  ;;  %vm467_vm2 = vcmp.eq.f32.partialorder %v3688_v19, inf  ;;  %vm469_vm3 = vcmp.eq.f32.partialorder %v3688_v19, 0.0 }
 0x14f   : > { %2596 = vrsqrt.f32 %v3690_v20  ;;  %v410_v46 = vmul.f32 %v2585_v28, %v3676_v11  ;;  %v426_v62 = vsel %vm425_vm5, %v3674_v10, %v424_v38  ;;  %v470_v38 = vand.u32 2147483648, %v3688_v19 }
 0x150   : > { %v2587_v42 = vpop.eup %2586  ;;  %v3754_v35 = vsel %vm427_vm6, %v428_v39, %v426_v62  ;;  %vm460_vm4 = vcmp.eq.f32.partialorder %v3690_v20, inf  ;;  %vm462_vm5 = vcmp.eq.f32.partialorder %v3690_v20, 0.0  ;;  %v463_v62 = vand.u32 2147483648, %v3690_v20 }
 0x151   : > { %v3694_v23 = vpop.xlane.xlu1 %392  ;;  %v3696_v24 = vpop.xlane.xlu0 %390  ;;  %v438_v63 = vmul.f32 %v2587_v42, %v3678_v14  ;;  %v412_v4 = vsel %vm411_vm7, %v3676_v11, %v410_v46 }
 0x152   : > { %2598 = vrsqrt.f32 %v3694_v23  ;;  %v2589_v47 = vpop.eup %2588  ;;  %v3761_v42 = vsel %vm413_vm8, %v414_v50, %v412_v4  ;;  %vm481_vm6 = vcmp.eq.f32.partialorder %v3694_v23, inf  ;;  %vm483_vm7 = vcmp.eq.f32.partialorder %v3694_v23, 0.0 }
 0x153   : > { %2600 = vrsqrt.f32 %v3696_v24  ;;  %v431_v6 = vmul.f32 %v2589_v47, %v3680_v15  ;;  %v440_v43 = vsel %vm439_vm9, %v3678_v14, %v438_v63  ;;  %vm474_vm8 = vcmp.eq.f32.partialorder %v3696_v24, inf }
 0x154   : > { %v2591_v3 = vpop.eup %2590  ;;  %vm476_vm9 = vcmp.eq.f32.partialorder %v3696_v24, 0.0 }
 0x155   : > { %v3701_v30 = vpop.xlane.xlu1 %396  ;;  %v3703_v31 = vpop.xlane.xlu0 %394  ;;  %v452_v46 = vmul.f32 %v2591_v3, %v3682_v17  ;;  %v433_v39 = vsel %vm432_vm11, %v3680_v15, %v431_v6 }
 0x156   : > { %2602 = vrsqrt.f32 %v3701_v30  ;;  %v2593_v7 = vpop.eup %2592  ;;  %vm497_vm11 = vcmp.eq.f32.partialorder %v3701_v30, 0.0 }
 0x157   : > { %2604 = vrsqrt.f32 %v3703_v31  ;;  %v445_v47 = vmul.f32 %v2593_v7, %v3684_v18  ;;  %v3786_v7 = vsel %vm441_vm10, %v442_v51, %v440_v43  ;;  %v454_v22 = vsel %vm453_vm13, %v3682_v17, %v452_v46 }
 0x158   : > { %v2595_v29 = vpop.eup %2594  ;;  %v484_v43 = vand.u32 2147483648, %v3694_v23  ;;  %v3820_v61 = vsel %vm455_vm14, %v456_v25, %v454_v22  ;;  %vm495_vm10 = vcmp.eq.f32.partialorder %v3701_v30, inf  ;;  %v498_v25 = vand.u32 2147483648, %v3701_v30 }
 0x159   : > { %v3718_v54 = vpop.xlane.xlu1 %400  ;;  %v3720_v55 = vpop.xlane.xlu0 %398  ;;  %v466_v50 = vmul.f32 %v2595_v29, %v3688_v19  ;;  %v3792_v29 = vsel %vm434_vm12, %v435_v21, %v433_v39  ;;  %v447_v51 = vsel %vm446_vm15, %v3684_v18, %v445_v47  ;;  %v477_v39 = vand.u32 2147483648, %v3696_v24 }
 0x15a   : > { %v2597_v10 = vpop.eup %2596  ;;  %2606 = vrsqrt.f32 %v3718_v54  ;;  %vm488_vm12 = vcmp.eq.f32.partialorder %v3703_v31, inf  ;;  %vm490_vm13 = vcmp.eq.f32.partialorder %v3703_v31, 0.0  ;;  %vm509_vm14 = vcmp.eq.f32.partialorder %v3718_v54, inf }
 0x15b   : > { %2608 = vrsqrt.f32 %v3720_v55  ;;  %v459_v11 = vmul.f32 %v2597_v10, %v3690_v20  ;;  %v468_v46 = vsel %vm467_vm2, %v3688_v19, %v466_v50  ;;  %v3826_v50 = vsel %vm448_vm1, %v449_v26, %v447_v51 }
 0x15c   : > { %v2599_v4 = vpop.eup %2598  ;;  %v3835_v17 = vsel %vm469_vm3, %v470_v38, %v468_v46  ;;  %vm511_vm15 = vcmp.eq.f32.partialorder %v3718_v54, 0.0  ;;  %vm502_vm1 = vcmp.eq.f32.partialorder %v3720_v55, inf  ;;  %vm504_vm3 = vcmp.eq.f32.partialorder %v3720_v55, 0.0 }
 0x15d   : > { %v3747_v27 = vpop.xlane.xlu1 %628  ;;  %v3749_v28 = vpop.xlane.xlu0 %626  ;;  %v480_v10 = vmul.f32 %v2599_v4, %v3694_v23  ;;  %v461_v4 = vsel %vm460_vm4, %v3690_v20, %v459_v11  ;;  %v505_v20 = vand.u32 2147483648, %v3720_v55 }
 0x15e   : > { %2610 = vrsqrt.f32 %v3747_v27  ;;  %v2601_v14 = vpop.eup %2600  ;;  %v3853_v46 = vsel %vm462_vm5, %v463_v62, %v461_v4  ;;  %vm667_vm2 = vcmp.eq.f32.partialorder %v3747_v27, inf  ;;  %vm669_vm4 = vcmp.eq.f32.partialorder %v3747_v27, 0.0 }
 0x15f   : > { %2612 = vrsqrt.f32 %v3749_v28  ;;  %v473_v21 = vmul.f32 %v2601_v14, %v3696_v24  ;;  %v482_v11 = vsel %vm481_vm6, %v3694_v23, %v480_v10  ;;  %v491_v14 = vand.u32 2147483648, %v3703_v31 }
 0x160   : > { %v2603_v15 = vpop.eup %2602  ;;  %v512_v10 = vand.u32 2147483648, %v3718_v54  ;;  %v3867_v4 = vsel %vm483_vm7, %v484_v43, %v482_v11  ;;  %vm660_vm5 = vcmp.eq.f32.partialorder %v3749_v28, inf  ;;  %vm662_vm6 = vcmp.eq.f32.partialorder %v3749_v28, 0.0 }
 0x161   : > { %v3779_v63 = vpop.xlane.xlu1 %632  ;;  %v3781_v3 = vpop.xlane.xlu0 %630  ;;  %v494_v22 = vmul.f32 %v2603_v15, %v3701_v30  ;;  %v475_v6 = vsel %vm474_vm8, %v3696_v24, %v473_v21  ;;  %v663_v24 = vand.u32 2147483648, %v3749_v28 }
 0x162   : > { %2614 = vrsqrt.f32 %v3779_v63  ;;  %v2605_v18 = vpop.eup %2604  ;;  %vm681_vm7 = vcmp.eq.f32.partialorder %v3779_v63, inf  ;;  %vm683_vm8 = vcmp.eq.f32.partialorder %v3779_v63, 0.0 }
 0x163   : > { %2616 = vrsqrt.f32 %v3781_v3  ;;  %v496_v15 = vsel %vm495_vm10, %v3701_v30, %v494_v22  ;;  %v487_v26 = vmul.f32 %v2605_v18, %v3703_v31  ;;  %v3884_v22 = vsel %vm476_vm9, %v477_v39, %v475_v6 }
 0x164   : > { %v2607_v51 = vpop.eup %2606  ;;  %v670_v18 = vand.u32 2147483648, %v3747_v27  ;;  %v3893_v60 = vsel %vm497_vm11, %v498_v25, %v496_v15  ;;  %vm674_vm9 = vcmp.eq.f32.partialorder %v3781_v3, inf  ;;  %vm676_vm10 = vcmp.eq.f32.partialorder %v3781_v3, 0.0 }
 0x165   : > { %v3813_v47 = vpop.xlane.xlu1 %636  ;;  %v3815_v34 = vpop.xlane.xlu0 %634  ;;  %v508_v57 = vmul.f32 %v2607_v51, %v3718_v54  ;;  %v489_v6 = vsel %vm488_vm12, %v3703_v31, %v487_v26 }
 0x166   : > { %v2609_v62 = vpop.eup %2608  ;;  %2618 = vrsqrt.f32 %v3813_v47  ;;  %vm695_vm11 = vcmp.eq.f32.partialorder %v3813_v47, inf  ;;  %vm688_vm12 = vcmp.eq.f32.partialorder %v3815_v34, inf  ;;  %v691_v49 = vand.u32 2147483648, %v3815_v34 }
 0x167   : > { %2620 = vrsqrt.f32 %v3815_v34  ;;  %v501_v39 = vmul.f32 %v2609_v62, %v3720_v55  ;;  %v510_v25 = vsel %vm509_vm14, %v3718_v54, %v508_v57  ;;  %v3921_v57 = vsel %vm490_vm13, %v491_v14, %v489_v6 }
 0x168   : > { %v2611_v21 = vpop.eup %2610  ;;  %5173 = vst [vmem:[#allocation34_spill] sm:$0xff] %v3921_v57  ;;  %v677_v54 = vand.u32 2147483648, %v3781_v3  ;;  %vm697_vm13 = vcmp.eq.f32.partialorder %v3813_v47, 0.0  ;;  %vm690_vm14 = vcmp.eq.f32.partialorder %v3815_v34, 0.0 }
 0x169   : > { %v3846_v19 = vpop.xlane.xlu1 %640  ;;  %v3848_v38 = vpop.xlane.xlu0 %638  ;;  %v666_v56 = vmul.f32 %v2611_v21, %v3747_v27  ;;  %v684_v21 = vand.u32 2147483648, %v3779_v63  ;;  %v503_v52 = vsel %vm502_vm1, %v3720_v55, %v501_v39 }
 0x16a   : > { %v2613_v11 = vpop.eup %2612  ;;  %2622 = vrsqrt.f32 %v3846_v19  ;;  %vm702_vm1 = vcmp.eq.f32.partialorder %v3848_v38, inf }
 0x16b   : > { %2624 = vrsqrt.f32 %v3848_v38  ;;  %v659_v15 = vmul.f32 %v2613_v11, %v3749_v28  ;;  %v3927_v11 = vsel %vm511_vm15, %v512_v10, %v510_v25  ;;  %v668_v30 = vsel %vm667_vm2, %v3747_v27, %v666_v56 }
 0x16c   : > { %v2615_v51 = vpop.eup %2614  ;;  %5174 = vst [vmem:[#allocation35_spill] sm:$0xff] %v3927_v11  ;;  %v698_v56 = vand.u32 2147483648, %v3813_v47  ;;  %v671_v48 = vsel %vm669_vm4, %v670_v18, %v668_v30  ;;  %vm709_vm15 = vcmp.eq.f32.partialorder %v3846_v19, inf  ;;  %vm711_vm2 = vcmp.eq.f32.partialorder %v3846_v19, 0.0 }
 0x16d   : > { %v3878_v23 = vpop.xlane.xlu1 %644  ;;  %v3880_v43 = vpop.xlane.xlu0 %642  ;;  %v680_v31 = vmul.f32 %v2615_v51, %v3779_v63  ;;  %v661_v14 = vsel %vm660_vm5, %v3749_v28, %v659_v15 }
 0x16e   : > { %2626 = vrsqrt.f32 %v3878_v23  ;;  %v2617_v62 = vpop.eup %2616  ;;  %v664_v16 = vsel %vm662_vm6, %v663_v24, %v661_v14  ;;  %v771_v24 = vmax.f32 %v671_v48, 1e-08  ;;  %vm723_vm4 = vcmp.eq.f32.partialorder %v3878_v23, inf }
 0x16f   : > { %2628 = vrsqrt.f32 %v3880_v43  ;;  %v673_v6 = vmul.f32 %v2617_v62, %v3781_v3  ;;  %v3953_v62 = vsel %vm504_vm3, %v505_v20, %v503_v52  ;;  %v682_v57 = vsel %vm681_vm7, %v3779_v63, %v680_v31 }
 0x170   : > { %v2619_v39 = vpop.eup %2618  ;;  %v712_v52 = vand.u32 2147483648, %v3846_v19  ;;  %v705_v31 = vand.u32 2147483648, %v3848_v38  ;;  %v685_v15 = vsel %vm683_vm8, %v684_v21, %v682_v57  ;;  %vm704_vm3 = vcmp.eq.f32.partialorder %v3848_v38, 0.0 }
 0x171   : > { %v3910_v53 = vpop.xlane.xlu1 %648  ;;  %v3912_v26 = vpop.xlane.xlu0 %646  ;;  %v675_v27 = vsel %vm674_vm9, %v3781_v3, %v673_v6  ;;  %v694_v20 = vmul.f32 %v2619_v39, %v3813_v47  ;;  %v770_v39 = vmax.f32 %v664_v16, 1e-08  ;;  %vm725_vm5 = vcmp.eq.f32.partialorder %v3878_v23, 0.0 }
 0x172   : > { %2630 = vrsqrt.f32 %v3910_v53  ;;  %v2621_v51 = vpop.eup %2620  ;;  %v678_v48 = vsel %vm676_vm10, %v677_v54, %v675_v27  ;;  %v726_v11 = vand.u32 2147483648, %v3878_v23  ;;  %vm716_vm6 = vcmp.eq.f32.partialorder %v3880_v43, inf }
 0x173   : > { %2632 = vrsqrt.f32 %v3912_v26  ;;  %v687_v30 = vmul.f32 %v2621_v51, %v3815_v34  ;;  %v696_v63 = vsel %vm695_vm11, %v3813_v47, %v694_v20  ;;  %v773_v3 = vmax.f32 %v685_v15, 1e-08 }
 0x174   : > { %v2623_v55 = vpop.eup %2622  ;;  %vm718_vm7 = vcmp.eq.f32.partialorder %v3880_v43, 0.0  ;;  %v772_v20 = vmax.f32 %v678_v48, 1e-08  ;;  %vm737_vm8 = vcmp.eq.f32.partialorder %v3910_v53, inf  ;;  %v699_v15 = vsel %vm697_vm13, %v698_v56, %v696_v63 }
 0x175   : > { %v3942_v10 = vpop.xlane.xlu1 %652  ;;  %v3944_v25 = vpop.xlane.xlu0 %650  ;;  %v708_v51 = vmul.f32 %v2623_v55, %v3846_v19  ;;  %v689_v57 = vsel %vm688_vm12, %v3815_v34, %v687_v30  ;;  %v5175_v55 = vmax.f32 %v3761_v42, 1e-08  ;;  %vm739_vm9 = vcmp.eq.f32.partialorder %v3910_v53, 0.0 }
 0x176   : > { %v2625_v18 = vpop.eup %2624  ;;  %2634 = vrsqrt.f32 %v3942_v10  ;;  %v5176_v42 = vmax.f32 %v3729_v59, 1e-08  ;;  %v692_v48 = vsel %vm690_vm14, %v691_v49, %v689_v57  ;;  %v740_v47 = vand.u32 2147483648, %v3910_v53 }
 0x177   : > { %2636 = vrsqrt.f32 %v3944_v25  ;;  %v701_v21 = vmul.f32 %v2625_v18, %v3848_v38  ;;  %v719_v18 = vand.u32 2147483648, %v3880_v43  ;;  %v710_v30 = vsel %vm709_vm15, %v3846_v19, %v708_v51 }
 0x178   : > { %v2627_v6 = vpop.eup %2626  ;;  %vm730_vm10 = vcmp.eq.f32.partialorder %v3912_v26, inf  ;;  %v5177_v59 = vmax.f32 %v3754_v35, 1e-08  ;;  %v775_v49 = vmax.f32 %v699_v15, 1e-08  ;;  %v733_v63 = vand.u32 2147483648, %v3912_v26 }
 0x179   : > { %v3973_v28 = vpop.xlane.xlu1 %656  ;;  %v3979_v14 = vpop.xlane.xlu0 %654  ;;  %v722_v54 = vmul.f32 %v2627_v6, %v3878_v23  ;;  %v5178_v35 = vmax.f32 %v3723_v58, 1e-08  ;;  %vm732_vm11 = vcmp.eq.f32.partialorder %v3912_v26, 0.0  ;;  %vm751_vm12 = vcmp.eq.f32.partialorder %v3942_v10, inf }
 0x17a   : > { %2638 = vrsqrt.f32 %v3973_v28  ;;  %v2629_v16 = vpop.eup %2628  ;;  %vm744_vm13 = vcmp.eq.f32.partialorder %v3944_v25, inf  ;;  %v747_v58 = vand.u32 2147483648, %v3944_v25  ;;  %vm753_vm14 = vcmp.eq.f32.partialorder %v3942_v10, 0.0 }
 0x17b   : > { %2640 = vrsqrt.f32 %v3979_v14  ;;  %v715_v6 = vmul.f32 %v2629_v16, %v3880_v43  ;;  %v724_v56 = vsel %vm723_vm4, %v3878_v23, %v722_v54  ;;  %v713_v16 = vsel %vm711_vm2, %v712_v52, %v710_v30 }
 0x17c   : > { %2642 = vrcp.f32 %v5175_v55  ;;  %v2631_v27 = vpop.eup %2630  ;;  %v4041_v19 = vsel %vm725_vm5, %v726_v11, %v724_v56  ;;  %v754_v52 = vand.u32 2147483648, %v3942_v10  ;;  %v5179_v23 = vmax.f32 %v3786_v7, 1e-08 }
 0x17d   : > { %2644 = vrcp.f32 %v771_v24  ;;  %v703_v24 = vsel %vm702_vm1, %v3848_v38, %v701_v21  ;;  %v736_v51 = vmul.f32 %v2631_v27, %v3910_v53  ;;  %v2633_v34 = vpop.eup %2632  ;;  %v774_v21 = vmax.f32 %v692_v48, 1e-08 }
 0x17e   : > { %2646 = vrcp.f32 %v5176_v42  ;;  %v706_v57 = vsel %vm704_vm3, %v705_v31, %v703_v24  ;;  %v717_v54 = vsel %vm716_vm6, %v3880_v43, %v715_v6  ;;  %v777_v31 = vmax.f32 %v713_v16, 1e-08 }
 0x17f   : > { %2648 = vrcp.f32 %v770_v39  ;;  %v776_v27 = vmax.f32 %v706_v57, 1e-08  ;;  %v720_v15 = vsel %vm718_vm7, %v719_v18, %v717_v54  ;;  %v779_v6 = vmax.f32 %v4041_v19, 1e-08 }
 0x180   : > { %2650 = vrcp.f32 %v5177_v59  ;;  %v2635_v39 = vpop.eup %2634  ;;  %vm765_vm15 = vcmp.eq.f32.partialorder %v3973_v28, inf  ;;  %v768_v42 = vand.u32 2147483648, %v3973_v28  ;;  %v5180_v7 = vmax.f32 %v3792_v29, 1e-08 }
 0x181   : > { %2652 = vrcp.f32 %v773_v3  ;;  %v2637_v55 = vpop.eup %2636  ;;  %v738_v3 = vsel %vm737_vm8, %v3910_v53, %v736_v51  ;;  %v750_v18 = vmul.f32 %v2635_v39, %v3942_v10  ;;  %vm746_vm1 = vcmp.eq.f32.partialorder %v3944_v25, 0.0 }
 0x182   : > { %2654 = vrcp.f32 %v5178_v35  ;;  %v4064_v43 = vsel %vm739_vm9, %v740_v47, %v738_v3  ;;  %v778_v51 = vmax.f32 %v720_v15, 1e-08  ;;  %vm758_vm2 = vcmp.eq.f32.partialorder %v3979_v14, inf }
 0x183   : > { %2656 = vrcp.f32 %v772_v20  ;;  %v729_v20 = vmul.f32 %v2633_v34, %v3912_v26  ;;  %v761_v59 = vand.u32 2147483648, %v3979_v14  ;;  %v5181_v34 = vmax.f32 %v3820_v61, 1e-08 }
 0x184   : > { %v2639_v38 = vpop.eup %2638  ;;  %2658 = vrcp.f32 %v5179_v23  ;;  %vm767_vm3 = vcmp.eq.f32.partialorder %v3973_v28, 0.0  ;;  %v781_v39 = vmax.f32 %v4064_v43, 1e-08  ;;  %v752_v54 = vsel %vm751_vm12, %v3942_v10, %v750_v18 }
 0x185   : > { %v2641_v11 = vpop.eup %2640  ;;  %2660 = vrcp.f32 %v775_v49  ;;  %v731_v47 = vsel %vm730_vm10, %v3912_v26, %v729_v20  ;;  %v743_v49 = vmul.f32 %v2637_v55, %v3944_v25  ;;  %v764_v35 = vmul.f32 %v2639_v38, %v3973_v28 }
 0x186   : > { %v2643_v30 = vpop.eup %2642  ;;  %2662 = vrcp.f32 %v5180_v7  ;;  %v734_v19 = vsel %vm732_vm11, %v733_v63, %v731_v47  ;;  %v757_v23 = vmul.f32 %v2641_v11, %v3979_v14  ;;  %vm760_vm4 = vcmp.eq.f32.partialorder %v3979_v14, 0.0  ;;  %v5188_v47 = vld [vmem:[#allocation34_spill] sm:$0xff] }
 0x187   : > { %v2645_v48 = vpop.eup %2644  ;;  %v563_v24 = vmul.f32 %v2643_v30, %v3524_v5  ;;  %2664 = vrcp.f32 %v774_v21  ;;  %v5182_v21 = vmax.f32 %v3826_v50, 1e-08  ;;  %v745_v38 = vsel %vm744_vm13, %v3944_v25, %v743_v49 }
 0x188   : > { %v2647_v56 = vpop.eup %2646  ;;  %v819_v29 = vmul.f32 %v2645_v48, %v3563_v32  ;;  %2666 = vrcp.f32 %v5181_v34  ;;  %v780_v20 = vmax.f32 %v734_v19, 1e-08  ;;  %v748_v10 = vsel %vm746_vm1, %v747_v58, %v745_v38 }
 0x189   : > { %v2649_v53 = vpop.eup %2648  ;;  %579 = vst [vmem:[#allocation2 + $0x8] sm:$0xff] %v563_v24  ;;  %v562_v5 = vmul.f32 %v2647_v56, %v3514_v1  ;;  %2668 = vrcp.f32 %v777_v31  ;;  %v5183_v31 = vmax.f32 %v3835_v17, 1e-08  ;;  %v5186_v58 = vmax.f32 %v3884_v22, 1e-08 }
 0x18a   : > { %v2651_v16 = vpop.eup %2650  ;;  %v835_v32 = vmul.f32 %v819_v29, %v563_v24  ;;  %v818_v61 = vmul.f32 %v2649_v53, %v3566_v33  ;;  %2670 = vrcp.f32 %v5182_v21  ;;  %v782_v24 = vmax.f32 %v748_v10, 1e-08 }
 0x18b   : > { %v2653_v57 = vpop.eup %2652  ;;  %578 = vst [vmem:[#allocation2] sm:$0xff] %v562_v5  ;;  %v565_v1 = vmul.f32 %v2651_v16, %v3517_v2  ;;  %2672 = vrcp.f32 %v776_v27  ;;  %v5184_v27 = vmax.f32 %v3853_v46, 1e-08  ;;  %v5189_v49 = vmax.f32 %v5188_v47, 1e-08 }
 0x18c   : > { %v2655_v55 = vpop.eup %2654  ;;  %852 = vadd.xlane.f32.xlu1 %v835_v32  ;;  %v834_v33 = vmul.f32 %v818_v61, %v562_v5  ;;  %v821_v50 = vmul.f32 %v2653_v57, %v3573_v36  ;;  %2674 = vrcp.f32 %v5183_v31  ;;  %v755_v36 = vsel %vm753_vm14, %v754_v52, %v752_v54  ;;  %v5190_v5 = vld [vmem:[#allocation25_spill] sm:$0xff]  ;;  %v5191_v32 = vld [vmem:[#allocation26_spill] sm:$0xff]  ;;  %v5192_v61 = vld [vmem:[#allocation35_spill] sm:$0xff] }
 0x18d   : > { %v2657_v3 = vpop.eup %2656  ;;  %581 = vst [vmem:[#allocation2 + $0x18] sm:$0xff] %v565_v1  ;;  %v564_v2 = vmul.f32 %v2655_v55, %v3511_v0  ;;  %2676 = vrcp.f32 %v779_v6  ;;  %v766_v0 = vsel %vm765_vm15, %v3973_v28, %v764_v35  ;;  %v5185_v52 = vmax.f32 %v3867_v4, 1e-08  ;;  %v5194_v55 = vld [vmem:[#allocation27_spill] sm:$0xff] }
 0x18e   : > { %v2659_v26 = vpop.eup %2658  ;;  %850 = vadd.xlane.f32.xlu0 %v834_v33  ;;  %v837_v17 = vmul.f32 %v821_v50, %v565_v1  ;;  %v820_v63 = vmul.f32 %v2657_v3, %v3576_v37  ;;  %2678 = vrcp.f32 %v5184_v27  ;;  %v783_v7 = vmax.f32 %v755_v36, 1e-08  ;;  %v2707_v50 = vld [vmem:[%s3486_s11 + $0x58] sm:$0xff]  ;;  %v2708_v36 = vld [vmem:[%s3486_s11 + $0x50] sm:$0xff] }
 0x18f   : > { %v2661_v15 = vpop.eup %2660  ;;  %580 = vst [vmem:[#allocation2 + $0x10] sm:$0xff] %v564_v2  ;;  %v567_v11 = vmul.f32 %v2659_v26, %v3531_v8  ;;  %2680 = vrcp.f32 %v778_v51  ;;  %v759_v8 = vsel %vm758_vm2, %v3979_v14, %v757_v23  ;;  %v769_v25 = vsel %vm767_vm3, %v768_v42, %v766_v0  ;;  %v5195_v23 = vld [vmem:[#allocation28_spill] sm:$0xff] }
 0x190   : > { %v2663_v30 = vpop.eup %2662  ;;  %856 = vadd.xlane.f32.xlu1 %v837_v17  ;;  %v836_v37 = vmul.f32 %v820_v63, %v564_v2  ;;  %v823_v46 = vmul.f32 %v2661_v15, %v3583_v40  ;;  %2682 = vrcp.f32 %v5185_v52  ;;  %v762_v28 = vsel %vm760_vm4, %v761_v59, %v759_v8  ;;  %v5196_v15 = vld [vmem:[#allocation29_spill] sm:$0xff] }
 0x191   : > { %v2665_v6 = vpop.eup %2664  ;;  %583 = vst [vmem:[#allocation2 + $0x28] sm:$0xff] %v567_v11  ;;  %v566_v48 = vmul.f32 %v2663_v30, %v3534_v9  ;;  %2684 = vrcp.f32 %v781_v39  ;;  %v785_v29 = vmax.f32 %v769_v25, 1e-08  ;;  %v5193_v21 = vmax.f32 %v5192_v61, 1e-08  ;;  %v5198_v25 = vld [vmem:[#allocation31_spill] sm:$0xff] }
 0x192   : > { %v2667_v43 = vpop.eup %2666  ;;  %854 = vadd.xlane.f32.xlu0 %v836_v37  ;;  %v839_v40 = vmul.f32 %v823_v46, %v567_v11  ;;  %v822_v4 = vmul.f32 %v2665_v6, %v3586_v41  ;;  %2686 = vrcp.f32 %v5186_v58  ;;  %v5187_v41 = vmax.f32 %v3893_v60, 1e-08  ;;  %v2709_v11 = vld [vmem:[%s3486_s11 + $0x68] sm:$0xff]  ;;  %v5197_v46 = vld [vmem:[#allocation30_spill] sm:$0xff] }
 0x193   : > { %v2669_v18 = vpop.eup %2668  ;;  %582 = vst [vmem:[#allocation2 + $0x20] sm:$0xff] %v566_v48  ;;  %v569_v9 = vmul.f32 %v2667_v43, %v3541_v12  ;;  %2688 = vrcp.f32 %v780_v20  ;;  %v528_v12 = vmax.f32 %v3953_v62, 1e-08  ;;  %v784_v60 = vmax.f32 %v762_v28, 1e-08  ;;  %v2711_v58 = vld [vmem:[%s3486_s11 + $0x78] sm:$0xff] }
 0x194   : > { %v2671_v56 = vpop.eup %2670  ;;  %860 = vadd.xlane.f32.xlu1 %v839_v40  ;;  %v838_v42 = vmul.f32 %v822_v4, %v566_v48  ;;  %v825_v51 = vmul.f32 %v2669_v18, %v3593_v44  ;;  %2690 = vrcp.f32 %v5187_v41 }
 0x195   : > { %v2673_v22 = vpop.eup %2672  ;;  %585 = vst [vmem:[#allocation2 + $0x38] sm:$0xff] %v569_v9  ;;  %v568_v34 = vmul.f32 %v2671_v56, %v3544_v13  ;;  %2692 = vrcp.f32 %v783_v7  ;;  %v2710_v7 = vld [vmem:[%s3486_s11 + $0x60] sm:$0xff]  ;;  %v5199_v56 = vld [vmem:[#allocation32_spill] sm:$0xff] }
 0x196   : > { %v2675_v53 = vpop.eup %2674  ;;  %858 = vadd.xlane.f32.xlu0 %v838_v42  ;;  %v841_v14 = vmul.f32 %v825_v51, %v569_v9  ;;  %v824_v59 = vmul.f32 %v2673_v22, %v3596_v45  ;;  %2694 = vrcp.f32 %v5189_v49  ;;  %v2706_v45 = vld [vmem:[%s3486_s11 + $0x40] sm:$0xff]  ;;  %v2712_v51 = vld [vmem:[%s3486_s11 + $0x70] sm:$0xff] }
 0x197   : > { %v2677_v44 = vpop.eup %2676  ;;  %584 = vst [vmem:[#allocation2 + $0x30] sm:$0xff] %v568_v34  ;;  %v571_v16 = vmul.f32 %v2675_v53, %v5190_v5  ;;  %2696 = vrcp.f32 %v782_v24 }
 0x198   : > { %v2679_v39 = vpop.eup %2678  ;;  %864 = vadd.xlane.f32.xlu1 %v841_v14  ;;  %v840_v13 = vmul.f32 %v824_v59, %v568_v34  ;;  %v827_v62 = vmul.f32 %v2677_v44, %v5191_v32  ;;  %2698 = vrcp.f32 %v5193_v21 }
 0x199   : > { %v2681_v57 = vpop.eup %2680  ;;  %587 = vst [vmem:[#allocation2 + $0x48] sm:$0xff] %v571_v16  ;;  %v570_v54 = vmul.f32 %v2706_v45, %v2679_v39  ;;  %2700 = vrcp.f32 %v785_v29  ;;  %v5200_v29 = vld [vmem:[#allocation33_spill] sm:$0xff] }
 0x19a   : > { %v2683_v35 = vpop.eup %2682  ;;  %862 = vadd.xlane.f32.xlu0 %v840_v13  ;;  %v843_v1 = vmul.f32 %v827_v62, %v571_v16  ;;  %v826_v19 = vmul.f32 %v2681_v57, %v5194_v55  ;;  %2702 = vrcp.f32 %v528_v12 }
 0x19b   : > { %v2685_v33 = vpop.eup %2684  ;;  %586 = vst [vmem:[#allocation2 + $0x40] sm:$0xff] %v570_v54  ;;  %v573_v31 = vmul.f32 %v2707_v50, %v2683_v35  ;;  %2704 = vrcp.f32 %v784_v60 }
 0x19c   : > { %v2687_v3 = vpop.eup %2686  ;;  %868 = vadd.xlane.f32.xlu1 %v843_v1  ;;  %v842_v38 = vmul.f32 %v826_v19, %v570_v54  ;;  %v829_v2 = vmul.f32 %v2685_v33, %v5195_v23 }
 0x19d   : > { %v2689_v26 = vpop.eup %2688  ;;  %589 = vst [vmem:[#allocation2 + $0x58] sm:$0xff] %v573_v31  ;;  %v572_v17 = vmul.f32 %v2708_v36, %v2687_v3 }
 0x19e   : > { %v2691_v63 = vpop.eup %2690  ;;  %866 = vadd.xlane.f32.xlu0 %v842_v38  ;;  %v845_v27 = vmul.f32 %v829_v2, %v573_v31  ;;  %v828_v20 = vmul.f32 %v2689_v26, %v5196_v15 }
 0x19f   : > { %v2693_v0 = vpop.eup %2692  ;;  %588 = vst [vmem:[#allocation2 + $0x50] sm:$0xff] %v572_v17  ;;  %v575_v30 = vmul.f32 %v2709_v11, %v2691_v63 }
 0x1a0   : > { %v2695_v10 = vpop.eup %2694  ;;  %872 = vadd.xlane.f32.xlu1 %v845_v27  ;;  %v844_v37 = vmul.f32 %v828_v20, %v572_v17  ;;  %v831_v52 = vmul.f32 %v2693_v0, %v5197_v46 }
 0x1a1   : > { %v2697_v6 = vpop.eup %2696  ;;  %591 = vst [vmem:[#allocation2 + $0x68] sm:$0xff] %v575_v30  ;;  %v574_v8 = vmul.f32 %v2710_v7, %v2695_v10 }
 0x1a2   : > { %v2699_v48 = vpop.eup %2698  ;;  %870 = vadd.xlane.f32.xlu0 %v844_v37  ;;  %v847_v43 = vmul.f32 %v831_v52, %v575_v30  ;;  %v830_v40 = vmul.f32 %v2697_v6, %v5198_v25 }
 0x1a3   : > { %v2701_v4 = vpop.eup %2700  ;;  %590 = vst [vmem:[#allocation2 + $0x60] sm:$0xff] %v574_v8  ;;  %v577_v18 = vmul.f32 %v2711_v58, %v2699_v48 }
 0x1a4   : > { %v2703_v24 = vpop.eup %2702  ;;  %876 = vadd.xlane.f32.xlu1 %v847_v43  ;;  %v846_v9 = vmul.f32 %v830_v40, %v574_v8  ;;  %v833_v28 = vmul.f32 %v2701_v4, %v5199_v56 }
 0x1a5   : > { %v2705_v42 = vpop.eup %2704  ;;  %593 = vst [vmem:[#allocation2 + $0x78] sm:$0xff] %v577_v18  ;;  %v576_v41 = vmul.f32 %v2712_v51, %v2703_v24 }
 0x1a6   : > { %874 = vadd.xlane.f32.xlu0 %v846_v9  ;;  %v849_v22 = vmul.f32 %v833_v28, %v577_v18  ;;  %v832_v34 = vmul.f32 %v2705_v42, %v5200_v29 }
 0x1a7   : > { %592 = vst [vmem:[#allocation2 + $0x70] sm:$0xff] %v576_v41 }
 0x1a8   : > { %880 = vadd.xlane.f32.xlu1 %v849_v22  ;;  %v848_v53 = vmul.f32 %v832_v34, %v576_v41 }
 0x1aa   : > { %878 = vadd.xlane.f32.xlu0 %v848_v53 }
 0x219   : > { %v853_v12 = vpop.xlane.xlu1 %852 }
 0x21a   : > { %v883_v14 = vmul.f32 2.0, %v853_v12 }
 0x21b   : > { %v851_v59 = vpop.xlane.xlu0 %850 }
 0x21c   : > { %900 = vst.msk [vmem:[#allocation3 + $0x8] sm:$0xff] %vm898_vm0, %v883_v14  ;;  %v882_v47 = vmul.f32 2.0, %v851_v59 }
 0x21d   : > { %v857_v49 = vpop.xlane.xlu1 %856 }
 0x21e   : > { %899 = vst.msk [vmem:[#allocation3] sm:$0xff] %vm898_vm0, %v882_v47  ;;  %v885_v44 = vmul.f32 2.0, %v857_v49 }
 0x21f   : > { %v855_v60 = vpop.xlane.xlu0 %854 }
 0x220   : > { %902 = vst.msk [vmem:[#allocation3 + $0x18] sm:$0xff] %vm898_vm0, %v885_v44  ;;  %v884_v5 = vmul.f32 2.0, %v855_v60 }
 0x221   : > { %v861_v16 = vpop.xlane.xlu1 %860 }
 0x222   : > { %901 = vst.msk [vmem:[#allocation3 + $0x10] sm:$0xff] %vm898_vm0, %v884_v5  ;;  %v887_v39 = vmul.f32 2.0, %v861_v16 }
 0x223   : > { %v859_v13 = vpop.xlane.xlu0 %858 }
 0x224   : > { %904 = vst.msk [vmem:[#allocation3 + $0x28] sm:$0xff] %vm898_vm0, %v887_v39  ;;  %v886_v32 = vmul.f32 2.0, %v859_v13 }
 0x225   : > { %v865_v62 = vpop.xlane.xlu1 %864 }
 0x226   : > { %903 = vst.msk [vmem:[#allocation3 + $0x20] sm:$0xff] %vm898_vm0, %v886_v32  ;;  %v889_v61 = vmul.f32 2.0, %v865_v62 }
 0x227   : > { %v863_v21 = vpop.xlane.xlu0 %862 }
 0x228   : > { %906 = vst.msk [vmem:[#allocation3 + $0x38] sm:$0xff] %vm898_vm0, %v889_v61  ;;  %v888_v57 = vmul.f32 2.0, %v863_v21 }
 0x229   : > { %v869_v45 = vpop.xlane.xlu1 %868 }
 0x22a   : > { %905 = vst.msk [vmem:[#allocation3 + $0x30] sm:$0xff] %vm898_vm0, %v888_v57  ;;  %v891_v54 = vmul.f32 2.0, %v869_v45 }
 0x22b   : > { %v867_v35 = vpop.xlane.xlu0 %866 }
 0x22c   : > { %908 = vst.msk [vmem:[#allocation3 + $0x48] sm:$0xff] %vm898_vm0, %v891_v54  ;;  %v890_v1 = vmul.f32 2.0, %v867_v35 }
 0x22d   : > { %v873_v55 = vpop.xlane.xlu1 %872 }
 0x22e   : > { %907 = vst.msk [vmem:[#allocation3 + $0x40] sm:$0xff] %vm898_vm0, %v890_v1  ;;  %v893_v19 = vmul.f32 2.0, %v873_v55 }
 0x22f   : > { %v871_v33 = vpop.xlane.xlu0 %870 }
 0x230   : > { %910 = vst.msk [vmem:[#allocation3 + $0x58] sm:$0xff] %vm898_vm0, %v893_v19  ;;  %v892_v50 = vmul.f32 2.0, %v871_v33 }
 0x231   : > { %v877_v31 = vpop.xlane.xlu1 %876 }
 0x232   : > { %909 = vst.msk [vmem:[#allocation3 + $0x50] sm:$0xff] %vm898_vm0, %v892_v50  ;;  %v895_v3 = vmul.f32 2.0, %v877_v31 }
 0x233   : > { %v875_v38 = vpop.xlane.xlu0 %874 }
 0x234   : > { %912 = vst.msk [vmem:[#allocation3 + $0x68] sm:$0xff] %vm898_vm0, %v895_v3  ;;  %v894_v23 = vmul.f32 2.0, %v875_v38 }
 0x235   : > { %v881_v2 = vpop.xlane.xlu1 %880 }
 0x236   : > { %911 = vst.msk [vmem:[#allocation3 + $0x60] sm:$0xff] %vm898_vm0, %v894_v23  ;;  %v897_v26 = vmul.f32 2.0, %v881_v2 }
 0x237   : > { %v879_v36 = vpop.xlane.xlu0 %878 }
 0x238   : > { %914 = vst.msk [vmem:[#allocation3 + $0x78] sm:$0xff] %vm898_vm0, %v897_v26  ;;  %v896_v17 = vmul.f32 2.0, %v879_v36 }
 0x23a   : > { %913 = vst.msk [vmem:[#allocation3 + $0x70] sm:$0xff] %vm898_vm0, %v896_v17 }
 0x23b PF: > { %v4175_v63 = vld [vmem:[%s3494_s3 + $0x10] sm:$0xff]  ;;  %v4178_v27 = vld [vmem:[%s3494_s3] sm:$0xff]  ;;  %v4181_v15 = vld [vmem:[%s3494_s3 + $0x18] sm:$0xff]  ;;  %s5201_s4 = sld [smem:[#allocation18_spill]]  ;;  %s2279_s24 = sshll.u32 %s3105_s21, 7 }
 0x23c   : > { %v965_v20 = vmul.f32 %v4175_v63, %v4175_v63  ;;  %v963_v0 = vmul.f32 %v4178_v27, %v4178_v27  ;;  %v4188_v11 = vld [vmem:[%s3494_s3 + $0x8] sm:$0xff]  ;;  %v966_v30 = vmul.f32 %v4181_v15, %v4181_v15  ;;  %v4198_v46 = vld [vmem:[%s3494_s3 + $0x20] sm:$0xff]  ;;  %v4205_v7 = vld [vmem:[%s3494_s3 + $0x38] sm:$0xff]  ;;  %s1437_s6 = ssub.s32 0, %s2279_s24  ;;  %p1436_p2 = scmp.lt.s32.totalorder %s2279_s24, 0 }
 0x23d   : > { %v964_v10 = vmul.f32 %v4188_v11, %v4188_v11  ;;  %v4195_v37 = vld [vmem:[%s3494_s3 + $0x28] sm:$0xff]  ;;  %v967_v6 = vmul.f32 %v4198_v46, %v4198_v46  ;;  %v4208_v8 = vld [vmem:[%s3494_s3 + $0x30] sm:$0xff]  ;;  %v970_v48 = vmul.f32 %v4205_v7, %v4205_v7  ;;  %v4218_v40 = vld [vmem:[%s3494_s3 + $0x40] sm:$0xff]  ;;  %s2280_s12 = smin.u32 %s2279_s24, %s1437_s6  ;;  %p2283_p11 = scmp.ne.s32.totalorder %s3105_s21, 1 }
 0x23e   : > { %983 = vadd.xlane.f32.xlu1 %v965_v20  ;;  %979 = vadd.xlane.f32.xlu0 %v963_v0  ;;  %v968_v52 = vmul.f32 %v4195_v37, %v4195_v37  ;;  %v969_v43 = vmul.f32 %v4208_v8, %v4208_v8  ;;  %v4215_v25 = vld [vmem:[%s3494_s3 + $0x48] sm:$0xff]  ;;  %v971_v58 = vmul.f32 %v4218_v40, %v4218_v40  ;;  %v4225_v18 = vld [vmem:[%s3494_s3 + $0x58] sm:$0xff]  ;;  %v4228_v24 = vld [vmem:[%s3494_s3 + $0x50] sm:$0xff]  ;;  %s1439_s0 = sand.u32 127, %s2280_s12   ;;  %s5264_s11 = sld [smem:[#allocation18_spill]] (!%p2283_p11) }
 0x23f   : > { %v972_v4 = vmul.f32 %v4215_v25, %v4215_v25  ;;  %v974_v9 = vmul.f32 %v4225_v18, %v4225_v18  ;;  %v973_v56 = vmul.f32 %v4228_v24, %v4228_v24  ;;  %v4235_v28 = vld [vmem:[%s3494_s3 + $0x68] sm:$0xff]  ;;  %v4238_v42 = vld [vmem:[%s3494_s3 + $0x60] sm:$0xff]  ;;  %v4245_v22 = vld [vmem:[%s3494_s3 + $0x78] sm:$0xff]  ;;  %s1440_s15 = ssub.s32 0, %s1439_s0 }
 0x240   : > { %v976_v51 = vmul.f32 %v4235_v28, %v4235_v28  ;;  %v975_v41 = vmul.f32 %v4238_v42, %v4238_v42  ;;  %v4248_v29 = vld [vmem:[%s3494_s3 + $0x70] sm:$0xff]  ;;  %v978_v34 = vmul.f32 %v4245_v22, %v4245_v22  ;;  %v1187_v12 = vld [vmem:[#allocation2] sm:$0xff]  ;;  %s5312_s15 = smov (!%p1436_p2, %s1440_s15), %s1439_s0 }
 0x241   : > { %v977_v53 = vmul.f32 %v4248_v29, %v4248_v29  ;;  %2361 = vmatprep.mubr.f32.mxu0 %v1187_v12  ;;  %v1195_v14 = vld [vmem:[#allocation2 + $0x40] sm:$0xff]  ;;  %p1383_p6 = scmp.eq.s32.totalorder %s5201_s4, %s3105_s21  ;;  %p2282_p7 = scmp.lt.s32.totalorder %s5312_s15, 0 }
 0x242   : > { %985 = vadd.xlane.f32.xlu1 %v966_v30  ;;  %981 = vadd.xlane.f32.xlu0 %v964_v10  ;;  %s1446_s9 = sadd.s32 128, %s5312_s15 }
 0x243   : > { %2373 = vmatprep.mubr.f32.mxu1 %v1195_v14  ;;  %s1400_s23 = scalar_select %p1383_p6, 1, 0 }
 0x244   : > { %s5314_s9 = smov (!%p2282_p7, %s1446_s9), %s5312_s15  ;;  %s2284_s7 = sshll.u32 (!%p2283_p11), %s5264_s11, 7 }
 0x245   : > { %p1953_p10 = scmp.lt.s32.totalorder (!%p2283_p11), %s2284_s7, 0  ;;  %s1954_s30 = ssub.s32 (!%p2283_p11), 0, %s2284_s7 }
 0x246   : > { %989 = vadd.xlane.f32.xlu1 %v968_v52  ;;  %987 = vadd.xlane.f32.xlu0 %v967_v6  ;;  %s2285_s5 = smin.u32 (!%p2283_p11), %s2284_s7, %s1954_s30 }
 0x247   : > { %s1956_s27 = sand.u32 (!%p2283_p11), 127, %s2285_s5  }
 0x248   : > { %s1957_s3 = ssub.s32 (!%p2283_p11), 0, %s1956_s27 }
 0x24a   : > { %993 = vadd.xlane.f32.xlu1 %v970_v48  ;;  %991 = vadd.xlane.f32.xlu0 %v969_v43 }
 0x24e   : > { %997 = vadd.xlane.f32.xlu1 %v972_v4  ;;  %995 = vadd.xlane.f32.xlu0 %v971_v58 }
 0x252   : > { %1001 = vadd.xlane.f32.xlu1 %v974_v9  ;;  %999 = vadd.xlane.f32.xlu0 %v973_v56 }
 0x256   : > { %1005 = vadd.xlane.f32.xlu1 %v976_v51  ;;  %1003 = vadd.xlane.f32.xlu0 %v975_v41 }
 0x25a   : > { %1009 = vadd.xlane.f32.xlu1 %v978_v34  ;;  %1007 = vadd.xlane.f32.xlu0 %v977_v53 }
 0x2cb   : > { %v984_v59 = vpop.xlane.xlu1 %983  ;;  %v980_v47 = vpop.xlane.xlu0 %979 }
 0x2cc   : > { %2715 = vrsqrt.f32 %v984_v59  ;;  %vm1027_vm0 = vcmp.eq.f32.partialorder %v984_v59, inf  ;;  %vm1029_vm5 = vcmp.eq.f32.partialorder %v984_v59, 0.0  ;;  %v1030_v32 = vand.u32 2147483648, %v984_v59 }
 0x2cd   : > { %2717 = vrsqrt.f32 %v980_v47  ;;  %vm1013_vm6 = vcmp.eq.f32.partialorder %v980_v47, inf  ;;  %vm1015_vm7 = vcmp.eq.f32.partialorder %v980_v47, 0.0  ;;  %v1016_v57 = vand.u32 2147483648, %v980_v47 }
 0x2cf   : > { %v986_v49 = vpop.xlane.xlu1 %985  ;;  %v982_v44 = vpop.xlane.xlu0 %981 }
 0x2d0   : > { %2719 = vrsqrt.f32 %v986_v49  ;;  %vm1034_vm8 = vcmp.eq.f32.partialorder %v986_v49, inf  ;;  %vm1036_vm9 = vcmp.eq.f32.partialorder %v986_v49, 0.0  ;;  %v1037_v54 = vand.u32 2147483648, %v986_v49 }
 0x2d1   : > { %2721 = vrsqrt.f32 %v982_v44  ;;  %vm1020_vm10 = vcmp.eq.f32.partialorder %v982_v44, inf  ;;  %vm1022_vm11 = vcmp.eq.f32.partialorder %v982_v44, 0.0  ;;  %v1023_v3 = vand.u32 2147483648, %v982_v44 }
 0x2d3   : > { %v4254_v60 = vpop.xlane.xlu1 %989  ;;  %v4256_v5 = vpop.xlane.xlu0 %987 }
 0x2d4   : > { %2723 = vrsqrt.f32 %v4254_v60  ;;  %vm1048_vm12 = vcmp.eq.f32.partialorder %v4254_v60, inf  ;;  %vm1050_vm13 = vcmp.eq.f32.partialorder %v4254_v60, 0.0  ;;  %v1051_v17 = vand.u32 2147483648, %v4254_v60 }
 0x2d5   : > { %2725 = vrsqrt.f32 %v4256_v5  ;;  %vm1041_vm14 = vcmp.eq.f32.partialorder %v4256_v5, inf  ;;  %v1044_v10 = vand.u32 2147483648, %v4256_v5  ;;  %vm1043_vm15 = vcmp.eq.f32.partialorder %v4256_v5, 0.0 }
 0x2d6   : > { %v2716_v16 = vpop.eup %2715 }
 0x2d7   : > { %v2718_v39 = vpop.eup %2717  ;;  %v1026_v13 = vmul.f32 %v2716_v16, %v984_v59  ;;  %v4260_v62 = vpop.xlane.xlu1 %993 }
 0x2d8   : > { %v4262_v61 = vpop.xlane.xlu0 %991  ;;  %v1012_v21 = vmul.f32 %v2718_v39, %v980_v47  ;;  %2727 = vrsqrt.f32 %v4260_v62  ;;  %vm1062_vm1 = vcmp.eq.f32.partialorder %v4260_v62, inf  ;;  %vm1064_vm3 = vcmp.eq.f32.partialorder %v4260_v62, 0.0 }
 0x2d9   : > { %v1028_v45 = vsel %vm1027_vm0, %v984_v59, %v1026_v13  ;;  %2729 = vrsqrt.f32 %v4262_v61  ;;  %vm1055_vm2 = vcmp.eq.f32.partialorder %v4262_v61, inf  ;;  %v1058_v16 = vand.u32 2147483648, %v4262_v61 }
 0x2da   : > { %v2720_v35 = vpop.eup %2719  ;;  %v1031_v1 = vsel %vm1029_vm5, %v1030_v32, %v1028_v45  ;;  %v1014_v55 = vsel %vm1013_vm6, %v980_v47, %v1012_v21  ;;  %vm1057_vm4 = vcmp.eq.f32.partialorder %v4262_v61, 0.0 }
 0x2db   : > { %v2722_v19 = vpop.eup %2721  ;;  %v1125_v33 = vmax.f32 %v1031_v1, 1e-08  ;;  %v1017_v50 = vsel %vm1015_vm7, %v1016_v57, %v1014_v55  ;;  %v1033_v31 = vmul.f32 %v2720_v35, %v986_v49  ;;  %v4268_v38 = vpop.xlane.xlu1 %997 }
 0x2dc   : > { %v1123_v23 = vmax.f32 %v1017_v50, 1e-08  ;;  %v1019_v2 = vmul.f32 %v2722_v19, %v982_v44  ;;  %2731 = vrsqrt.f32 %v4268_v38  ;;  %v4272_v26 = vpop.xlane.xlu0 %995  ;;  %vm1076_vm0 = vcmp.eq.f32.partialorder %v4268_v38, inf }
 0x2dd   : > { %v1035_v36 = vsel %vm1034_vm8, %v986_v49, %v1033_v31  ;;  %2733 = vrcp.f32 %v1125_v33  ;;  %vm1078_vm5 = vcmp.eq.f32.partialorder %v4268_v38, 0.0  ;;  %vm1069_vm6 = vcmp.eq.f32.partialorder %v4272_v26, inf }
 0x2de   : > { %v2724_v20 = vpop.eup %2723  ;;  %v1038_v0 = vsel %vm1036_vm9, %v1037_v54, %v1035_v36  ;;  %v1021_v30 = vsel %vm1020_vm10, %v982_v44, %v1019_v2  ;;  %2735 = vrsqrt.f32 %v4272_v26  ;;  %v1065_v44 = vand.u32 2147483648, %v4260_v62 }
 0x2df   : > { %v2726_v52 = vpop.eup %2725  ;;  %v1126_v6 = vmax.f32 %v1038_v0, 1e-08  ;;  %v1024_v48 = vsel %vm1022_vm11, %v1023_v3, %v1021_v30  ;;  %v1047_v43 = vmul.f32 %v2724_v20, %v4254_v60  ;;  %2737 = vrcp.f32 %v1123_v23  ;;  %v4289_v56 = vpop.xlane.xlu1 %1001 }
 0x2e0   : > { %v1124_v4 = vmax.f32 %v1024_v48, 1e-08  ;;  %v1040_v58 = vmul.f32 %v2726_v52, %v4256_v5  ;;  %v4297_v53 = vpop.xlane.xlu0 %999  ;;  %v1072_v23 = vand.u32 2147483648, %v4272_v26  ;;  %vm1071_vm7 = vcmp.eq.f32.partialorder %v4272_v26, 0.0 }
 0x2e1   : > { %2739 = vrcp.f32 %v1126_v6  ;;  %v1049_v9 = vsel %vm1048_vm12, %v4254_v60, %v1047_v43  ;;  %vm1090_vm8 = vcmp.eq.f32.partialorder %v4289_v56, inf  ;;  %vm1092_vm9 = vcmp.eq.f32.partialorder %v4289_v56, 0.0 }
 0x2e2   : > { %v2728_v51 = vpop.eup %2727  ;;  %2741 = vrcp.f32 %v1124_v4  ;;  %v1052_v41 = vsel %vm1050_vm13, %v1051_v17, %v1049_v9  ;;  %v1042_v34 = vsel %vm1041_vm14, %v4256_v5, %v1040_v58  ;;  %vm1083_vm10 = vcmp.eq.f32.partialorder %v4297_v53, inf }
 0x2e3   : > { %v2730_v12 = vpop.eup %2729  ;;  %v1128_v14 = vmax.f32 %v1052_v41, 1e-08  ;;  %v1045_v59 = vsel %vm1043_vm15, %v1044_v10, %v1042_v34  ;;  %v1061_v47 = vmul.f32 %v2728_v51, %v4260_v62  ;;  %2743 = vrsqrt.f32 %v4289_v56 }
 0x2e4   : > { %v1127_v49 = vmax.f32 %v1045_v59, 1e-08  ;;  %v1054_v60 = vmul.f32 %v2730_v12, %v4262_v61  ;;  %2745 = vrsqrt.f32 %v4297_v53  ;;  %v4315_v55 = vpop.xlane.xlu0 %1003  ;;  %v1093_v9 = vand.u32 2147483648, %v4289_v56 }
 0x2e5   : > { %v1063_v5 = vsel %vm1062_vm1, %v4260_v62, %v1061_v47  ;;  %2747 = vrcp.f32 %v1128_v14  ;;  %v4312_v62 = vpop.xlane.xlu1 %1005  ;;  %v1086_v51 = vand.u32 2147483648, %v4297_v53  ;;  %vm1085_vm11 = vcmp.eq.f32.partialorder %v4297_v53, 0.0 }
 0x2e6   : > { %v2732_v39 = vpop.eup %2731  ;;  %v1056_v13 = vsel %vm1055_vm2, %v4262_v61, %v1054_v60  ;;  %2749 = vrcp.f32 %v1127_v49  ;;  %v1066_v21 = vsel %vm1064_vm3, %v1065_v44, %v1063_v5  ;;  %v1079_v61 = vand.u32 2147483648, %v4268_v38 }
 0x2e7   : > { %v2734_v32 = vpop.eup %2733  ;;  %v1075_v57 = vmul.f32 %v2732_v39, %v4268_v38  ;;  %v1059_v54 = vsel %vm1057_vm4, %v1058_v16, %v1056_v13  ;;  %v1130_v33 = vmax.f32 %v1066_v21, 1e-08  ;;  %2751 = vrsqrt.f32 %v4312_v62 }
 0x2e8   : > { %v2736_v45 = vpop.eup %2735  ;;  %v1129_v31 = vmax.f32 %v1059_v54, 1e-08  ;;  %2753 = vrsqrt.f32 %v4315_v55  ;;  %v1173_v52 = vmul.f32 %v2734_v32, %v4175_v63  ;;  %v4337_v63 = vpop.xlane.xlu0 %1007  ;;  %vm1104_vm12 = vcmp.eq.f32.partialorder %v4312_v62, inf }
 0x2e9   : > { %v2738_v35 = vpop.eup %2737  ;;  %v1068_v1 = vmul.f32 %v2736_v45, %v4272_v26  ;;  %v1077_v3 = vsel %vm1076_vm0, %v4268_v38, %v1075_v57  ;;  %2755 = vrcp.f32 %v1130_v33  ;;  %v4333_v43 = vpop.xlane.xlu1 %1009  ;;  %vm1097_vm13 = vcmp.eq.f32.partialorder %v4315_v55, inf }
 0x2ea   : > { %v1171_v2 = vmul.f32 %v2738_v35, %v4178_v27  ;;  %2757 = vrcp.f32 %v1129_v31  ;;  %v1080_v27 = vsel %vm1078_vm5, %v1079_v61, %v1077_v3  ;;  %vm1106_vm14 = vcmp.eq.f32.partialorder %v4312_v62, 0.0 }
 0x2eb   : > { %v2740_v19 = vpop.eup %2739  ;;  %v1070_v0 = vsel %vm1069_vm6, %v4272_v26, %v1068_v1  ;;  %v1132_v38 = vmax.f32 %v1080_v27, 1e-08  ;;  %2759 = vrsqrt.f32 %v4333_v43  ;;  %v1100_v32 = vand.u32 2147483648, %v4315_v55 }
 0x2ec   : > { %v2742_v50 = vpop.eup %2741  ;;  %v1174_v17 = vmul.f32 %v2740_v19, %v4181_v15  ;;  %2761 = vrsqrt.f32 %v4337_v63  ;;  %vm1099_vm15 = vcmp.eq.f32.partialorder %v4315_v55, 0.0  ;;  %vm1118_vm1 = vcmp.eq.f32.partialorder %v4333_v43, inf }
 0x2ed   : > { %v1172_v36 = vmul.f32 %v2742_v50, %v4188_v11  ;;  %v2744_v20 = vpop.eup %2743  ;;  %v1073_v11 = vsel %vm1071_vm7, %v1072_v23, %v1070_v0  ;;  %2763 = vrcp.f32 %v1132_v38  ;;  %vm1111_vm2 = vcmp.eq.f32.partialorder %v4337_v63, inf }
 0x2ee   : > { %v2746_v30 = vpop.eup %2745  ;;  %v1089_v15 = vmul.f32 %v2744_v20, %v4289_v56  ;;  %v2389_v48 = vpack.c.bf16 %v1174_v17, %v1173_v52  ;;  %v1131_v58 = vmax.f32 %v1073_v11, 1e-08  ;;  %vm1120_vm3 = vcmp.eq.f32.partialorder %v4333_v43, 0.0 }
 0x2ef   : > { %v2385_v10 = vpack.c.bf16 %v1172_v36, %v1171_v2  ;;  %v2748_v6 = vpop.eup %2747  ;;  %v1082_v26 = vmul.f32 %v2746_v30, %v4297_v53  ;;  %v1121_v31 = vand.u32 2147483648, %v4333_v43  ;;  %v1114_v23 = vand.u32 2147483648, %v4337_v63 }
 0x2f0   : > { %v2750_v4 = vpop.eup %2749  ;;  %v1091_v41 = vsel %vm1090_vm8, %v4289_v56, %v1089_v15  ;;  %v1176_v12 = vmul.f32 %v2748_v6, %v4195_v37  ;;  %2765 = vrcp.f32 %v1131_v58  ;;  %v1107_v56 = vand.u32 2147483648, %v4312_v62 }
 0x2f1   : > { %2386 = vmatprep.subr.bf16.mxu0 %v2385_v10  ;;  %2417 = vmatprep.subr.bf16.mxu1 %v2385_v10  ;;  %v1175_v34 = vmul.f32 %v2750_v4, %v4198_v46  ;;  %v2752_v14 = vpop.eup %2751  ;;  %v1084_v59 = vsel %vm1083_vm10, %v4297_v53, %v1082_v26  ;;  %v1094_v49 = vsel %vm1092_vm9, %v1093_v9, %v1091_v41  ;;  %vm1113_vm4 = vcmp.eq.f32.partialorder %v4337_v63, 0.0  ;;  %v1189_v9 = vld [vmem:[#allocation2 + $0x10] sm:$0xff]  ;;  %v1190_v41 = vld [vmem:[#allocation2 + $0x18] sm:$0xff] }
 0x2f2   : > { %2388 = vmatpush3.bf16.xpose.msra.mxu0 %v2385_v10  ;;  %2425 = vmatpush3.bf16.xpose.msra.mxu1 %v2385_v10  ;;  %v2754_v47 = vpop.eup %2753  ;;  %v1087_v60 = vsel %vm1085_vm11, %v1086_v51, %v1084_v59  ;;  %v1103_v5 = vmul.f32 %v2752_v14, %v4312_v62  ;;  %v1134_v39 = vmax.f32 %v1094_v49, 1e-08  ;;  %v1197_v51 = vld [vmem:[#allocation2 + $0x50] sm:$0xff]  ;;  %v1200_v14 = vld [vmem:[#allocation2 + $0x68] sm:$0xff]  ;;  %v1194_v49 = vld [vmem:[#allocation2 + $0x38] sm:$0xff]  ;;  %vm3130_vm9 = vmmov 1  }
 0x2f3   : > { %2390 = vmatprep.subr.bf16.mxu0 %v2389_v48  ;;  %2418 = vmatprep.subr.bf16.mxu1 %v2389_v48  ;;  %v2756_v44 = vpop.eup %2755  ;;  %v2393_v46 = vpack.c.bf16 %v1176_v12, %v1175_v34  ;;  %v1096_v37 = vmul.f32 %v2754_v47, %v4315_v55  ;;  %v1133_v53 = vmax.f32 %v1087_v60, 1e-08  ;;  %v1198_v34 = vld [vmem:[#allocation2 + $0x58] sm:$0xff]  ;;  %v1199_v12 = vld [vmem:[#allocation2 + $0x60] sm:$0xff]  ;;  %v1193_v59 = vld [vmem:[#allocation2 + $0x30] sm:$0xff]  ;;  %v1364_v60 = vlaneseq }
 0x2f4   : > { %v2758_v16 = vpop.eup %2757  ;;  %v1105_v13 = vsel %vm1104_vm12, %v4312_v62, %v1103_v5  ;;  %v1178_v57 = vmul.f32 %v2756_v44, %v4205_v7  ;;  %2767 = vrcp.f32 %v1134_v39  ;;  %v1201_v47 = vld [vmem:[#allocation2 + $0x70] sm:$0xff]  ;;  %v1202_v44 = vld [vmem:[#allocation2 + $0x78] sm:$0xff] }
 0x2f5   : > { %v1177_v21 = vmul.f32 %v2758_v16, %v4208_v8  ;;  %v2760_v45 = vpop.eup %2759  ;;  %v1098_v54 = vsel %vm1097_vm13, %v4315_v55, %v1096_v37  ;;  %2769 = vrcp.f32 %v1133_v53  ;;  %v1108_v1 = vsel %vm1106_vm14, %v1107_v56, %v1105_v13 }
 0x2f6   : > { %v2762_v35 = vpop.eup %2761  ;;  %v1101_v33 = vsel %vm1099_vm15, %v1100_v32, %v1098_v54  ;;  %v1117_v61 = vmul.f32 %v2760_v45, %v4333_v43  ;;  %v1136_v7 = vmax.f32 %v1108_v1, 1e-08  ;;  %v4385_v5 = vshrl.u32 %v1364_v60, 7 }
 0x2f7   : > { %v2764_v19 = vpop.eup %2763  ;;  %v2397_v62 = vpack.c.bf16 %v1178_v57, %v1177_v21  ;;  %v1110_v8 = vmul.f32 %v2762_v35, %v4337_v63  ;;  %v1135_v55 = vmax.f32 %v1101_v33, 1e-08  ;;  %v4390_v16 = vand.u32 127, %v1364_v60  ;;  %v4751_v33 = vld [vmem:[#allocation4 + $0x50] sm:$0xff] }
 0x2f8   : > { %v1119_v3 = vsel %vm1118_vm1, %v4333_v43, %v1117_v61  ;;  %v1180_v36 = vmul.f32 %v2764_v19, %v4215_v25  ;;  %2771 = vrcp.f32 %v1136_v7  ;;  %v1401_v37 = vstv %s1400_s23 }
 0x2f9   : > { %v1112_v17 = vsel %vm1111_vm2, %v4337_v63, %v1110_v8  ;;  %2773 = vrcp.f32 %v1135_v55  ;;  %v1122_v20 = vsel %vm1120_vm3, %v1121_v31, %v1119_v3  ;;  %vm4394_vm5 = vcmp.eq.s32.totalorder %v1401_v37, 1 }
 0x2fa   : > { %2392 = vmatpush3.bf16.xpose.msra.mxu0 %v2389_v48  ;;  %2426 = vmatpush3.bf16.xpose.msra.mxu1 %v2389_v48  ;;  %v2766_v50 = vpop.eup %2765  ;;  %v1115_v30 = vsel %vm1113_vm4, %v1114_v23, %v1112_v17  ;;  %v1138_v27 = vmax.f32 %v1122_v20, 1e-08  ;;  %v4399_v53 = vadd.s32 72, %v4385_v5  ;;  %v1448_v56 = vstv %s5314_s9 }
 0x2fb   : > { %2394 = vmatprep.subr.bf16.mxu0 %v2393_v46  ;;  %2419 = vmatprep.subr.bf16.mxu1 %v2393_v46  ;;  %v1179_v2 = vmul.f32 %v2766_v50, %v4218_v40  ;;  %v1137_v6 = vmax.f32 %v1115_v30, 1e-08  ;;  %v4402_v13 = vadd.s32 64, %v4385_v5  ;;  %vm1384_vm7 = vcmp.eq.s32.totalorder %v4385_v5, %v4390_v16 }
 0x2fc   : > { %2775 = vrcp.f32 %v1138_v27  ;;  %5205 = vst [vmem:[#allocation37_spill] sm:$0xff] %v4399_v53  ;;  %v4409_v32 = vadd.s32 %v1448_v56, %v4390_v16  ;;  %vm1393_vm8 = vcmp.eq.s32.totalorder %v4399_v53, %v4390_v16  ;;  %v4417_v21 = vadd.s32 24, %v4385_v5  ;;  %vm1403_vm12 = vmand %vm4394_vm5, %vm1384_vm7  ;;  %v4695_v27 = vld [vmem:[#allocation4 + $0x8] sm:$0xff] }
 0x2fd   : > { %v2401_v10 = vpack.c.bf16 %v1180_v36, %v1179_v2  ;;  %2777 = vrcp.f32 %v1137_v6  ;;  %5206 = vst [vmem:[#allocation38_spill] sm:$0xff] %v4402_v13  ;;  %vm1392_vm11 = vcmp.eq.s32.totalorder %v4402_v13, %v4390_v16  ;;  %v4422_v57 = vadd.s32 16, %v4385_v5  ;;  %vm1412_vm13 = vmand %vm4394_vm5, %vm1393_vm8 }
 0x2fe   : > { %v2768_v0 = vpop.eup %2767  ;;  %5207 = vst [vmem:[#allocation39_spill] sm:$0xff] %v4417_v21  ;;  %v4427_v45 = vadd.s32 88, %v4385_v5  ;;  %vm1450_vm14 = vcmp.lt.s32.totalorder %v4409_v32, 4  ;;  %vm1411_vm15 = vmand %vm4394_vm5, %vm1392_vm11  ;;  %vm1387_vm2 = vcmp.eq.s32.totalorder %v4417_v21, %v4390_v16  ;;  %v4448_v35 = vadd.s32 80, %v4385_v5 }
 0x2ff   : > { %v2770_v52 = vpop.eup %2769  ;;  %v1182_v25 = vmul.f32 %v2768_v0, %v4225_v18  ;;  %vm1419_vm1 = vmxor %vm1403_vm12, %vm3130_vm9  ;;  %vm1386_vm4 = vcmp.eq.s32.totalorder %v4422_v57, %v4390_v16  ;;  %v4478_v61 = vadd.s32 40, %v4385_v5  ;;  %v4512_v20 = vadd.s32 32, %v4385_v5 }
 0x300   : > { %v1181_v40 = vmul.f32 %v2770_v52, %v4228_v24  ;;  %5208 = vst [vmem:[#allocation40_spill] sm:$0xff] %v4427_v45  ;;  %vm1428_vm3 = vmxor %vm1412_vm13, %vm3130_vm9  ;;  %vm1395_vm7 = vcmp.eq.s32.totalorder %v4427_v45, %v4390_v16  ;;  %v4536_v6 = vadd.s32 56, %v4385_v5  ;;  %v4633_v19 = vadd.s32 112, %v4385_v5 }
 0x301   : > { %5211 = vst [vmem:[#allocation41_spill] sm:$0xff] %v4448_v35  ;;  %vm4452_vm8 = vmand %vm1419_vm1, %vm1450_vm14  ;;  %v3131_v31 = vmov 0  }
 0x302   : > { %2396 = vmatpush3.bf16.xpose.msra.mxu0 %v2393_v46  ;;  %2427 = vmatpush3.bf16.xpose.msra.mxu1 %v2393_v46  ;;  %v2772_v11 = vpop.eup %2771  ;;  %v2405_v15 = vpack.c.bf16 %v1182_v25, %v1181_v40  ;;  %v4388_v46 = vadd.s32 8, %v4385_v5  ;;  %vm4460_vm11 = vmand %vm1428_vm3, %vm1450_vm14  ;;  %5218 = vst [vmem:[#allocation42_spill] sm:$0xff] %v4478_v61 }
 0x303   : > { %2398 = vmatprep.subr.bf16.mxu0 %v2397_v62  ;;  %2420 = vmatprep.subr.bf16.mxu1 %v2397_v62  ;;  %v2774_v48 = vpop.eup %2773  ;;  %v1184_v4 = vmul.f32 %v2772_v11, %v4235_v28  ;;  %v1196_v28 = vld [vmem:[#allocation2 + $0x48] sm:$0xff]  ;;  %vm1405_vm12 = vmand %vm4394_vm5, %vm1386_vm4  ;;  %5228 = vst [vmem:[#allocation44_spill] sm:$0xff] %v4512_v20 }
 0x304   : > { %v1183_v43 = vmul.f32 %v2774_v48, %v4238_v42  ;;  %v1188_v42 = vld [vmem:[#allocation2 + $0x8] sm:$0xff]  ;;  %5202 = vst [vmem:[#allocation36_spill] sm:$0xff] %v4388_v46  ;;  %vm1385_vm0 = vcmp.eq.s32.totalorder %v4388_v46, %v4390_v16  ;;  %vm1421_vm3 = vmxor %vm1405_vm12, %vm3130_vm9  ;;  %2713 = vset.pattern.permute.xlu1 %v3131_v31  ;;  %2714 = vset.pattern.permute.xlu0 %v3131_v31 }
 0x305   : > { %vm1404_vm6 = vmand %vm4394_vm5, %vm1385_vm0  ;;  %5233 = vst [vmem:[#allocation45_spill] sm:$0xff] %v4536_v6 }
 0x306   : > { %v2776_v26 = vpop.eup %2775  ;;  %v2409_v63 = vpack.c.bf16 %v1184_v4, %v1183_v43  ;;  %vm1420_vm10 = vmxor %vm1404_vm6, %vm3130_vm9  ;;  %5245 = vst [vmem:[#allocation49_spill] sm:$0xff] %v4633_v19 }
 0x307   : > { %v2778_v38 = vpop.eup %2777  ;;  %v1186_v24 = vmul.f32 %v2776_v26, %v4245_v22  ;;  %v1192_v22 = vld [vmem:[#allocation2 + $0x28] sm:$0xff]  ;;  %vm4440_vm0 = vmand %vm1420_vm10, %vm1450_vm14 }
 0x308   : > { %v1185_v18 = vmul.f32 %v2778_v38, %v4248_v29  ;;  %v1191_v29 = vld [vmem:[#allocation2 + $0x20] sm:$0xff]  ;;  %vm1427_vm6 = vmxor %vm1411_vm15, %vm3130_vm9 }
 0x309   : > { %vm1406_vm10 = vmand %vm4394_vm5, %vm1387_vm2  ;;  %vm1394_vm2 = vcmp.eq.s32.totalorder %v4448_v35, %v4390_v16 }
 0x30a   : > { %2400 = vmatpush3.bf16.xpose.msra.mxu0 %v2397_v62  ;;  %2428 = vmatpush3.bf16.xpose.msra.mxu1 %v2397_v62  ;;  %v2413_v58 = vpack.c.bf16 %v1186_v24, %v1185_v18  ;;  %vm4468_vm13 = vmand %vm1427_vm6, %vm1450_vm14  ;;  %v4482_v62 = vadd.s32 104, %v4385_v5 }
 0x30b   : > { %2402 = vmatprep.subr.bf16.mxu0 %v2401_v10  ;;  %2421 = vmatprep.subr.bf16.mxu1 %v2401_v10  ;;  %vm1414_vm15 = vmand %vm4394_vm5, %vm1395_vm7 }
 0x30c   : > { %vm1422_vm1 = vmxor %vm1406_vm10, %vm3130_vm9  ;;  %5219 = vst [vmem:[#allocation43_spill] sm:$0xff] %v4482_v62  ;;  %vm1389_vm10 = vcmp.eq.s32.totalorder %v4478_v61, %v4390_v16 }
 0x30d   : > { %vm4485_vm4 = vmxor %vm1414_vm15, %vm3130_vm9  ;;  %vm1397_vm15 = vcmp.eq.s32.totalorder %v4482_v62, %v4390_v16 }
 0x30e   : > { %vm4491_vm6 = vmand %vm4394_vm5, %vm1394_vm2 }
 0x30f   : > { %vm4497_vm7 = vmand %vm1422_vm1, %vm1450_vm14 }
 0x310   : > { %vm4505_vm12 = vmand %vm1421_vm3, %vm1450_vm14 }
 0x311   : > { %vm4518_vm1 = vmand %vm4485_vm4, %vm1450_vm14 }
 0x312   : > { %2404 = vmatpush3.bf16.xpose.msra.mxu0 %v2401_v10  ;;  %2429 = vmatpush3.bf16.xpose.msra.mxu1 %v2401_v10  ;;  %vm1429_vm2 = vmxor %vm4491_vm6, %vm3130_vm9 }
 0x313   : > { %2406 = vmatprep.subr.bf16.mxu0 %v2405_v15  ;;  %2422 = vmatprep.subr.bf16.mxu1 %v2405_v15  ;;  %vm4531_vm3 = vmand %vm4394_vm5, %vm1389_vm10  ;;  %vm1391_vm10 = vcmp.eq.s32.totalorder %v4536_v6, %v4390_v16 }
 0x314   : > { %vm4552_vm4 = vmand %vm1429_vm2, %vm1450_vm14 }
 0x31a   : > { %2408 = vmatpush3.bf16.xpose.msra.mxu0 %v2405_v15  ;;  %2430 = vmatpush3.bf16.xpose.msra.mxu1 %v2405_v15 }
 0x31b   : > { %2410 = vmatprep.subr.bf16.mxu0 %v2409_v63  ;;  %2423 = vmatprep.subr.bf16.mxu1 %v2409_v63 }
 0x322   : > { %2412 = vmatpush3.bf16.xpose.msra.mxu0 %v2409_v63  ;;  %2431 = vmatpush3.bf16.xpose.msra.mxu1 %v2409_v63  ;;  %v4559_v63 = vadd.s32 96, %v4385_v5 }
 0x323   : > { %2414 = vmatprep.subr.bf16.mxu0 %v2413_v58  ;;  %2424 = vmatprep.subr.bf16.mxu1 %v2413_v58 }
 0x324   : > { %5236 = vst [vmem:[#allocation46_spill] sm:$0xff] %v4559_v63  ;;  %vm1396_vm2 = vcmp.eq.s32.totalorder %v4559_v63, %v4390_v16 }
 0x32a   : > { %2416 = vmatpush3.bf16.xpose.msra.mxu0 %v2413_v58  ;;  %2432 = vmatpush3.bf16.xpose.msra.mxu1 %v2413_v58 }
 0x331   : > { %2362 = vmatmul.mubr.f32.vlgmr.msra.gmra.mrb[0].mxu0 %v1188_v42  ;;  %2374 = vmatmul.mubr.f32.vlgmr.msra.gmra.mrb[0].mxu1 %v1196_v28 }
 0x332   : > { %2364 = vmatprep.mubr.f32.mxu0 %v1189_v9  ;;  %2376 = vmatprep.mubr.f32.mxu1 %v1197_v51 }
 0x335   : > { %2365 = vmatmul.mubr.f32.gmra.mrb[2].mxu0 %v1190_v41  ;;  %2377 = vmatmul.mubr.f32.gmra.mrb[2].mxu1 %v1198_v34 }
 0x336   : > { %2367 = vmatprep.mubr.f32.mxu0 %v1191_v29  ;;  %2379 = vmatprep.mubr.f32.mxu1 %v1199_v12 }
 0x339   : > { %2368 = vmatmul.mubr.f32.gmra.mrb[4].mxu0 %v1192_v22  ;;  %2380 = vmatmul.mubr.f32.gmra.mrb[4].mxu1 %v1200_v14  ;;  %v4609_v14 = vadd.s32 48, %v4385_v5 }
 0x33a   : > { %2370 = vmatprep.mubr.f32.mxu0 %v1193_v59  ;;  %2382 = vmatprep.mubr.f32.mxu1 %v1201_v47 }
 0x33b   : > { %5243 = vst [vmem:[#allocation47_spill] sm:$0xff] %v4609_v14 }
 0x33d   : > { %2371 = vmatmul.mubr.f32.gmra.mrb[6].mxu0 %v1194_v49  ;;  %2383 = vmatmul.mubr.f32.gmra.mrb[6].mxu1 %v1202_v44  ;;  %v4616_v49 = vadd.s32 120, %v4385_v5 }
 0x33f   : > { %5244 = vst [vmem:[#allocation48_spill] sm:$0xff] %v4616_v49 }
 0x404   : > { %v2363_v7 = vpop.f32.mrb[0].mxu0  ;;  %v2375_v55 = vpop.f32.mrb[0].mxu1 }
 0x405   : > { %v1349_v3 = vmul.f32 2.0, %v2363_v7  ;;  %v1269_v23 = vpop.f32.mrb[1].mxu0  ;;  %v1357_v2 = vmul.f32 2.0, %v2375_v55  ;;  %v1309_v36 = vpop.f32.mrb[1].mxu1 }
 0x406   : > { %v1348_v0 = vmul.f32 2.0, %v1269_v23  ;;  %v1356_v30 = vmul.f32 2.0, %v1309_v36 }
 0x407   : > { %v4527_v52 = vsel %vm4440_vm0, %v1349_v3, -1e+30  ;;  %vm1416_vm0 = vmand %vm4394_vm5, %vm1397_vm15  ;;  %v4548_v15 = vsel %vm4460_vm11, %v1357_v2, -1e+30 }
 0x408   : > { %1501 = vmax.xlane.f32.xlu1 %v4527_v52  ;;  %v4541_v40 = vsel %vm4452_vm8, %v1348_v0, -1e+30  ;;  %v2366_v25 = vpop.f32.mrb[2].mxu0  ;;  %v2378_v11 = vpop.f32.mrb[2].mxu1  ;;  %vm1388_vm8 = vcmp.eq.s32.totalorder %v4512_v20, %v4390_v16  ;;  %v4563_v38 = vsel %vm4468_vm13, %v1356_v30, -1e+30  ;;  %vm1424_vm11 = vmxor %vm4531_vm3, %vm3130_vm9 }
 0x409   : > { %1499 = vmax.xlane.f32.xlu0 %v4541_v40  ;;  %v1351_v48 = vmul.f32 2.0, %v2366_v25  ;;  %v1279_v43 = vpop.f32.mrb[3].mxu0  ;;  %v1319_v4 = vpop.f32.mrb[3].mxu1  ;;  %vm4569_vm6 = vmxor %vm1416_vm0, %vm3130_vm9  ;;  %v1359_v28 = vmul.f32 2.0, %v2378_v11  ;;  %v4697_v25 = vld [vmem:[#allocation4] sm:$0xff] }
 0x40a   : > { %v1350_v18 = vmul.f32 2.0, %v1279_v43  ;;  %vm1407_vm13 = vmand %vm4394_vm5, %vm1388_vm8  ;;  %v1358_v12 = vmul.f32 2.0, %v1319_v4  ;;  %v4705_v4 = vld [vmem:[#allocation4 + $0x48] sm:$0xff] }
 0x40b   : > { %v4581_v9 = vsel %vm4497_vm7, %v1351_v48, -1e+30  ;;  %vm4585_vm15 = vmand %vm1424_vm11, %vm1450_vm14  ;;  %v4621_v44 = vsel %vm4518_vm1, %v1359_v28, -1e+30 }
 0x40c   : > { %1517 = vmax.xlane.f32.xlu1 %v4548_v15  ;;  %v2369_v58 = vpop.f32.mrb[4].mxu0  ;;  %v2381_v42 = vpop.f32.mrb[4].mxu1  ;;  %v4593_v29 = vsel %vm4505_vm12, %v1350_v18, -1e+30  ;;  %vm4599_vm7 = vmand %vm4569_vm6, %vm1450_vm14  ;;  %v4626_v54 = vsel %vm4552_vm4, %v1358_v12, -1e+30  ;;  %vm1390_vm6 = vcmp.eq.s32.totalorder %v4609_v14, %v4390_v16  ;;  %vm1399_vm4 = vcmp.eq.s32.totalorder %v4616_v49, %v4390_v16 }
 0x40d   : > { %1515 = vmax.xlane.f32.xlu0 %v4563_v38  ;;  %v1289_v41 = vpop.f32.mrb[5].mxu0  ;;  %v1329_v34 = vpop.f32.mrb[5].mxu1  ;;  %vm1410_vm3 = vmand %vm4394_vm5, %vm1391_vm10  ;;  %v1353_v60 = vmul.f32 2.0, %v2369_v58  ;;  %v1361_v50 = vmul.f32 2.0, %v2381_v42  ;;  %v4712_v18 = vld [vmem:[#allocation4 + $0x40] sm:$0xff]  ;;  %v4731_v12 = vld [vmem:[#allocation4 + $0x10] sm:$0xff] }
 0x40e   : > { %vm1423_vm12 = vmxor %vm1407_vm13, %vm3130_vm9  ;;  %v1352_v1 = vmul.f32 2.0, %v1289_v41  ;;  %v1360_v55 = vmul.f32 2.0, %v1329_v34  ;;  %v4724_v41 = vld [vmem:[#allocation4 + $0x18] sm:$0xff]  ;;  %v4829_v49 = vld [vmem:[#allocation4 + $0x70] sm:$0xff] }
 0x40f   : > { %vm1415_vm0 = vmand %vm4394_vm5, %vm1396_vm2  ;;  %v4648_v8 = vsel %vm4585_vm15, %v1353_v60, -1e+30  ;;  %v4664_v3 = vsel %vm4599_vm7, %v1361_v50, -1e+30  ;;  %v4820_v34 = vld [vmem:[#allocation4 + $0x78] sm:$0xff] }
 0x410   : > { %1505 = vmax.xlane.f32.xlu1 %v4581_v9  ;;  %v2372_v59 = vpop.f32.mrb[6].mxu0  ;;  %v2384_v47 = vpop.f32.mrb[6].mxu1  ;;  %vm1426_vm8 = vmxor %vm1410_vm3, %vm3130_vm9  ;;  %vm1398_vm3 = vcmp.eq.s32.totalorder %v4633_v19, %v4390_v16 }
 0x411   : > { %1503 = vmax.xlane.f32.xlu0 %v4593_v29  ;;  %v1299_v37 = vpop.f32.mrb[7].mxu0  ;;  %v1339_v56 = vpop.f32.mrb[7].mxu1  ;;  %vm1455_vm11 = vmand %vm1423_vm12, %vm1450_vm14  ;;  %v1355_v23 = vmul.f32 2.0, %v2372_v59  ;;  %v1363_v36 = vmul.f32 2.0, %v2384_v47 }
 0x412   : > { %vm1431_vm1 = vmxor %vm1415_vm0, %vm3130_vm9  ;;  %v4652_v7 = vsel %vm1455_vm11, %v1352_v1, -1e+30  ;;  %v1354_v2 = vmul.f32 2.0, %v1299_v37  ;;  %v1362_v0 = vmul.f32 2.0, %v1339_v56  ;;  %v4744_v56 = vld [vmem:[#allocation4 + $0x58] sm:$0xff] }
 0x413   : > { %vm4639_vm10 = vmand %vm1426_vm8, %vm1450_vm14  ;;  %v4800_v1 = vld [vmem:[#allocation4 + $0x38] sm:$0xff] }
 0x414   : > { %1521 = vmax.xlane.f32.xlu1 %v4621_v44  ;;  %vm1409_vm13 = vmand %vm4394_vm5, %vm1390_vm6  ;;  %v4678_v17 = vsel %vm4639_vm10, %v1355_v23, -1e+30 }
 0x415   : > { %1519 = vmax.xlane.f32.xlu0 %v4626_v54  ;;  %vm1463_vm2 = vmand %vm1431_vm1, %vm1450_vm14 }
 0x416   : > { %vm1418_vm12 = vmand %vm4394_vm5, %vm1399_vm4  ;;  %v4669_v16 = vsel %vm1463_vm2, %v1360_v55, -1e+30 }
 0x417   : > { %vm1425_vm15 = vmxor %vm1409_vm13, %vm3130_vm9 }
 0x418   : > { %1509 = vmax.xlane.f32.xlu1 %v4648_v8  ;;  %vm1417_vm0 = vmand %vm4394_vm5, %vm1398_vm3 }
 0x419   : > { %1507 = vmax.xlane.f32.xlu0 %v4652_v7  ;;  %vm1434_vm8 = vmxor %vm1418_vm12, %vm3130_vm9 }
 0x41a   : > { %vm1457_vm11 = vmand %vm1425_vm15, %vm1450_vm14 }
 0x41b   : > { %vm1433_vm6 = vmxor %vm1417_vm0, %vm3130_vm9  ;;  %v4683_v39 = vsel %vm1457_vm11, %v1354_v2, -1e+30  ;;  %vm1803_vm9 = vcmask 7168  }
 0x41c   : > { %1525 = vmax.xlane.f32.xlu1 %v4664_v3  ;;  %vm1466_vm5 = vmand %vm1434_vm8, %vm1450_vm14 }
 0x41d   : > { %1523 = vmax.xlane.f32.xlu0 %v4669_v16  ;;  %vm1465_vm7 = vmand %vm1433_vm6, %vm1450_vm14  ;;  %v4688_v30 = vsel %vm1466_vm5, %v1363_v36, -1e+30  ;;  %v4764_v36 = vld [vmem:[#allocation4 + $0x28] sm:$0xff] }
 0x41e   : > { %v4691_v10 = vsel %vm1465_vm7, %v1362_v0, -1e+30 }
 0x420   : > { %1513 = vmax.xlane.f32.xlu1 %v4678_v17 }
 0x421   : > { %1511 = vmax.xlane.f32.xlu0 %v4683_v39 }
 0x424   : > { %1529 = vmax.xlane.f32.xlu1 %v4688_v30 }
 0x425   : > { %1527 = vmax.xlane.f32.xlu0 %v4691_v10 }
 0x495   : > { %v1502_v11 = vpop.xlane.xlu1 %1501 }
 0x496   : > { %v4700_v32 = vmax.f32 %v4695_v27, %v1502_v11  ;;  %v1500_v48 = vpop.xlane.xlu0 %1499  ;;  %v4771_v11 = vld [vmem:[#allocation4 + $0x20] sm:$0xff] }
 0x497   : > { %v4703_v43 = vmax.f32 %v4697_v25, %v1500_v48  ;;  %v4790_v48 = vld [vmem:[#allocation4 + $0x60] sm:$0xff] }
 0x498   : > { %1821 = vst.msk [vmem:[#allocation4 + $0x8] sm:$0xff] %vm1803_vm9, %v4700_v32  ;;  %1602 = vperm.xlu1 %2713, %v4700_v32  }
 0x499   : > { %1820 = vst.msk [vmem:[#allocation4] sm:$0xff] %vm1803_vm9, %v4703_v43  ;;  %v1518_v58 = vpop.xlane.xlu1 %1517 }
 0x49a   : > { %v4719_v42 = vmax.f32 %v4705_v4, %v1518_v58  ;;  %v1516_v28 = vpop.xlane.xlu0 %1515 }
 0x49b   : > { %v4722_v51 = vmax.f32 %v4712_v18, %v1516_v28 }
 0x49c   : > { %1829 = vst.msk [vmem:[#allocation4 + $0x48] sm:$0xff] %vm1803_vm9, %v4719_v42  ;;  %1642 = vperm.xlu0 %2714, %v4719_v42  }
 0x49d   : > { %1828 = vst.msk [vmem:[#allocation4 + $0x40] sm:$0xff] %vm1803_vm9, %v4722_v51  ;;  %v1506_v59 = vpop.xlane.xlu1 %1505  ;;  %1637 = vperm.xlu1 %2713, %v4722_v51  }
 0x49e   : > { %v4739_v47 = vmax.f32 %v4724_v41, %v1506_v59  ;;  %v1504_v60 = vpop.xlane.xlu0 %1503 }
 0x49f   : > { %v4742_v37 = vmax.f32 %v4731_v12, %v1504_v60  ;;  %v4781_v60 = vld [vmem:[#allocation4 + $0x68] sm:$0xff] }
 0x4a0   : > { %1823 = vst.msk [vmem:[#allocation4 + $0x18] sm:$0xff] %vm1803_vm9, %v4739_v47  ;;  %1597 = vperm.xlu0 %2714, %v4703_v43  }
 0x4a1   : > { %1822 = vst.msk [vmem:[#allocation4 + $0x10] sm:$0xff] %vm1803_vm9, %v4742_v37  ;;  %v1522_v55 = vpop.xlane.xlu1 %1521  ;;  %1612 = vperm.xlu1 %2713, %v4739_v47  }
 0x4a2   : > { %v4759_v31 = vmax.f32 %v4744_v56, %v1522_v55  ;;  %v1520_v23 = vpop.xlane.xlu0 %1519 }
 0x4a3   : > { %v4762_v2 = vmax.f32 %v4751_v33, %v1520_v23 }
 0x4a4   : > { %1831 = vst.msk [vmem:[#allocation4 + $0x58] sm:$0xff] %vm1803_vm9, %v4759_v31  ;;  %1652 = vperm.xlu0 %2714, %v4759_v31  }
 0x4a5   : > { %1830 = vst.msk [vmem:[#allocation4 + $0x50] sm:$0xff] %vm1803_vm9, %v4762_v2  ;;  %v1510_v58 = vpop.xlane.xlu1 %1509  ;;  %1607 = vperm.xlu1 %2713, %v4742_v37  }
 0x4a6   : > { %v4779_v28 = vmax.f32 %v4764_v36, %v1510_v58  ;;  %v1508_v59 = vpop.xlane.xlu0 %1507  ;;  %v4810_v58 = vld [vmem:[#allocation4 + $0x30] sm:$0xff] }
 0x4a7   : > { %v4784_v55 = vmax.f32 %v4771_v11, %v1508_v59 }
 0x4a8   : > { %1825 = vst.msk [vmem:[#allocation4 + $0x28] sm:$0xff] %vm1803_vm9, %v4779_v28 }
 0x4a9   : > { %v1526_v0 = vpop.xlane.xlu1 %1525  ;;  %1647 = vperm.xlu1 %2713, %v4762_v2   ;;  %1824 = vst.msk [vmem:[#allocation4 + $0x20] sm:$0xff] %vm1803_vm9, %v4784_v55 }
 0x4aa   : > { %v4798_v59 = vmax.f32 %v4781_v60, %v1526_v0  ;;  %v1524_v50 = vpop.xlane.xlu0 %1523 }
 0x4ab   : > { %v4803_v23 = vmax.f32 %v4790_v48, %v1524_v50 }
 0x4ac   : > { %1833 = vst.msk [vmem:[#allocation4 + $0x68] sm:$0xff] %vm1803_vm9, %v4798_v59  ;;  %1662 = vperm.xlu0 %2714, %v4798_v59  }
 0x4ad   : > { %1622 = vperm.xlu1 %2713, %v4779_v28   ;;  %v1514_v0 = vpop.xlane.xlu1 %1513  ;;  %1832 = vst.msk [vmem:[#allocation4 + $0x60] sm:$0xff] %vm1803_vm9, %v4803_v23 }
 0x4ae   : > { %v4818_v50 = vmax.f32 %v4800_v1, %v1514_v0  ;;  %v1512_v24 = vpop.xlane.xlu0 %1511 }
 0x4af   : > { %v4823_v26 = vmax.f32 %v4810_v58, %v1512_v24 }
 0x4b0   : > { %1827 = vst.msk [vmem:[#allocation4 + $0x38] sm:$0xff] %vm1803_vm9, %v4818_v50 }
 0x4b1   : > { %1617 = vperm.xlu1 %2713, %v4784_v55   ;;  %v1530_v22 = vpop.xlane.xlu1 %1529  ;;  %1826 = vst.msk [vmem:[#allocation4 + $0x30] sm:$0xff] %vm1803_vm9, %v4823_v26 }
 0x4b2   : > { %v4837_v24 = vmax.f32 %v4820_v34, %v1530_v22  ;;  %v1528_v63 = vpop.xlane.xlu0 %1527 }
 0x4b3   : > { %v4840_v19 = vmax.f32 %v4829_v49, %v1528_v63 }
 0x4b4   : > { %1835 = vst.msk [vmem:[#allocation4 + $0x78] sm:$0xff] %vm1803_vm9, %v4837_v24  ;;  %1672 = vperm.xlu0 %2714, %v4837_v24  }
 0x4b5   : > { %1657 = vperm.xlu1 %2713, %v4803_v23   ;;  %1834 = vst.msk [vmem:[#allocation4 + $0x70] sm:$0xff] %vm1803_vm9, %v4840_v19 }
 0x4b9   : > { %1632 = vperm.xlu1 %2713, %v4818_v50  }
 0x4bd   : > { %1627 = vperm.xlu1 %2713, %v4823_v26  }
 0x4c1   : > { %1667 = vperm.xlu1 %2713, %v4840_v19  }
 0x517   : > { %v1603_v63 = vpop.permute.xlu1 %1602 }
 0x518   : > { %v1676_v22 = vsub.f32 %v4527_v52, %v1603_v63 }
 0x51a   : > { %v1693_v62 = vmul.f32 1.442695, %v1676_v22 }
 0x51b   : > { %v1643_v35 = vpop.permute.xlu0 %1642 }
 0x51c   : > { %2779 = vpow2.f32 %v1693_v62  ;;  %v1684_v45 = vsub.f32 %v4548_v15, %v1643_v35  ;;  %v1638_v13 = vpop.permute.xlu1 %1637 }
 0x51d   : > { %v1683_v0 = vsub.f32 %v4563_v38, %v1638_v13 }
 0x51e   : > { %v1709_v53 = vmul.f32 1.442695, %v1684_v45 }
 0x51f   : > { %v1707_v14 = vmul.f32 1.442695, %v1683_v0  ;;  %v1598_v6 = vpop.permute.xlu0 %1597 }
 0x520   : > { %2781 = vpow2.f32 %v1709_v53  ;;  %v1675_v20 = vsub.f32 %v4541_v40, %v1598_v6  ;;  %v1613_v61 = vpop.permute.xlu1 %1612 }
 0x521   : > { %2783 = vpow2.f32 %v1707_v14  ;;  %v1678_v46 = vsub.f32 %v4581_v9, %v1613_v61 }
 0x522   : > { %v1691_v21 = vmul.f32 1.442695, %v1675_v20 }
 0x523   : > { %v1653_v52 = vpop.permute.xlu0 %1652  ;;  %v1697_v63 = vmul.f32 1.442695, %v1678_v46 }
 0x524   : > { %2785 = vpow2.f32 %v1691_v21  ;;  %v1686_v62 = vsub.f32 %v4621_v44, %v1653_v52  ;;  %v1608_v35 = vpop.permute.xlu1 %1607 }
 0x525   : > { %v1677_v15 = vsub.f32 %v4593_v29, %v1608_v35  ;;  %2787 = vpow2.f32 %v1697_v63 }
 0x526   : > { %v2780_v13 = vpop.eup %2779  ;;  %v1713_v53 = vmul.f32 1.442695, %v1686_v62 }
 0x527   : > { %v1695_v45 = vmul.f32 1.442695, %v1677_v15  ;;  %1757 = vadd.xlane.f32.xlu0 %v2780_v13 }
 0x528   : > { %v1648_v38 = vpop.permute.xlu1 %1647 }
 0x529   : > { %2789 = vpow2.f32 %v1695_v45  ;;  %v1685_v6 = vsub.f32 %v4626_v54, %v1648_v38 }
 0x52a   : > { %v2782_v40 = vpop.eup %2781  ;;  %2791 = vpow2.f32 %v1713_v53 }
 0x52b   : > { %v2784_v61 = vpop.eup %2783  ;;  %v1711_v20 = vmul.f32 1.442695, %v1685_v6  ;;  %1773 = vadd.xlane.f32.xlu1 %v2782_v40  ;;  %v1663_v21 = vpop.permute.xlu0 %1662 }
 0x52c   : > { %v1688_v46 = vsub.f32 %v4664_v3, %v1663_v21  ;;  %v1623_v9 = vpop.permute.xlu1 %1622  ;;  %1771 = vadd.xlane.f32.xlu0 %v2784_v61 }
 0x52d   : > { %2793 = vpow2.f32 %v1711_v20  ;;  %v1680_v29 = vsub.f32 %v4648_v8, %v1623_v9 }
 0x52e   : > { %v2786_v14 = vpop.eup %2785  ;;  %v1717_v0 = vmul.f32 1.442695, %v1688_v46 }
 0x52f   : > { %v1701_v44 = vmul.f32 1.442695, %v1680_v29  ;;  %1755 = vadd.xlane.f32.xlu1 %v2786_v14  ;;  %v2788_v52 = vpop.eup %2787 }
 0x530   : > { %v1618_v22 = vpop.permute.xlu1 %1617 }
 0x531   : > { %2795 = vpow2.f32 %v1701_v44  ;;  %v1679_v54 = vsub.f32 %v4652_v7, %v1618_v22 }
 0x532   : > { %2797 = vpow2.f32 %v1717_v0 }
 0x533   : > { %v2790_v63 = vpop.eup %2789  ;;  %v1699_v62 = vmul.f32 1.442695, %v1679_v54  ;;  %1761 = vadd.xlane.f32.xlu1 %v2788_v52  ;;  %v1673_v3 = vpop.permute.xlu0 %1672  ;;  %v5248_v54 = vsub.f32 %v4695_v27, %v4700_v32  ;;  %v5252_v27 = vsub.f32 %v4724_v41, %v4739_v47  ;;  %v1732_v47 = vld [vmem:[#allocation5 + $0x48] sm:$0xff] }
 0x534   : > { %v1658_v35 = vpop.permute.xlu1 %1657  ;;  %1759 = vadd.xlane.f32.xlu0 %v2790_v63  ;;  %v2792_v8 = vpop.eup %2791  ;;  %v1690_v53 = vsub.f32 %v4688_v30, %v1673_v3  ;;  %v5251_v3 = vsub.f32 %v4697_v25, %v4703_v43  ;;  %v5255_v25 = vsub.f32 %v4751_v33, %v4762_v2  ;;  %v1723_v2 = vld [vmem:[#allocation5] sm:$0xff] }
 0x535   : > { %2799 = vpow2.f32 %v1699_v62  ;;  %v1687_v15 = vsub.f32 %v4669_v16, %v1658_v35  ;;  %v1565_v52 = vmul.f32 1.442695, %v5248_v54  ;;  %v5250_v62 = vsub.f32 %v4712_v18, %v4722_v51  ;;  %v1734_v54 = vld [vmem:[#allocation5 + $0x58] sm:$0xff] }
 0x536   : > { %v1721_v61 = vmul.f32 1.442695, %v1690_v53  ;;  %v1569_v32 = vmul.f32 1.442695, %v5252_v27  ;;  %v5254_v18 = vsub.f32 %v4744_v56, %v4759_v31  ;;  %v1583_v43 = vmul.f32 1.442695, %v5255_v25 }
 0x537   : > { %v2794_v13 = vpop.eup %2793  ;;  %v1715_v45 = vmul.f32 1.442695, %v1687_v15  ;;  %1777 = vadd.xlane.f32.xlu1 %v2792_v8  ;;  %v1579_v35 = vmul.f32 1.442695, %v5250_v62  ;;  %v1563_v15 = vmul.f32 1.442695, %v5251_v3  ;;  %v5253_v8 = vsub.f32 %v4731_v12, %v4742_v37 }
 0x538   : > { %v1633_v38 = vpop.permute.xlu1 %1632  ;;  %1775 = vadd.xlane.f32.xlu0 %v2794_v13  ;;  %v1724_v13 = vld [vmem:[#allocation5 + $0x8] sm:$0xff]  ;;  %v1585_v51 = vmul.f32 1.442695, %v5254_v18  ;;  %v1731_v12 = vld [vmem:[#allocation5 + $0x40] sm:$0xff]  ;;  %v5256_v37 = vsub.f32 %v4764_v36, %v4779_v28  ;;  %v1733_v62 = vld [vmem:[#allocation5 + $0x50] sm:$0xff]  ;;  %v5260_v3 = vsub.f32 %v4800_v1, %v4818_v50  ;;  %v5262_v1 = vsub.f32 %v4820_v34, %v4837_v24 }
 0x539   : > { %2801 = vpow2.f32 %v1715_v45  ;;  %v1682_v7 = vsub.f32 %v4678_v17, %v1633_v38 }
 0x53a   : > { %v1593_v50 = vmul.f32 1.442695, %v5262_v1  ;;  %v5265_v1 = vld [vmem:[#allocation39_spill] sm:$0xff] (!%p2283_p11) }
 0x53b   : > { %v2796_v6 = vpop.eup %2795  ;;  %v1705_v40 = vmul.f32 1.442695, %v1682_v7 }
 0x53c   : > { %v1628_v20 = vpop.permute.xlu1 %1627  ;;  %1765 = vadd.xlane.f32.xlu1 %v2796_v6  ;;  %v2798_v16 = vpop.eup %2797  ;;  %v1573_v6 = vmul.f32 1.442695, %v5256_v37 }
 0x53d   : > { %2803 = vpow2.f32 %v1705_v40  ;;  %v1681_v21 = vsub.f32 %v4683_v39, %v1628_v20 }
 0x53e   : > { %2805 = vpow2.f32 %v1721_v61 }
 0x53f   : > { %v2800_v46 = vpop.eup %2799  ;;  %v1703_v9 = vmul.f32 1.442695, %v1681_v21  ;;  %v5257_v21 = vsub.f32 %v4771_v11, %v4784_v55  ;;  %v5259_v11 = vsub.f32 %v4790_v48, %v4803_v23 }
 0x540   : > { %1763 = vadd.xlane.f32.xlu0 %v2800_v46  ;;  %v1668_v29 = vpop.permute.xlu1 %1667  ;;  %1781 = vadd.xlane.f32.xlu1 %v2798_v16 }
 0x541   : > { %2807 = vpow2.f32 %v1703_v9  ;;  %v1689_v30 = vsub.f32 %v4691_v10, %v1668_v29  ;;  %v5249_v10 = vsub.f32 %v4705_v4, %v4719_v42  ;;  %v1567_v4 = vmul.f32 1.442695, %v5253_v8 }
 0x542   : > { %v1571_v16 = vmul.f32 1.442695, %v5257_v21  ;;  %v5258_v9 = vsub.f32 %v4781_v60, %v4798_v59  ;;  %v1587_v55 = vmul.f32 1.442695, %v5259_v11 }
 0x543   : > { %v2802_v14 = vpop.eup %2801  ;;  %v1719_v17 = vmul.f32 1.442695, %v1689_v30  ;;  %v1581_v63 = vmul.f32 1.442695, %v5249_v10 }
 0x544   : > { %1779 = vadd.xlane.f32.xlu0 %v2802_v14  ;;  %v1589_v36 = vmul.f32 1.442695, %v5258_v9  ;;  %v1726_v14 = vld [vmem:[#allocation5 + $0x18] sm:$0xff]  ;;  %v1729_v9 = vld [vmem:[#allocation5 + $0x30] sm:$0xff] }
 0x545   : > { %2809 = vpow2.f32 %v1719_v17 }
 0x546   : > { %2811 = vpow2.f32 %v1565_v52 }
 0x547   : > { %v2804_v44 = vpop.eup %2803  ;;  %2813 = vpow2.f32 %v1581_v63 }
 0x548   : > { %1769 = vadd.xlane.f32.xlu1 %v2804_v44  ;;  %v2806_v0 = vpop.eup %2805  ;;  %2815 = vpow2.f32 %v1579_v35 }
 0x549   : > { %2817 = vpow2.f32 %v1563_v15  ;;  %v1577_v15 = vmul.f32 1.442695, %v5260_v3 }
 0x54a   : > { %2819 = vpow2.f32 %v1569_v32 }
 0x54b   : > { %v2808_v22 = vpop.eup %2807  ;;  %2821 = vpow2.f32 %v1567_v4 }
 0x54c   : > { %1767 = vadd.xlane.f32.xlu0 %v2808_v22  ;;  %1785 = vadd.xlane.f32.xlu1 %v2806_v0  ;;  %2823 = vpow2.f32 %v1585_v51  ;;  %v1725_v0 = vld [vmem:[#allocation5 + $0x10] sm:$0xff] }
 0x54d   : > { %2825 = vpow2.f32 %v1583_v43 }
 0x54e   : > { %2827 = vpow2.f32 %v1573_v6  ;;  %v1735_v6 = vld [vmem:[#allocation5 + $0x60] sm:$0xff] }
 0x54f   : > { %v2810_v39 = vpop.eup %2809  ;;  %2829 = vpow2.f32 %v1571_v16 }
 0x550   : > { %1783 = vadd.xlane.f32.xlu0 %v2810_v39  ;;  %v2812_v42 = vpop.eup %2811  ;;  %2831 = vpow2.f32 %v1589_v36 }
 0x551   : > { %v1740_v45 = vmul.f32 %v2812_v42, %v1724_v13  ;;  %v2814_v53 = vpop.eup %2813  ;;  %2833 = vpow2.f32 %v1587_v55  ;;  %v1728_v42 = vld [vmem:[#allocation5 + $0x28] sm:$0xff]  ;;  %v5261_v13 = vsub.f32 %v4810_v58, %v4823_v26  ;;  %v5263_v26 = vsub.f32 %v4829_v49, %v4840_v19  ;;  %v1730_v49 = vld [vmem:[#allocation5 + $0x38] sm:$0xff] }
 0x552   : > { %v2816_v38 = vpop.eup %2815  ;;  %v1748_v56 = vmul.f32 %v2814_v53, %v1732_v47  ;;  %2835 = vpow2.f32 %v1577_v15  ;;  %v1727_v47 = vld [vmem:[#allocation5 + $0x20] sm:$0xff] }
 0x553   : > { %v2818_v31 = vpop.eup %2817  ;;  %v1747_v33 = vmul.f32 %v2816_v38, %v1731_v12  ;;  %v1575_v18 = vmul.f32 1.442695, %v5261_v13  ;;  %v1591_v58 = vmul.f32 1.442695, %v5263_v26 }
 0x554   : > { %v1739_v28 = vmul.f32 %v2818_v31, %v1723_v2  ;;  %v2820_v29 = vpop.eup %2819 }
 0x555   : > { %v2822_v17 = vpop.eup %2821  ;;  %v1742_v60 = vmul.f32 %v2820_v29, %v1726_v14  ;;  %2837 = vpow2.f32 %v1575_v18  ;;  %v1840_v18 = vld [vmem:[#allocation4] sm:$0xff] (!%p2283_p11) }
 0x556   : > { %v2824_v59 = vpop.eup %2823  ;;  %v1741_v39 = vmul.f32 %v2822_v17, %v1725_v0  ;;  %2839 = vpow2.f32 %v1593_v50 }
 0x557   : > { %v2826_v52 = vpop.eup %2825  ;;  %v1750_v48 = vmul.f32 %v2824_v59, %v1734_v54  ;;  %2841 = vpow2.f32 %v1591_v58  ;;  %v1920_v58 = vld [vmem:[#allocation3] sm:$0xff] (!%p2283_p11) }
 0x558   : > { %v1749_v27 = vmul.f32 %v2826_v52, %v1733_v62  ;;  %v2828_v32 = vpop.eup %2827 }
 0x559   : > { %v2830_v25 = vpop.eup %2829  ;;  %v1744_v43 = vmul.f32 %v2828_v32, %v1728_v42  ;;  %v1842_v32 = vld [vmem:[#allocation4 + $0x10] sm:$0xff] (!%p2283_p11) }
 0x55a   : > { %v1743_v24 = vmul.f32 %v2830_v25, %v1727_v47 }
 0x5b4   : > { %v1758_v41 = vpop.xlane.xlu0 %1757 }
 0x5b5   : > { %v1788_v7 = vadd.f32 %v1758_v41, %v1740_v45  ;;  %v2832_v45 = vpop.eup %2831  ;;  %v1736_v41 = vld [vmem:[#allocation5 + $0x68] sm:$0xff] }
 0x5b6   : > { %v1752_v34 = vmul.f32 %v2832_v45, %v1736_v41  ;;  %v5266_v41 = vld [vmem:[#allocation36_spill] sm:$0xff] (!%p2283_p11) }
 0x5b7   : > { %1805 = vst.msk [vmem:[#allocation5 + $0x8] sm:$0xff] %vm1803_vm9, %v1788_v7  ;;  %v2834_v7 = vpop.eup %2833 }
 0x5b8   : > { %v1774_v40 = vpop.xlane.xlu1 %1773 }
 0x5b9   : > { %v1796_v61 = vadd.f32 %v1774_v40, %v1748_v56  ;;  %v1772_v20 = vpop.xlane.xlu0 %1771  ;;  %v1751_v40 = vmul.f32 %v2834_v7, %v1735_v6 }
 0x5ba   : > { %v1795_v46 = vadd.f32 %v1772_v20, %v1747_v33  ;;  %v2836_v33 = vpop.eup %2835 }
 0x5bb   : > { %1813 = vst.msk [vmem:[#allocation5 + $0x48] sm:$0xff] %vm1803_vm9, %v1796_v61  ;;  %v2838_v61 = vpop.eup %2837  ;;  %v1746_v20 = vmul.f32 %v2836_v33, %v1730_v49 }
 0x5bc   : > { %1812 = vst.msk [vmem:[#allocation5 + $0x40] sm:$0xff] %vm1803_vm9, %v1795_v46  ;;  %v1756_v30 = vpop.xlane.xlu1 %1755  ;;  %v2840_v21 = vpop.eup %2839  ;;  %v1738_v46 = vld [vmem:[#allocation5 + $0x78] sm:$0xff]  ;;  %v1745_v29 = vmul.f32 %v2838_v61, %v1729_v9  ;;  %v1925_v9 = vld [vmem:[#allocation3 + $0x28] sm:$0xff] (!%p2283_p11) }
 0x5bd   : > { %v1787_v44 = vadd.f32 %v1756_v30, %v1739_v28  ;;  %v1754_v28 = vmul.f32 %v2840_v21, %v1738_v46  ;;  %v2842_v30 = vpop.eup %2841 }
 0x5bf   : > { %1804 = vst.msk [vmem:[#allocation5] sm:$0xff] %vm1803_vm9, %v1787_v44  ;;  %v1737_v44 = vld [vmem:[#allocation5 + $0x70] sm:$0xff] }
 0x5c0   : > { %v1762_v22 = vpop.xlane.xlu1 %1761  ;;  %v1753_v55 = vmul.f32 %v2842_v30, %v1737_v44  ;;  %v1924_v44 = vld [vmem:[#allocation3 + $0x20] sm:$0xff] (!%p2283_p11) }
 0x5c1   : > { %v1790_v10 = vadd.f32 %v1762_v22, %v1742_v60  ;;  %v1760_v63 = vpop.xlane.xlu0 %1759 }
 0x5c2   : > { %v1789_v35 = vadd.f32 %v1760_v63, %v1741_v39  ;;  %v3132_v39 = vmov (!%p2283_p11), 0   ;;  %v1865_v15 = vld [vmem:[#allocation5 + $0x48] sm:$0xff] (!%p2283_p11) }
 0x5c3   : > { %1807 = vst.msk [vmem:[#allocation5 + $0x18] sm:$0xff] %vm1803_vm9, %v1790_v10  ;;  %2844 = vset.pattern.permute.xlu1 (!%p2283_p11), %v3132_v39  ;;  %2843 = vset.pattern.permute.xlu0 (!%p2283_p11), %v3132_v39  ;;  %v1857_v10 = vld [vmem:[#allocation5 + $0x8] sm:$0xff] (!%p2283_p11) }
 0x5c4   : > { %1806 = vst.msk [vmem:[#allocation5 + $0x10] sm:$0xff] %vm1803_vm9, %v1789_v35  ;;  %v1778_v23 = vpop.xlane.xlu1 %1777 }
 0x5c5   : > { %v1798_v8 = vadd.f32 %v1778_v23, %v1750_v48  ;;  %v1776_v4 = vpop.xlane.xlu0 %1775  ;;  %v1864_v48 = vld [vmem:[#allocation5 + $0x40] sm:$0xff] (!%p2283_p11) }
 0x5c6   : > { %v1797_v51 = vadd.f32 %v1776_v4, %v1749_v27  ;;  %v1856_v54 = vld [vmem:[#allocation5] sm:$0xff] (!%p2283_p11) }
 0x5c7   : > { %1815 = vst.msk [vmem:[#allocation5 + $0x58] sm:$0xff] %vm1803_vm9, %v1798_v8 }
 0x5c8   : > { %1814 = vst.msk [vmem:[#allocation5 + $0x50] sm:$0xff] %vm1803_vm9, %v1797_v51 }
 0x5c9   : > { %v1766_v53 = vpop.xlane.xlu1 %1765 }
 0x5ca   : > { %v1792_v38 = vadd.f32 %v1766_v53, %v1744_v43  ;;  %v1859_v52 = vld [vmem:[#allocation5 + $0x18] sm:$0xff] (!%p2283_p11)  ;;  %v1922_v43 = vld [vmem:[#allocation3 + $0x10] sm:$0xff] (!%p2283_p11) }
 0x5cb   : > { %v1858_v22 = vld [vmem:[#allocation5 + $0x10] sm:$0xff] (!%p2283_p11)  ;;  %v1843_v53 = vld [vmem:[#allocation4 + $0x18] sm:$0xff] (!%p2283_p11) }
 0x5cc   : > { %1809 = vst.msk [vmem:[#allocation5 + $0x28] sm:$0xff] %vm1803_vm9, %v1792_v38  ;;  %2845 = vlog2.f32 (!%p2283_p11), %v1858_v22  ;;  %v5269_v22 = vld [vmem:[#allocation45_spill] sm:$0xff] (!%p2283_p11) }
 0x5cd   : > { %v1782_v12 = vpop.xlane.xlu1 %1781  ;;  %v1764_v37 = vpop.xlane.xlu0 %1763  ;;  %2847 = vlog2.f32 (!%p2283_p11), %v1856_v54  ;;  %v1846_v54 = vld [vmem:[#allocation4 + $0x30] sm:$0xff] (!%p2283_p11) }
 0x5ce   : > { %v1800_v56 = vadd.f32 %v1782_v12, %v1752_v34  ;;  %v1791_v31 = vadd.f32 %v1764_v37, %v1743_v24  ;;  %2849 = vlog2.f32 (!%p2283_p11), %v1859_v52  ;;  %v1867_v23 = vld [vmem:[#allocation5 + $0x58] sm:$0xff] (!%p2283_p11)  ;;  %v1841_v24 = vld [vmem:[#allocation4 + $0x8] sm:$0xff] (!%p2283_p11)  ;;  %v5268_v12 = vld [vmem:[#allocation44_spill] sm:$0xff] (!%p2283_p11) }
 0x5cf   : > { %2851 = vlog2.f32 (!%p2283_p11), %v1857_v10 }
 0x5d0   : > { %1817 = vst.msk [vmem:[#allocation5 + $0x68] sm:$0xff] %vm1803_vm9, %v1800_v56  ;;  %1808 = vst.msk [vmem:[#allocation5 + $0x20] sm:$0xff] %vm1803_vm9, %v1791_v31  ;;  %v1923_v56 = vld [vmem:[#allocation3 + $0x18] sm:$0xff] (!%p2283_p11) }
 0x5d1   : > { %v1780_v2 = vpop.xlane.xlu0 %1779 }
 0x5d2   : > { %v1799_v19 = vadd.f32 %v1780_v2, %v1751_v40  ;;  %v1845_v40 = vld [vmem:[#allocation4 + $0x28] sm:$0xff] (!%p2283_p11) }
 0x5d3   : > { %v1861_v63 = vld [vmem:[#allocation5 + $0x28] sm:$0xff] (!%p2283_p11) }
 0x5d4   : > { %1816 = vst.msk [vmem:[#allocation5 + $0x60] sm:$0xff] %vm1803_vm9, %v1799_v19  ;;  %2853 = vlog2.f32 (!%p2283_p11), %v1861_v63  ;;  %v1921_v19 = vld [vmem:[#allocation3 + $0x8] sm:$0xff] (!%p2283_p11) }
 0x5d5   : > { %v1770_v16 = vpop.xlane.xlu1 %1769 }
 0x5d6   : > { %v1794_v36 = vadd.f32 %v1770_v16, %v1746_v20  ;;  %v2846_v27 = vpop.eup (!%p2283_p11), %2845  ;;  %v1844_v20 = vld [vmem:[#allocation4 + $0x20] sm:$0xff] (!%p2283_p11) }
 0x5d7   : > { %v1860_v62 = vld [vmem:[#allocation5 + $0x20] sm:$0xff] (!%p2283_p11)  ;;  %v2848_v4 = vpop.eup (!%p2283_p11), %2847  ;;  %v1877_v42 = vmul.f32 (!%p2283_p11), 0.6931472, %v2846_v27  ;;  %v1849_v27 = vld [vmem:[#allocation4 + $0x48] sm:$0xff] (!%p2283_p11) }
 0x5d8   : > { %1811 = vst.msk [vmem:[#allocation5 + $0x38] sm:$0xff] %vm1803_vm9, %v1794_v36  ;;  %2855 = vlog2.f32 (!%p2283_p11), %v1860_v62  ;;  %v2850_v25 = vpop.eup (!%p2283_p11), %2849  ;;  %v1873_v45 = vmul.f32 (!%p2283_p11), 0.6931472, %v2848_v4  ;;  %v1926_v4 = vld [vmem:[#allocation3 + $0x30] sm:$0xff] (!%p2283_p11) }
 0x5d9   : > { %v1786_v14 = vpop.xlane.xlu1 %1785  ;;  %v1768_v17 = vpop.xlane.xlu0 %1767  ;;  %v1906_v26 = vadd.f32 (!%p2283_p11), %v1877_v42, %v1842_v32  ;;  %v1879_v34 = vmul.f32 (!%p2283_p11), 0.6931472, %v2850_v25  ;;  %v5270_v42 = vld [vmem:[#allocation47_spill] sm:$0xff] (!%p2283_p11)  ;;  %v1866_v25 = vld [vmem:[#allocation5 + $0x50] sm:$0xff] (!%p2283_p11) }
 0x5da   : > { %v1802_v0 = vadd.f32 %v1786_v14, %v1754_v28  ;;  %v1793_v11 = vadd.f32 %v1768_v17, %v1745_v29  ;;  %1839 = sbr.rel (%p2283_p11) target bundleno = 1671 (0x687), region = 52  ;;  %v2852_v38 = vpop.eup (!%p2283_p11), %2851  ;;  %v1904_v6 = vadd.f32 (!%p2283_p11), %v1873_v45, %v1840_v18  ;;  %v1847_v28 = vld [vmem:[#allocation4 + $0x38] sm:$0xff] (!%p2283_p11) }
 0x5db   : > { %v1875_v31 = vmul.f32 (!%p2283_p11), 0.6931472, %v2852_v38  ;;  %v1938_v2 = vsub.f32 (!%p2283_p11), %v1906_v26, %v1922_v43  ;;  %v1907_v49 = vadd.f32 (!%p2283_p11), %v1879_v34, %v1843_v53  ;;  %v5271_v53 = vld [vmem:[#allocation37_spill] sm:$0xff] (!%p2283_p11)  ;;  %v1851_v34 = vld [vmem:[#allocation4 + $0x58] sm:$0xff] (!%p2283_p11) }
 0x5dc   : > { %1819 = vst.msk [vmem:[#allocation5 + $0x78] sm:$0xff] %vm1803_vm9, %v1802_v0  ;;  %1810 = vst.msk [vmem:[#allocation5 + $0x30] sm:$0xff] %vm1803_vm9, %v1793_v11  ;;  %v1936_v16 = vsub.f32 (!%p2283_p11), %v1904_v6, %v1920_v58  ;;  %v1929_v26 = vld [vmem:[#allocation3 + $0x48] sm:$0xff] (!%p2283_p11) }
 0x5dd   : > { %v1784_v60 = vpop.xlane.xlu0 %1783  ;;  %v1905_v46 = vadd.f32 (!%p2283_p11), %v1875_v31, %v1841_v24  ;;  %v1939_v14 = vsub.f32 (!%p2283_p11), %v1907_v49, %v1923_v56 }
 0x5de   : > { %v1801_v59 = vadd.f32 %v1784_v60, %v1753_v55  ;;  %v2854_v37 = vpop.eup (!%p2283_p11), %2853 }
 0x5df   : > { %v1863_v35 = vld [vmem:[#allocation5 + $0x38] sm:$0xff] (!%p2283_p11)  ;;  %v1883_v61 = vmul.f32 (!%p2283_p11), 0.6931472, %v2854_v37  ;;  %v1937_v60 = vsub.f32 (!%p2283_p11), %v1905_v46, %v1921_v19  ;;  %v1868_v37 = vld [vmem:[#allocation5 + $0x60] sm:$0xff] (!%p2283_p11) }
 0x5e0   : > { %1818 = vst.msk [vmem:[#allocation5 + $0x70] sm:$0xff] %vm1803_vm9, %v1801_v59  ;;  %2857 = vlog2.f32 (!%p2283_p11), %v1863_v35  ;;  %v1927_v35 = vld [vmem:[#allocation3 + $0x38] sm:$0xff] (!%p2283_p11) }
 0x5e1   : > { %s5316_s3 = smov (!%p1953_p10, %s1957_s3), %s1956_s27  ;;  %v1909_v17 = vadd.f32 %v1883_v61, %v1845_v40  ;;  %v1931_v19 = vld [vmem:[#allocation3 + $0x58] sm:$0xff]  ;;  %v5273_v61 = vld [vmem:[#allocation40_spill] sm:$0xff] }
 0x5e2   : > { %p2287_p3 = scmp.lt.s32.totalorder %s5316_s3, 0  ;;  %s1963_s21 = sadd.s32 128, %s5316_s3  ;;  %v2856_v33 = vpop.eup %2855 }
 0x5e3   : > { %v1862_v3 = vld [vmem:[#allocation5 + $0x30] sm:$0xff]  ;;  %v1881_v36 = vmul.f32 0.6931472, %v2856_v33  ;;  %v1941_v63 = vsub.f32 %v1909_v17, %v1925_v9  ;;  %v1871_v56 = vld [vmem:[#allocation5 + $0x78] sm:$0xff] }
 0x5e4   : > { %2859 = vlog2.f32 %v1862_v3  ;;  %s5318_s21 = smov (!%p2287_p3, %s1963_s21), %s5316_s3 }
 0x5e5   : > { %2861 = vlog2.f32 %v1865_v15  ;;  %v4937_v8 = vstv %s5318_s21  ;;  %v1908_v59 = vadd.f32 %v1881_v36, %v1844_v20 }
 0x5e6   : > { %2863 = vlog2.f32 %v1864_v48  ;;  %v1968_v13 = vadd.s32 %v4937_v8, %v4422_v57  ;;  %v1966_v51 = vadd.s32 %v4937_v8, %v4385_v5  ;;  %v1969_v50 = vadd.s32 %v4937_v8, %v5265_v1  ;;  %v5267_v57 = vld [vmem:[#allocation42_spill] sm:$0xff] }
 0x5e7   : > { %2865 = vlog2.f32 %v1867_v23  ;;  %v1967_v47 = vadd.s32 %v4937_v8, %v5266_v41  ;;  %v1971_v7 = vadd.s32 %v4937_v8, %v5267_v57  ;;  %v4951_v5 = vadd.s32 %v4937_v8, %v5268_v12  ;;  %v1869_v57 = vld [vmem:[#allocation5 + $0x68] sm:$0xff]  ;;  %v5272_v12 = vld [vmem:[#allocation38_spill] sm:$0xff] }
 0x5e8   : > { %vm1984_vm14 = vcmp.lt.s32.totalorder %v1968_v13, 4  ;;  %vm1982_vm1 = vcmp.lt.s32.totalorder %v1966_v51, 4  ;;  %vm1985_vm10 = vcmp.lt.s32.totalorder %v1969_v50, 4  ;;  %v1973_v39 = vadd.s32 %v4937_v8, %v5269_v22  ;;  %v1848_v51 = vld [vmem:[#allocation4 + $0x40] sm:$0xff]  ;;  %v1870_v33 = vld [vmem:[#allocation5 + $0x70] sm:$0xff] }
 0x5e9   : > { %vm1983_vm4 = vcmp.lt.s32.totalorder %v1967_v47, 4  ;;  %v2000_v30 = vsel %vm1984_vm14, %v1938_v2, 0.0  ;;  %v1998_v55 = vsel %vm1982_vm1, %v1936_v16, 0.0  ;;  %v2001_v10 = vsel %vm1985_vm10, %v1939_v14, 0.0 }
 0x5ea   : > { %v2858_v21 = vpop.eup %2857  ;;  %2026 = vperm.xlu1 %2844, %v2000_v30   ;;  %2016 = vperm.xlu0 %2843, %v1998_v55   ;;  %v1999_v48 = vsel %vm1983_vm4, %v1937_v60, 0.0  ;;  %vm1987_vm13 = vcmp.lt.s32.totalorder %v1971_v7, 4  ;;  %v1940_v23 = vsub.f32 %v1908_v59, %v1924_v44  ;;  %vm1986_vm2 = vcmp.lt.s32.totalorder %v4951_v5, 4  ;;  %v1928_v7 = vld [vmem:[#allocation3 + $0x40] sm:$0xff]  ;;  %v1930_v44 = vld [vmem:[#allocation3 + $0x50] sm:$0xff] }
 0x5eb   : > { %v1887_v0 = vmul.f32 0.6931472, %v2858_v21  ;;  %v1972_v13 = vadd.s32 %v4937_v8, %v5270_v42  ;;  %v2003_v43 = vsel %vm1987_vm13, %v1941_v63, 0.0  ;;  %vm1989_vm3 = vcmp.lt.s32.totalorder %v1973_v39, 4  ;;  %v1852_v39 = vld [vmem:[#allocation4 + $0x60] sm:$0xff]  ;;  %v1933_v63 = vld [vmem:[#allocation3 + $0x68] sm:$0xff] }
 0x5ec   : > { %v1975_v41 = vadd.s32 %v4937_v8, %v5271_v53  ;;  %v2002_v47 = vsel %vm1986_vm2, %v1940_v23, 0.0  ;;  %v1974_v5 = vadd.s32 %v4937_v8, %v5272_v12  ;;  %2867 = vlog2.f32 %v1866_v25  ;;  %v1854_v42 = vld [vmem:[#allocation4 + $0x70] sm:$0xff] }
 0x5ed   : > { %v1911_v62 = vadd.f32 %v1887_v0, %v1847_v28  ;;  %vm1988_vm12 = vcmp.lt.s32.totalorder %v1972_v13, 4  ;;  %2869 = vlog2.f32 %v1869_v57  ;;  %v1977_v20 = vadd.s32 %v4937_v8, %v5273_v61  ;;  %v1850_v28 = vld [vmem:[#allocation4 + $0x50] sm:$0xff]  ;;  %v1853_v0 = vld [vmem:[#allocation4 + $0x68] sm:$0xff] }
 0x5ee   : > { %v2860_v29 = vpop.eup %2859  ;;  %2031 = vperm.xlu1 %2844, %v2001_v10   ;;  %2021 = vperm.xlu0 %2843, %v1999_v48   ;;  %vm1991_vm15 = vcmp.lt.s32.totalorder %v1975_v41, 4  ;;  %2871 = vlog2.f32 %v1868_v37  ;;  %vm1990_vm0 = vcmp.lt.s32.totalorder %v1974_v5, 4  ;;  %v1934_v53 = vld [vmem:[#allocation3 + $0x70] sm:$0xff] }
 0x5ef   : > { %v2862_v11 = vpop.eup %2861  ;;  %v1885_v3 = vmul.f32 0.6931472, %v2860_v29  ;;  %v1943_v1 = vsub.f32 %v1911_v62, %v1927_v35  ;;  %2873 = vlog2.f32 %v1871_v56  ;;  %vm1993_vm8 = vcmp.lt.s32.totalorder %v1977_v20, 4  ;;  %v5274_v29 = vld [vmem:[#allocation41_spill] sm:$0xff]  ;;  %v1855_v35 = vld [vmem:[#allocation4 + $0x78] sm:$0xff] }
 0x5f0   : > { %v2864_v52 = vpop.eup %2863  ;;  %v1891_v18 = vmul.f32 0.6931472, %v2862_v11  ;;  %2875 = vlog2.f32 %v1870_v33  ;;  %v1976_v30 = vadd.s32 %v4937_v8, %v5274_v29  ;;  %v5275_v11 = vld [vmem:[#allocation43_spill] sm:$0xff] }
 0x5f1   : > { %v2866_v15 = vpop.eup %2865  ;;  %v1910_v32 = vadd.f32 %v1885_v3, %v1846_v54  ;;  %v1889_v50 = vmul.f32 0.6931472, %v2864_v52  ;;  %v2005_v6 = vsel %vm1989_vm3, %v1943_v1, 0.0  ;;  %v1979_v55 = vadd.s32 %v4937_v8, %v5275_v11  ;;  %v5276_v54 = vld [vmem:[#allocation46_spill] sm:$0xff]  ;;  %v5277_v3 = vld [vmem:[#allocation48_spill] sm:$0xff]  ;;  %v5278_v1 = vld [vmem:[#allocation49_spill] sm:$0xff] }
 0x5f2   : > { %v1913_v45 = vadd.f32 %v1891_v18, %v1849_v27  ;;  %v1895_v24 = vmul.f32 0.6931472, %v2866_v15  ;;  %2041 = vperm.xlu1 %2844, %v2003_v43   ;;  %2036 = vperm.xlu0 %2843, %v2002_v47   ;;  %v1978_v52 = vadd.s32 %v4937_v8, %v5276_v54  ;;  %vm1992_vm11 = vcmp.lt.s32.totalorder %v1976_v30, 4  ;;  %v1935_v18 = vld [vmem:[#allocation3 + $0x78] sm:$0xff] }
 0x5f3   : > { %v1942_v38 = vsub.f32 %v1910_v32, %v1926_v4  ;;  %v1912_v58 = vadd.f32 %v1889_v50, %v1848_v51  ;;  %v1981_v15 = vadd.s32 %v4937_v8, %v5277_v3  ;;  %v1932_v32 = vld [vmem:[#allocation3 + $0x60] sm:$0xff]  ;;  %vm1995_vm6 = vcmp.lt.s32.totalorder %v1979_v55, 4 }
 0x5f4   : > { %v1945_v31 = vsub.f32 %v1913_v45, %v1929_v26  ;;  %v1915_v40 = vadd.f32 %v1895_v24, %v1851_v34  ;;  %v1980_v50 = vadd.s32 %v4937_v8, %v5278_v1  ;;  %vm1994_vm5 = vcmp.lt.s32.totalorder %v1978_v52, 4 }
 0x5f5   : > { %v2004_v2 = vsel %vm1988_vm12, %v1942_v38, 0.0  ;;  %v1944_v49 = vsub.f32 %v1912_v58, %v1928_v7  ;;  %vm1997_vm7 = vcmp.lt.s32.totalorder %v1981_v15, 4 }
 0x5f6   : > { %2051 = vperm.xlu1 %2844, %v2005_v6   ;;  %2046 = vperm.xlu0 %2843, %v2004_v2   ;;  %v2007_v21 = vsel %vm1991_vm15, %v1945_v31, 0.0  ;;  %v1947_v16 = vsub.f32 %v1915_v40, %v1931_v19  ;;  %v2868_v9 = vpop.eup %2867  ;;  %vm1996_vm9 = vcmp.lt.s32.totalorder %v1980_v50, 4 }
 0x5f7   : > { %v2006_v46 = vsel %vm1990_vm0, %v1944_v49, 0.0  ;;  %v1893_v14 = vmul.f32 0.6931472, %v2868_v9  ;;  %v2870_v17 = vpop.eup %2869 }
 0x5f8   : > { %v2009_v36 = vsel %vm1993_vm8, %v1947_v16, 0.0  ;;  %v2872_v60 = vpop.eup %2871  ;;  %v1899_v22 = vmul.f32 0.6931472, %v2870_v17 }
 0x5f9   : > { %v1914_v59 = vadd.f32 %v1893_v14, %v1850_v28  ;;  %v2874_v10 = vpop.eup %2873  ;;  %v1897_v62 = vmul.f32 0.6931472, %v2872_v60 }
 0x5fa   : > { %2061 = vperm.xlu1 %2844, %v2007_v21   ;;  %2056 = vperm.xlu0 %2843, %v2006_v46   ;;  %v2876_v48 = vpop.eup %2875  ;;  %v1917_v27 = vadd.f32 %v1899_v22, %v1853_v0  ;;  %v1903_v4 = vmul.f32 0.6931472, %v2874_v10 }
 0x5fb   : > { %v1946_v23 = vsub.f32 %v1914_v59, %v1930_v44  ;;  %v1916_v13 = vadd.f32 %v1897_v62, %v1852_v39  ;;  %v1901_v51 = vmul.f32 0.6931472, %v2876_v48 }
 0x5fc   : > { %v1949_v43 = vsub.f32 %v1917_v27, %v1933_v63  ;;  %v1919_v45 = vadd.f32 %v1903_v4, %v1855_v35 }
 0x5fd   : > { %v2008_v25 = vsel %vm1992_vm11, %v1946_v23, 0.0  ;;  %v1948_v41 = vsub.f32 %v1916_v13, %v1932_v32  ;;  %v1918_v47 = vadd.f32 %v1901_v51, %v1854_v42 }
 0x5fe   : > { %2071 = vperm.xlu1 %2844, %v2009_v36   ;;  %2066 = vperm.xlu0 %2843, %v2008_v25   ;;  %v2011_v38 = vsel %vm1995_vm6, %v1949_v43, 0.0  ;;  %v1951_v26 = vsub.f32 %v1919_v45, %v1935_v18 }
 0x5ff   : > { %v2010_v58 = vsel %vm1994_vm5, %v1948_v41, 0.0  ;;  %v1950_v34 = vsub.f32 %v1918_v47, %v1934_v53 }
 0x600   : > { %v2013_v8 = vsel %vm1997_vm7, %v1951_v26, 0.0 }
 0x601   : > { %v2012_v24 = vsel %vm1996_vm9, %v1950_v34, 0.0 }
 0x602   : > { %2081 = vperm.xlu1 %2844, %v2011_v38   ;;  %2076 = vperm.xlu0 %2843, %v2010_v58  }
 0x606   : > { %2091 = vperm.xlu1 %2844, %v2013_v8   ;;  %2086 = vperm.xlu0 %2843, %v2012_v24  }
 0x669   : > { %v2027_v57 = vpop.permute.xlu1 %2026  ;;  %v2017_v7 = vpop.permute.xlu0 %2016 }
 0x66a   : > { %2096 = vst [vmem:[%s3507_s26 + $0x10] sm:$0xff] %v2027_v57  ;;  %2094 = vst [vmem:[%s3507_s26] sm:$0xff] %v2017_v7 }
 0x66d   : > { %v2032_v12 = vpop.permute.xlu1 %2031  ;;  %v2022_v5 = vpop.permute.xlu0 %2021 }
 0x66e   : > { %2097 = vst [vmem:[%s3507_s26 + $0x18] sm:$0xff] %v2032_v12  ;;  %2095 = vst [vmem:[%s3507_s26 + $0x8] sm:$0xff] %v2022_v5 }
 0x671   : > { %v2042_v37 = vpop.permute.xlu1 %2041  ;;  %v2037_v6 = vpop.permute.xlu0 %2036 }
 0x672   : > { %2099 = vst [vmem:[%s3507_s26 + $0x28] sm:$0xff] %v2042_v37  ;;  %2098 = vst [vmem:[%s3507_s26 + $0x20] sm:$0xff] %v2037_v6 }
 0x675   : > { %v2052_v56 = vpop.permute.xlu1 %2051  ;;  %v2047_v31 = vpop.permute.xlu0 %2046 }
 0x676   : > { %2101 = vst [vmem:[%s3507_s26 + $0x38] sm:$0xff] %v2052_v56  ;;  %2100 = vst [vmem:[%s3507_s26 + $0x30] sm:$0xff] %v2047_v31 }
 0x679   : > { %v2062_v40 = vpop.permute.xlu1 %2061  ;;  %v2057_v33 = vpop.permute.xlu0 %2056 }
 0x67a   : > { %2103 = vst [vmem:[%s3507_s26 + $0x48] sm:$0xff] %v2062_v40  ;;  %2102 = vst [vmem:[%s3507_s26 + $0x40] sm:$0xff] %v2057_v33 }
 0x67d   : > { %v2072_v2 = vpop.permute.xlu1 %2071  ;;  %v2067_v49 = vpop.permute.xlu0 %2066 }
 0x67e   : > { %2105 = vst [vmem:[%s3507_s26 + $0x58] sm:$0xff] %v2072_v2  ;;  %2104 = vst [vmem:[%s3507_s26 + $0x50] sm:$0xff] %v2067_v49 }
 0x681   : > { %v2082_v19 = vpop.permute.xlu1 %2081  ;;  %v2077_v61 = vpop.permute.xlu0 %2076 }
 0x682   : > { %2107 = vst [vmem:[%s3507_s26 + $0x68] sm:$0xff] %v2082_v19  ;;  %2106 = vst [vmem:[%s3507_s26 + $0x60] sm:$0xff] %v2077_v61 }
 0x685   : > { %v2092_v20 = vpop.permute.xlu1 %2091  ;;  %v2087_v21 = vpop.permute.xlu0 %2086 }
 0x686   : > { %2109 = vst [vmem:[%s3507_s26 + $0x78] sm:$0xff] %v2092_v20  ;;  %2108 = vst [vmem:[%s3507_s26 + $0x70] sm:$0xff] %v2087_v21 }
 0x687 PF: > { %s5279_s10 = sld [smem:[#allocation18_spill]]  ;;  %s2124_s0 = sshll.u32 %s3507_s26, 4  ;;  %s5003_s0 = int_to_ptr.vmem [resolvable:$true] %s2124_s0 }
 0x688   : > { %s5280_s24 = sld [smem:[#allocation52_spill]]  ;;  %s2111_s15 = scalar_lea.sflag [#allocation8], %s3482_s17 }
 0x689   : > { %s2967_s23 = scalar_lea.vmem %s5003_s0, 2048  ;;  %p5282_p1 = scmp.ne.s32.totalorder %s5149_s22, 0 }
 0x68a   : > { %p2968_p12 = scmp.ne.s32.totalorder %s5003_s0, %s2967_s23  ;;  %s3133_s9 = smov [#allocation12]  }
 0x68b   : > { %s2971_s11 = sshll.u32 %s3133_s9, 4  ;;  %s2972_s11 = int_to_ptr.vmem [resolvable:$false] %s2971_s11 }
 0x68c   : > { %p2969_p13 = pnand %p2968_p12, %p5282_p1  ;;  %s2973_s7 = scalar_lea.vmem %s2972_s11, 4096 }
 0x68d   : > { %s2296_s29 = sshll.u32 %s5279_s10, 11  ;;  %p2974_p9 = scmp.lt.s32.totalorder %s5003_s0, %s2972_s11 }
 0x68e   : > { %s5281_s6 = smov %s5280_s24  ;;  %s5000_s12 = scalar_lea.hbm %s5280_s24, %s2296_s29 }
 0x68f   : > { %p2970_p0 = pneg %p2969_p13  ;;  %p2975_p8 = scmp.lt.s32.totalorder %s2973_s7, %s2967_s23 }
 0x691   : > { %p2976_p4 = por %p2975_p8, %p2974_p9 }
 0x693   : > { %p2977_p5 = pnand %p2976_p4, %p2970_p0 }
 0x695   : > { %2980 = shalt.err (!%p2977_p5)
}
 0x696   : > { %s2981_s26 = scalar_lea.hbm %s5000_s12, 2048  ;;  %s2985_s27 = scalar_lea.hbm %s5281_s6, 4096 }
 0x697   : > { %p2982_p2 = scmp.ne.s32.totalorder %s5000_s12, %s2981_s26  ;;  %p2986_p11 = scmp.lt.u32.totalorder %s5000_s12, %s5281_s6 }
 0x698   : > { %p2987_p10 = scmp.lt.u32.totalorder %s2985_s27, %s2981_s26  ;;  %p2989_p12 = scmp.lt.u32.totalorder %s2981_s26, %s5000_s12 }
 0x699   : > { %p2983_p6 = pnand %p2982_p2, %p5282_p1 }
 0x69a   : > { %p2988_p3 = por %p2987_p10, %p2986_p11 }
 0x69b   : > { %p2984_p7 = pneg %p2983_p6 }
 0x69c   : > { %p2990_p13 = por %p2989_p12, %p2988_p3 }
 0x69e   : > { %p2991_p0 = pnand %p2990_p13, %p2984_p7 }
 0x6a0   : > { %2994 = shalt.err (!%p2991_p0)
}
 0x6a1   : > { %s3134_s10 = smov 128   ;;  %s3135_s29 = smov 8  }
 0x6a2   : > { %2439 = dma.vmem_to_hbm [thread:$0]  (%p5282_p1), %s5003_s0, 2048, %s5000_s12, %s2111_s15, %s3134_s10, %s3134_s10, %s3135_s29  }
 0x6a3 PF: > { %p2456_p9 = scmp.ge.s32.totalorder %s3121_s25, 2  ;;  %s2139_s28 = sand.u32 1, %s3093_s18  }
 0x6a4   : > { %p5283_p8 = scmp.ne.s32.totalorder %s5150_s8, 0  ;;  %s2140_s4 = scalar_lea.sflag [#allocation8], %s2139_s28 }
 0x6a6   : > { %p2452_p4 = pnand %p2456_p9, %p5283_p8 }
 0x6a8   : > { %3064 = dma.done.wait (!%p2452_p4), %s2140_s4, 2048  }
 0x6a9   : > { %3066 = vsyncadd (!%p2452_p4), %s2140_s4, 4294965248  ;;  %s22_s25 = sadd.s32 1, %s3121_s25   ;;  %s5285_s22 = sld [smem:[#allocation17_spill]] }
 0x6aa   : > { %p5034_p5 = scmp.ge.s32.totalorder %s22_s25, 6   ;;  %s5286_s17 = sld [smem:[#allocation22_spill]] }
 0x6ab   : > { %s5287_s0 = sld [smem:[#allocation24_spill]]  ;;  %s5288_s21 = sld [smem:[#allocation19_spill]] }
 0x6ac   : > { %s5289_s8 = sld [smem:[#allocation20_spill]]  ;;  %s5290_s23 = sld [smem:[#allocation21_spill]] }
 0x6ad   : > { %s5291_s9 = sld [smem:[#allocation23_spill]]  ;;  %s5293_s12 = smov %s3073_s13 }
 0x6ae   : > { %s5294_s13 = smov %s3077_s14  ;;  %s5295_s14 = smov %s3435_s1 }
 0x6af   : > { %s5296_s15 = smov %s3085_s16  ;;  %s5297_s16 = smov %s5285_s22 }
 0x6b0   : > { %s5298_s18 = smov %s3097_s19  ;;  %s5299_s19 = smov %s3101_s20 }
 0x6b1   : > { %s5300_s20 = smov %s5287_s0  ;;  %21 = sbr.rel (!%p5034_p5) target bundleno = 16 (0x10), region = 109 }
 0x6b2   : > { %s5301_s22 = smov %s5289_s8 }
 0x6b3   : > { %s5302_s24 = smov %s5291_s9 }
 0x6b8   :  { %2145 = vsyncpa [#allocation7], 1 }
 0x6b9   :  { %2147 = vsyncpa [#allocation7 + $0x1], 1 }
 0x6ba   :  { %2148 = vsyncpa [#allocation10], 1 }
 0x6bb   :  { %2150 = vsyncpa [#allocation10 + $0x1], 1 }
 0x6bc   :  { %2151 = vsyncpa [#allocation8], 1 }
 0x6bd   :  { %2153 = vsyncpa [#allocation8 + $0x1], 1 }

</bundles_post_ra>
